<compile_context>
chip_gen: v7x
topology: tpu7x:2x2x1
jax: 0.10.0
libtpu: 0.0.40
codegen_flags: <defaults>
</compile_context>

<pallas_src>
import functools
import numpy as np
import jax
import jax.numpy as jnp
from jax.experimental import pallas as pl
from jax.experimental.pallas import tpu as pltpu

EPS = 1e-5
MAX_BLOCK = 512      # samples per grid step (lane dim)
F_CONV = 320         # rows of every expanded conv matmul (2 * Lh * Cout == 320 for all 3)
F_HALF = 160


# --------------------------------- kernel ---------------------------------
def ec_1dcnn_kernel(x_ref, w1_ref, w2_ref, w3_ref, pk_ref,
                    wf1_ref, bf1_ref, wf2_ref, bf2_ref, wf3_ref, bf3_ref,
                    out_ref):
    f32 = jnp.float32
    bf16 = jnp.bfloat16

    def post_conv(h, off):
        # bias + ReLU + eval-mode BN + MaxPool1d(2).
        # pk_ref rows [off, off+960) = bias | scale | shift, each (320, 1);
        # static sublane-aligned slices (no lane extraction).
        b = pk_ref[off:off + F_CONV]
        s = pk_ref[off + F_CONV:off + 2 * F_CONV]
        t = pk_ref[off + 2 * F_CONV:off + 3 * F_CONV]
        h = jnp.maximum(h + b, 0.0) * s + t
        # top half of h = even conv positions, bottom half = odd -> pool is a max
        return jnp.maximum(h[:F_HALF, :], h[F_HALF:, :])            # (160, BB)

    # ---- conv1: contract the shared length-40 axis of (320,40) x (BB,40) ----
    x_b = x_ref[...].astype(bf16)                                     # (BB, 40)
    h = jax.lax.dot_general(w1_ref[...], x_b,
                            dimension_numbers=(((1,), (1,)), ((), ())),
                            preferred_element_type=f32)               # (320, BB)
    a = post_conv(h, 0)                                               # (160, BB)

    # ---- conv2 / conv3 (pre-expanded banded matmuls) ----
    h = jnp.dot(w2_ref[...], a.astype(bf16), preferred_element_type=f32)
    a = post_conv(h, 960)
    h = jnp.dot(w3_ref[...], a.astype(bf16), preferred_element_type=f32)
    a = post_conv(h, 1920)

    # ---- fc1 (+ReLU); its BatchNorm is folded into wf2/bf2 ----
    a = jnp.maximum(jnp.dot(wf1_ref[...], a.astype(bf16),
                            preferred_element_type=f32) + bf1_ref[...], 0.0)   # (64, BB)
    # ---- fc2 (+ReLU); its BatchNorm is folded into wf3/bf3 ----
    a = jnp.maximum(jnp.dot(wf2_ref[...], a.astype(bf16),
                            preferred_element_type=f32) + bf2_ref[...], 0.0)   # (32, BB)
    # ---- fc3 ----
    out_ref[...] = (jnp.dot(wf3_ref[...], a.astype(bf16),
                            preferred_element_type=f32) + bf3_ref[...])        # (1, BB)


# --------------------------- one-time parameter packing (numpy) ---------------------------
def _conv_eo_weight_np(W, Lin):
    """Dense (2*Lh*Cout, Lin*Cin) matrix for Conv1d(k, pad=k//2, stride=1).
    Top half yields even output positions, bottom half odd positions.
    Input features ordered l*Cin + c; pooled output features j*Cout + c."""
    W = np.asarray(W, np.float32)
    Cout, Cin, K = W.shape
    pad = K // 2
    Fin = Lin * Cin
    M = np.zeros((Lin, Cout, Lin, Cin), np.float32)
    for k in range(K):
        for lo in range(Lin):
            li = lo + k - pad
            if 0 <= li < Lin:
                M[lo, :, li, :] = W[:, :, k]
    M = M.reshape(Lin, Cout, Fin)
    even = M[0::2].reshape(-1, Fin)        # (Lh*Cout, Fin), row = j*Cout + c
    odd = M[1::2].reshape(-1, Fin)
    return np.concatenate([even, odd], axis=0)           # (2*Lh*Cout, Fin)


def _bn_fold_np(bn):
    g, be, m, v = (np.asarray(q, np.float32) for q in bn)
    scale = g / np.sqrt(v + EPS)
    shift = be - m * scale
    return scale, shift


def _conv_pack_np(b, bn, reps):
    scale, shift = _bn_fold_np(bn)
    b = np.asarray(b, np.float32)
    return np.concatenate([np.tile(b, reps), np.tile(scale, reps), np.tile(shift, reps)])


def prepare_params(p):
    """One-time packing of raw PyTorch-layout params into kernel operands (numpy)."""
    asnp = lambda a: np.asarray(a, np.float32)

    w1 = _conv_eo_weight_np(p["W1"], 40)                   # (320, 40)
    w2 = _conv_eo_weight_np(p["W2"], 20)                   # (320, 160)
    w3 = _conv_eo_weight_np(p["W3"], 10)                   # (320, 160)

    pk = np.concatenate([
        _conv_pack_np(p["b1"], p["bn1"], 2 * 20),          # conv1: rows    0: 960
        _conv_pack_np(p["b2"], p["bn2"], 2 * 10),          # conv2: rows  960:1920
        _conv_pack_np(p["b3"], p["bn3"], 2 * 5),           # conv3: rows 1920:2880
    ]).reshape(-1, 1)                                      # (2880, 1)

    # torch Flatten of (B, 32, 5) is index c*5 + l; conv3 feature order is l*32 + c.
    perm = np.array([c * 5 + l for l in range(5) for c in range(32)], np.int32)
    wf1 = asnp(p["Wf1"])[:, perm]                          # (64, 160)
    bf1 = asnp(p["bf1"]).reshape(-1, 1)                    # (64, 1)

    # fold fc1-BN into fc2 and fc2-BN into fc3 (exact in eval mode)
    s1, t1 = _bn_fold_np(p["bnf1"])
    wf2 = asnp(p["Wf2"]) * s1[None, :]                     # (32, 64)
    bf2 = (asnp(p["bf2"]) + asnp(p["Wf2"]) @ t1).reshape(-1, 1)
    s2, t2 = _bn_fold_np(p["bnf2"])
    wf3 = asnp(p["Wf3"]) * s2[None, :]                     # (1, 32)
    bf3 = (asnp(p["bf3"]) + asnp(p["Wf3"]) @ t2).reshape(-1, 1)

    to_bf16 = lambda a: jnp.asarray(a, jnp.bfloat16)
    to_f32 = lambda a: jnp.asarray(a, jnp.float32)
    return (to_bf16(w1), to_bf16(w2), to_bf16(w3), to_f32(pk),
            to_bf16(wf1), to_f32(bf1), to_bf16(wf2), to_f32(bf2),
            to_bf16(wf3), to_f32(bf3))


# --------------------------------- wrapper ---------------------------------
def _choose_block(B, max_block):
    # lane-dim blocks are multiples of 128; aim for >=2 grid steps when B > 128
    # so both v7x TensorCores get work.
    half = -(-B // 2)
    half128 = -(-half // 128) * 128
    return int(max(128, min(max_block, half128)))


@functools.partial(jax.jit, static_argnames=("max_block",))
def ec_1dcnn_forward(x_ncl, packed, max_block=MAX_BLOCK):
    """x_ncl: (B, 1, 40) float32, PyTorch NCL layout.  packed = prepare_params(p).
    Returns (B, 1) float32."""
    (w1, w2, w3, pk, wf1, bf1, wf2, bf2, wf3, bf3) = packed
    B = x_ncl.shape[0]
    block_b = _choose_block(B, max_block)
    nb = -(-B // block_b)
    B_pad = nb * block_b

    x = x_ncl[:, 0, :].astype(jnp.float32)                 # (B, 40) -- no HBM transpose
    if B_pad != B:
        x = jnp.pad(x, ((0, B_pad - B), (0, 0)))

    params = (w1, w2, w3, pk, wf1, bf1, wf2, bf2, wf3, bf3)
    in_specs = [pl.BlockSpec((block_b, 40), lambda b: (b, 0))]
    in_specs += [pl.BlockSpec(q.shape, lambda b: (0, 0)) for q in params]
    out_specs = pl.BlockSpec((1, block_b), lambda b: (0, b))

    flops = 2 * (320 * 40 + 2 * 320 * 160 + 64 * 160 + 32 * 64 + 32) * B_pad
    bytes_accessed = int(x.size * 4 + B_pad * 4
                         + sum(int(q.size) * q.dtype.itemsize for q in params))

    out = pl.pallas_call(
        ec_1dcnn_kernel,
        out_shape=jax.ShapeDtypeStruct((1, B_pad), jnp.float32),
        grid_spec=pltpu.PrefetchScalarGridSpec(
            num_scalar_prefetch=0,
            grid=(nb,),
            in_specs=in_specs,
            out_specs=out_specs,
        ),
        compiler_params=pltpu.CompilerParams(
            dimension_semantics=("parallel",),
            vmem_limit_bytes=32 * 1024 * 1024,
        ),
        cost_estimate=pl.CostEstimate(flops=flops, transcendentals=0,
                                      bytes_accessed=bytes_accessed),
    )(x, *params)

    return out[0, :B].reshape(B, 1)


# --------------------- pure-JAX reference (for verification) ---------------------
def ref_forward(x, p):
    def conv(h, w, b):
        y = jax.lax.conv_general_dilated(
            h, w, window_strides=(1,), padding=[(2, 2)],
            dimension_numbers=("NCH", "OIH", "NCH"))
        return y + b[None, :, None]

    def bn_ncl(h, bn):
        g, be, m, v = bn
        return ((h - m[None, :, None]) / jnp.sqrt(v[None, :, None] + EPS)
                * g[None, :, None] + be[None, :, None])

    def bn_flat(h, bn):
        g, be, m, v = bn
        return (h - m) / jnp.sqrt(v + EPS) * g + be

    def pool(h):
        B_, C_, L_ = h.shape
        return h.reshape(B_, C_, L_ // 2, 2).max(axis=-1)

    h = pool(bn_ncl(jax.nn.relu(conv(x, p["W1"], p["b1"])), p["bn1"]))
    h = pool(bn_ncl(jax.nn.relu(conv(h, p["W2"], p["b2"])), p["bn2"]))
    h = pool(bn_ncl(jax.nn.relu(conv(h, p["W3"], p["b3"])), p["bn3"]))
    flat = h.reshape(h.shape[0], -1)                       # (B, 160), torch Flatten order
    f = bn_flat(jax.nn.relu(flat @ p["Wf1"].T + p["bf1"]), p["bnf1"])
    f = bn_flat(jax.nn.relu(f @ p["Wf2"].T + p["bf2"]), p["bnf2"])
    return f @ p["Wf3"].T + p["bf3"]


def init_params(key):
    ks = jax.random.split(key, 20)
    f32 = jnp.float32

    def nrm(k, shape, s):
        return s * jax.random.normal(k, shape, f32)

    def bn(k, c):
        k1, k2, k3, k4 = jax.random.split(k, 4)
        g = 1.0 + 0.1 * jax.random.normal(k1, (c,), f32)
        be = 0.05 * jax.random.normal(k2, (c,), f32)
        m = 0.1 * jax.random.normal(k3, (c,), f32)
        v = 0.8 + 0.2 * jax.random.uniform(k4, (c,), f32)
        return g, be, m, v

    return {
        "W1": nrm(ks[0], (8, 1, 5), 0.3),   "b1": nrm(ks[1], (8,), 0.05),
        "W2": nrm(ks[2], (16, 8, 5), 0.15), "b2": nrm(ks[3], (16,), 0.05),
        "W3": nrm(ks[4], (32, 16, 5), 0.1), "b3": nrm(ks[5], (32,), 0.05),
        "Wf1": nrm(ks[6], (64, 160), 0.08), "bf1": nrm(ks[7], (64,), 0.05),
        "Wf2": nrm(ks[8], (32, 64), 0.1),   "bf2": nrm(ks[9], (32,), 0.05),
        "Wf3": nrm(ks[10], (1, 32), 0.15),  "bf3": nrm(ks[11], (1,), 0.05),
        "bn1": bn(ks[12], 8), "bn2": bn(ks[13], 16), "bn3": bn(ks[14], 32),
        "bnf1": bn(ks[15], 64), "bnf2": bn(ks[16], 32),
    }


if __name__ == "__main__":
    key = jax.random.PRNGKey(0)
    k_x, k_x2, k_p = jax.random.split(key, 3)

    # fc1 expects 160 = 32 channels * 5 positions  ->  input length must be 40.
    params = init_params(k_p)
    packed = prepare_params(params)     # one-time packing, hoisted off the hot path

    # small batch (single 128-lane block)
    x = jax.random.normal(k_x, (2, 1, 40), jnp.float32)            # (B, C=1, L=40)
    out = jax.block_until_ready(ec_1dcnn_forward(x, packed))
    ref = ref_forward(x, params)
    assert out.shape == (2, 1), f"bad output shape {out.shape}"
    if not bool(jnp.allclose(out, ref, atol=5e-2, rtol=5e-2)):
        raise SystemExit(
            f"mismatch (B=2): max|d|={float(jnp.max(jnp.abs(out - ref)))}")

    # multi-block batch (2 grid steps -> exercises parallel grid + padded tail)
    x2 = jax.random.normal(k_x2, (300, 1, 40), jnp.float32)
    out2 = jax.block_until_ready(ec_1dcnn_forward(x2, packed))
    ref2 = ref_forward(x2, params)
    assert out2.shape == (300, 1), f"bad output shape {out2.shape}"
    if not bool(jnp.allclose(out2, ref2, atol=5e-2, rtol=5e-2)):
        raise SystemExit(
            f"mismatch (B=300): max|d|={float(jnp.max(jnp.abs(out2 - ref2)))}")

    print("KERNEL_OK")
</pallas_src>

<mosaic_0001>
module attributes {stable_mosaic.version = 11 : i64} {
  func.func @ec_1dcnn_kernel(%arg0: i32, %arg1: memref<128x40xf32, #tpu.memory_space<vmem>>, %arg2: memref<320x40xbf16, #tpu.memory_space<vmem>>, %arg3: memref<320x160xbf16, #tpu.memory_space<vmem>>, %arg4: memref<320x160xbf16, #tpu.memory_space<vmem>>, %arg5: memref<2880x1xf32, #tpu.memory_space<vmem>>, %arg6: memref<64x160xbf16, #tpu.memory_space<vmem>>, %arg7: memref<64x1xf32, #tpu.memory_space<vmem>>, %arg8: memref<32x64xbf16, #tpu.memory_space<vmem>>, %arg9: memref<32x1xf32, #tpu.memory_space<vmem>>, %arg10: memref<1x32xbf16, #tpu.memory_space<vmem>>, %arg11: memref<1x1xf32, #tpu.memory_space<vmem>>, %arg12: memref<1x128xf32, #tpu.memory_space<vmem>>) attributes {dimension_semantics = [#tpu.dimension_semantics<parallel>], iteration_bounds = array<i64: 1>, scalar_prefetch = 0 : i64, scratch_operands = 0 : i64, tpu.core_type = #tpu.core_type<tc>, window_params = [{transform_indices = @transform_0, window_bounds = array<i64: 128, 40>}, {pipeline_mode = #tpu.pipeline_mode<synchronous>, transform_indices = @transform_1, window_bounds = array<i64: 320, 40>}, {pipeline_mode = #tpu.pipeline_mode<synchronous>, transform_indices = @transform_2, window_bounds = array<i64: 320, 160>}, {pipeline_mode = #tpu.pipeline_mode<synchronous>, transform_indices = @transform_3, window_bounds = array<i64: 320, 160>}, {pipeline_mode = #tpu.pipeline_mode<synchronous>, transform_indices = @transform_4, window_bounds = array<i64: 2880, 1>}, {pipeline_mode = #tpu.pipeline_mode<synchronous>, transform_indices = @transform_5, window_bounds = array<i64: 64, 160>}, {pipeline_mode = #tpu.pipeline_mode<synchronous>, transform_indices = @transform_6, window_bounds = array<i64: 64, 1>}, {pipeline_mode = #tpu.pipeline_mode<synchronous>, transform_indices = @transform_7, window_bounds = array<i64: 32, 64>}, {pipeline_mode = #tpu.pipeline_mode<synchronous>, transform_indices = @transform_8, window_bounds = array<i64: 32, 1>}, {pipeline_mode = #tpu.pipeline_mode<synchronous>, transform_indices = @transform_9, window_bounds = array<i64: 1, 32>}, {pipeline_mode = #tpu.pipeline_mode<synchronous>, transform_indices = @transform_10, window_bounds = array<i64: 1, 1>}, {transform_indices = @transform_11, window_bounds = array<i64: 1, 128>}]} {
    %c0 = arith.constant 0 : index
    %c0_0 = arith.constant 0 : index
    %0 = vector.load %arg1[%c0, %c0_0] : memref<128x40xf32, #tpu.memory_space<vmem>>, vector<128x40xf32>
    %1 = arith.truncf %0 : vector<128x40xf32> to vector<128x40xbf16>
    %c0_1 = arith.constant 0 : index
    %c0_2 = arith.constant 0 : index
    %2 = vector.load %arg2[%c0_1, %c0_2] : memref<320x40xbf16, #tpu.memory_space<vmem>>, vector<320x40xbf16>
    %cst = arith.constant dense<0.000000e+00> : vector<320x128xf32>
    %3 = tpu.matmul %2, %1, %cst {dimension_numbers = #tpu.dot_dimension_numbers<[1], [1], [0], [0], [0, 0, 1, 0], [], []>} : vector<320x40xbf16>, vector<128x40xbf16>, vector<320x128xf32> -> vector<320x128xf32>
    %c0_3 = arith.constant 0 : index
    %c0_4 = arith.constant 0 : index
    %4 = vector.load %arg5[%c0_3, %c0_4] : memref<2880x1xf32, #tpu.memory_space<vmem>>, vector<320x1xf32>
    %c320 = arith.constant 320 : index
    %c0_5 = arith.constant 0 : index
    %5 = vector.load %arg5[%c320, %c0_5] : memref<2880x1xf32, #tpu.memory_space<vmem>>, vector<320x1xf32>
    %c640 = arith.constant 640 : index
    %c0_6 = arith.constant 0 : index
    %6 = vector.load %arg5[%c640, %c0_6] : memref<2880x1xf32, #tpu.memory_space<vmem>>, vector<320x1xf32>
    %7 = vector.broadcast %4 : vector<320x1xf32> to vector<320x128xf32>
    %8 = arith.addf %3, %7 : vector<320x128xf32>
    %cst_7 = arith.constant 0.000000e+00 : f32
    %9 = vector.broadcast %cst_7 : f32 to vector<320x128xf32>
    %10 = arith.maximumf %8, %9 : vector<320x128xf32>
    %11 = vector.broadcast %5 : vector<320x1xf32> to vector<320x128xf32>
    %12 = arith.mulf %10, %11 : vector<320x128xf32>
    %13 = vector.broadcast %6 : vector<320x1xf32> to vector<320x128xf32>
    %14 = arith.addf %12, %13 : vector<320x128xf32>
    %15 = vector.extract_strided_slice %14 {offsets = [0, 0], sizes = [160, 128], strides = [1, 1]} : vector<320x128xf32> to vector<160x128xf32>
    %16 = vector.extract_strided_slice %14 {offsets = [160, 0], sizes = [160, 128], strides = [1, 1]} : vector<320x128xf32> to vector<160x128xf32>
    %17 = arith.maximumf %15, %16 : vector<160x128xf32>
    %c0_8 = arith.constant 0 : index
    %c0_9 = arith.constant 0 : index
    %18 = vector.load %arg3[%c0_8, %c0_9] : memref<320x160xbf16, #tpu.memory_space<vmem>>, vector<320x160xbf16>
    %19 = arith.truncf %17 : vector<160x128xf32> to vector<160x128xbf16>
    %cst_10 = arith.constant dense<0.000000e+00> : vector<320x128xf32>
    %20 = tpu.matmul %18, %19, %cst_10 {dimension_numbers = #tpu.dot_dimension_numbers<[1], [0], [0], [1], [0, 0, 1, 1], [], []>} : vector<320x160xbf16>, vector<160x128xbf16>, vector<320x128xf32> -> vector<320x128xf32>
    %c960 = arith.constant 960 : index
    %c0_11 = arith.constant 0 : index
    %21 = vector.load %arg5[%c960, %c0_11] : memref<2880x1xf32, #tpu.memory_space<vmem>>, vector<320x1xf32>
    %c1280 = arith.constant 1280 : index
    %c0_12 = arith.constant 0 : index
    %22 = vector.load %arg5[%c1280, %c0_12] : memref<2880x1xf32, #tpu.memory_space<vmem>>, vector<320x1xf32>
    %c1600 = arith.constant 1600 : index
    %c0_13 = arith.constant 0 : index
    %23 = vector.load %arg5[%c1600, %c0_13] : memref<2880x1xf32, #tpu.memory_space<vmem>>, vector<320x1xf32>
    %24 = vector.broadcast %21 : vector<320x1xf32> to vector<320x128xf32>
    %25 = arith.addf %20, %24 : vector<320x128xf32>
    %cst_14 = arith.constant 0.000000e+00 : f32
    %26 = vector.broadcast %cst_14 : f32 to vector<320x128xf32>
    %27 = arith.maximumf %25, %26 : vector<320x128xf32>
    %28 = vector.broadcast %22 : vector<320x1xf32> to vector<320x128xf32>
    %29 = arith.mulf %27, %28 : vector<320x128xf32>
    %30 = vector.broadcast %23 : vector<320x1xf32> to vector<320x128xf32>
    %31 = arith.addf %29, %30 : vector<320x128xf32>
    %32 = vector.extract_strided_slice %31 {offsets = [0, 0], sizes = [160, 128], strides = [1, 1]} : vector<320x128xf32> to vector<160x128xf32>
    %33 = vector.extract_strided_slice %31 {offsets = [160, 0], sizes = [160, 128], strides = [1, 1]} : vector<320x128xf32> to vector<160x128xf32>
    %34 = arith.maximumf %32, %33 : vector<160x128xf32>
    %c0_15 = arith.constant 0 : index
    %c0_16 = arith.constant 0 : index
    %35 = vector.load %arg4[%c0_15, %c0_16] : memref<320x160xbf16, #tpu.memory_space<vmem>>, vector<320x160xbf16>
    %36 = arith.truncf %34 : vector<160x128xf32> to vector<160x128xbf16>
    %cst_17 = arith.constant dense<0.000000e+00> : vector<320x128xf32>
    %37 = tpu.matmul %35, %36, %cst_17 {dimension_numbers = #tpu.dot_dimension_numbers<[1], [0], [0], [1], [0, 0, 1, 1], [], []>} : vector<320x160xbf16>, vector<160x128xbf16>, vector<320x128xf32> -> vector<320x128xf32>
    %c1920 = arith.constant 1920 : index
    %c0_18 = arith.constant 0 : index
    %38 = vector.load %arg5[%c1920, %c0_18] : memref<2880x1xf32, #tpu.memory_space<vmem>>, vector<320x1xf32>
    %c2240 = arith.constant 2240 : index
    %c0_19 = arith.constant 0 : index
    %39 = vector.load %arg5[%c2240, %c0_19] : memref<2880x1xf32, #tpu.memory_space<vmem>>, vector<320x1xf32>
    %c2560 = arith.constant 2560 : index
    %c0_20 = arith.constant 0 : index
    %40 = vector.load %arg5[%c2560, %c0_20] : memref<2880x1xf32, #tpu.memory_space<vmem>>, vector<320x1xf32>
    %41 = vector.broadcast %38 : vector<320x1xf32> to vector<320x128xf32>
    %42 = arith.addf %37, %41 : vector<320x128xf32>
    %cst_21 = arith.constant 0.000000e+00 : f32
    %43 = vector.broadcast %cst_21 : f32 to vector<320x128xf32>
    %44 = arith.maximumf %42, %43 : vector<320x128xf32>
    %45 = vector.broadcast %39 : vector<320x1xf32> to vector<320x128xf32>
    %46 = arith.mulf %44, %45 : vector<320x128xf32>
    %47 = vector.broadcast %40 : vector<320x1xf32> to vector<320x128xf32>
    %48 = arith.addf %46, %47 : vector<320x128xf32>
    %49 = vector.extract_strided_slice %48 {offsets = [0, 0], sizes = [160, 128], strides = [1, 1]} : vector<320x128xf32> to vector<160x128xf32>
    %50 = vector.extract_strided_slice %48 {offsets = [160, 0], sizes = [160, 128], strides = [1, 1]} : vector<320x128xf32> to vector<160x128xf32>
    %51 = arith.maximumf %49, %50 : vector<160x128xf32>
    %c0_22 = arith.constant 0 : index
    %c0_23 = arith.constant 0 : index
    %52 = vector.load %arg6[%c0_22, %c0_23] : memref<64x160xbf16, #tpu.memory_space<vmem>>, vector<64x160xbf16>
    %53 = arith.truncf %51 : vector<160x128xf32> to vector<160x128xbf16>
    %cst_24 = arith.constant dense<0.000000e+00> : vector<64x128xf32>
    %54 = tpu.matmul %52, %53, %cst_24 {dimension_numbers = #tpu.dot_dimension_numbers<[1], [0], [0], [1], [0, 0, 1, 1], [], []>} : vector<64x160xbf16>, vector<160x128xbf16>, vector<64x128xf32> -> vector<64x128xf32>
    %c0_25 = arith.constant 0 : index
    %c0_26 = arith.constant 0 : index
    %55 = vector.load %arg7[%c0_25, %c0_26] : memref<64x1xf32, #tpu.memory_space<vmem>>, vector<64x1xf32>
    %56 = vector.broadcast %55 : vector<64x1xf32> to vector<64x128xf32>
    %57 = arith.addf %54, %56 : vector<64x128xf32>
    %cst_27 = arith.constant 0.000000e+00 : f32
    %58 = vector.broadcast %cst_27 : f32 to vector<64x128xf32>
    %59 = arith.maximumf %57, %58 : vector<64x128xf32>
    %c0_28 = arith.constant 0 : index
    %c0_29 = arith.constant 0 : index
    %60 = vector.load %arg8[%c0_28, %c0_29] : memref<32x64xbf16, #tpu.memory_space<vmem>>, vector<32x64xbf16>
    %61 = arith.truncf %59 : vector<64x128xf32> to vector<64x128xbf16>
    %cst_30 = arith.constant dense<0.000000e+00> : vector<32x128xf32>
    %62 = tpu.matmul %60, %61, %cst_30 {dimension_numbers = #tpu.dot_dimension_numbers<[1], [0], [0], [1], [0, 0, 1, 1], [], []>} : vector<32x64xbf16>, vector<64x128xbf16>, vector<32x128xf32> -> vector<32x128xf32>
    %c0_31 = arith.constant 0 : index
    %c0_32 = arith.constant 0 : index
    %63 = vector.load %arg9[%c0_31, %c0_32] : memref<32x1xf32, #tpu.memory_space<vmem>>, vector<32x1xf32>
    %64 = vector.broadcast %63 : vector<32x1xf32> to vector<32x128xf32>
    %65 = arith.addf %62, %64 : vector<32x128xf32>
    %cst_33 = arith.constant 0.000000e+00 : f32
    %66 = vector.broadcast %cst_33 : f32 to vector<32x128xf32>
    %67 = arith.maximumf %65, %66 : vector<32x128xf32>
    %c0_34 = arith.constant 0 : index
    %c0_35 = arith.constant 0 : index
    %68 = vector.load %arg10[%c0_34, %c0_35] : memref<1x32xbf16, #tpu.memory_space<vmem>>, vector<1x32xbf16>
    %69 = arith.truncf %67 : vector<32x128xf32> to vector<32x128xbf16>
    %cst_36 = arith.constant dense<0.000000e+00> : vector<1x128xf32>
    %70 = tpu.matmul %68, %69, %cst_36 {dimension_numbers = #tpu.dot_dimension_numbers<[1], [0], [0], [1], [0, 0, 1, 1], [], []>} : vector<1x32xbf16>, vector<32x128xbf16>, vector<1x128xf32> -> vector<1x128xf32>
    %c0_37 = arith.constant 0 : index
    %c0_38 = arith.constant 0 : index
    %71 = vector.load %arg11[%c0_37, %c0_38] : memref<1x1xf32, #tpu.memory_space<vmem>>, vector<1x1xf32>
    %72 = vector.broadcast %71 : vector<1x1xf32> to vector<1x128xf32>
    %73 = arith.addf %70, %72 : vector<1x128xf32>
    %c0_39 = arith.constant 0 : index
    %c0_40 = arith.constant 0 : index
    %74 = vector.load %arg12[%c0_39, %c0_40] : memref<1x128xf32, #tpu.memory_space<vmem>>, vector<1x128xf32>
    tpu.vector_store %arg12[%c0_39, %c0_40], %73 {strides = array<i32>} : memref<1x128xf32, #tpu.memory_space<vmem>>, vector<1x128xf32>,
    return
  }
  func.func @transform_0(%arg0: i32) -> (i32, i32) {
    %c0_i32 = arith.constant 0 : i32
    %c0_i32_0 = arith.constant 0 : i32
    return %arg0, %c0_i32 : i32, i32
  }
  func.func @transform_1(%arg0: i32) -> (i32, i32) {
    %c0_i32 = arith.constant 0 : i32
    %c0_i32_0 = arith.constant 0 : i32
    %c0_i32_1 = arith.constant 0 : i32
    return %c0_i32, %c0_i32_0 : i32, i32
  }
  func.func @transform_2(%arg0: i32) -> (i32, i32) {
    %c0_i32 = arith.constant 0 : i32
    %c0_i32_0 = arith.constant 0 : i32
    %c0_i32_1 = arith.constant 0 : i32
    return %c0_i32, %c0_i32_0 : i32, i32
  }
  func.func @transform_3(%arg0: i32) -> (i32, i32) {
    %c0_i32 = arith.constant 0 : i32
    %c0_i32_0 = arith.constant 0 : i32
    %c0_i32_1 = arith.constant 0 : i32
    return %c0_i32, %c0_i32_0 : i32, i32
  }
  func.func @transform_4(%arg0: i32) -> (i32, i32) {
    %c0_i32 = arith.constant 0 : i32
    %c0_i32_0 = arith.constant 0 : i32
    %c0_i32_1 = arith.constant 0 : i32
    return %c0_i32, %c0_i32_0 : i32, i32
  }
  func.func @transform_5(%arg0: i32) -> (i32, i32) {
    %c0_i32 = arith.constant 0 : i32
    %c0_i32_0 = arith.constant 0 : i32
    %c0_i32_1 = arith.constant 0 : i32
    return %c0_i32, %c0_i32_0 : i32, i32
  }
  func.func @transform_6(%arg0: i32) -> (i32, i32) {
    %c0_i32 = arith.constant 0 : i32
    %c0_i32_0 = arith.constant 0 : i32
    %c0_i32_1 = arith.constant 0 : i32
    return %c0_i32, %c0_i32_0 : i32, i32
  }
  func.func @transform_7(%arg0: i32) -> (i32, i32) {
    %c0_i32 = arith.constant 0 : i32
    %c0_i32_0 = arith.constant 0 : i32
    %c0_i32_1 = arith.constant 0 : i32
    return %c0_i32, %c0_i32_0 : i32, i32
  }
  func.func @transform_8(%arg0: i32) -> (i32, i32) {
    %c0_i32 = arith.constant 0 : i32
    %c0_i32_0 = arith.constant 0 : i32
    %c0_i32_1 = arith.constant 0 : i32
    return %c0_i32, %c0_i32_0 : i32, i32
  }
  func.func @transform_9(%arg0: i32) -> (i32, i32) {
    %c0_i32 = arith.constant 0 : i32
    %c0_i32_0 = arith.constant 0 : i32
    %c0_i32_1 = arith.constant 0 : i32
    return %c0_i32, %c0_i32_0 : i32, i32
  }
  func.func @transform_10(%arg0: i32) -> (i32, i32) {
    %c0_i32 = arith.constant 0 : i32
    %c0_i32_0 = arith.constant 0 : i32
    %c0_i32_1 = arith.constant 0 : i32
    return %c0_i32, %c0_i32_0 : i32, i32
  }
  func.func @transform_11(%arg0: i32) -> (i32, i32) {
    %c0_i32 = arith.constant 0 : i32
    %c0_i32_0 = arith.constant 0 : i32
    return %c0_i32, %arg0 : i32, i32
  }
}

</mosaic_0001>

<bundles_post_ra>
// kernel: ec_1dcnn_forward.1
= control target key start
LH: loop header
LB: loop body
LE: loop exit
PB: predicated region body
PF: predicated region fallthrough
CT: control target
= control target key end

     0   :  { %v7721_v0 = vmov 0   ;;  %vm525_vm0 = vcmask 326656   ;;  %vm1893_vm1 = vcmask 261120   ;;  %vm4259_vm2 = vcmask 523264   ;;  %s7709_s4 = inlined_call_operand.vmem [shape: f32[2880,1], index: 4, kind: input, shape index: {}]   ;;  %s7710_s0 = inlined_call_operand.vmem [shape: f32[128,40], index: 0, kind: input, shape index: {}]   ;;  %s7711_s1 = inlined_call_operand.vmem [shape: bf16[320,40], index: 1, kind: input, shape index: {}]   ;;  %s7712_s2 = inlined_call_operand.vmem [shape: bf16[320,160], index: 2, kind: input, shape index: {}]   ;;  %s7713_s10 = inlined_call_operand.<no memory space> [shape: f32[1,1], index: 10, kind: input, shape index: {}]   ;;  %s7714_s3 = inlined_call_operand.vmem [shape: bf16[320,160], index: 3, kind: input, shape index: {}]   ;;  %s7715_s6 = inlined_call_operand.vmem [shape: f32[64,1], index: 6, kind: input, shape index: {}]   ;;  %s7716_s8 = inlined_call_operand.vmem [shape: f32[32,1], index: 8, kind: input, shape index: {}]   ;;  %s7717_s5 = inlined_call_operand.vmem [shape: bf16[64,160], index: 5, kind: input, shape index: {}]   ;;  %s7718_s7 = inlined_call_operand.vmem [shape: bf16[32,64], index: 7, kind: input, shape index: {}]   ;;  %s7719_s9 = inlined_call_operand.vmem [shape: bf16[1,32], index: 9, kind: input, shape index: {}]   ;;  %s7720_s11 = inlined_call_operand.vmem [shape: f32[1,128], index: 11, kind: output, shape index: {}]  }
   0x1   :  { %4682 = vset.pattern.permute.xlu1 %v7721_v0  ;;  %4681 = vset.pattern.permute.xlu0 %v7721_v0  ;;  %v125_v1 = vld [vmem:[%s7709_s4 + $0xa0] sm:$0xff]  ;;  %v42_v4 = vld [vmem:[%s7710_s0 + $0x8] sm:$0xff]  ;;  %v43_v7 = vld [vmem:[%s7710_s0 + $0x10] sm:$0xff]  ;;  %vm4839_vm3 = vmmov 0  }
   0x2   :  { %v105_v2 = vld [vmem:[%s7709_s4] sm:$0xff]  ;;  %327 = vperm.xlu1 %4682, %v125_v1   ;;  %v126_v6 = vld [vmem:[%s7709_s4 + $0xa8] sm:$0xff]  ;;  %1954 = vmatprep.subr.bf16.mxu1 %v7721_v0  ;;  %v44_v9 = vld [vmem:[%s7710_s0 + $0x18] sm:$0xff] }
   0x3   :  { %v41_v3 = vld [vmem:[%s7710_s0] sm:$0xff]  ;;  %227 = vperm.xlu0 %4681, %v105_v2   ;;  %v106_v8 = vld [vmem:[%s7709_s4 + $0x8] sm:$0xff]  ;;  %v58_v11 = vpack.c.bf16 %v44_v9, %v43_v7  ;;  %v108_v12 = vld [vmem:[%s7709_s4 + $0x18] sm:$0xff] }
   0x4   :  { %v57_v5 = vpack.c.bf16 %v42_v4, %v41_v3  ;;  %v107_v13 = vld [vmem:[%s7709_s4 + $0x10] sm:$0xff]  ;;  %v45_v14 = vld [vmem:[%s7710_s0 + $0x20] sm:$0xff]  ;;  %v46_v15 = vld [vmem:[%s7710_s0 + $0x28] sm:$0xff] }
   0x5   :  { %v590_v16 = vsel %vm525_vm0, %v58_v11, 0  ;;  %v128_v17 = vld [vmem:[%s7709_s4 + $0xb8] sm:$0xff]  ;;  %v59_v18 = vpack.c.bf16 %v46_v15, %v45_v14  ;;  %v127_v19 = vld [vmem:[%s7709_s4 + $0xb0] sm:$0xff]  ;;  %v146_v20 = vld [vmem:[%s7709_s4 + $0x148] sm:$0xff] }
   0x6   :  { %4670 = vmatprep.subr.msk.bf16.mxu0 %vm525_vm0, %v57_v5  ;;  %v587_v10 = vsel %vm525_vm0, %v57_v5, 0  ;;  %332 = vperm.xlu1 %4682, %v126_v6   ;;  %v145_v21 = vld [vmem:[%s7709_s4 + $0x140] sm:$0xff]  ;;  %v47_v22 = vld [vmem:[%s7710_s0 + $0x30] sm:$0xff]  ;;  %v48_v23 = vld [vmem:[%s7710_s0 + $0x38] sm:$0xff] }
   0x7   :  { %4595 = vmatpush3.bf16.xpose.msra.mxu0 %v587_v10  ;;  %232 = vperm.xlu0 %4681, %v106_v8   ;;  %v4683_v24 = vld [vmem:[%s7711_s1] sm:$0xff]   ;;  %v593_v25 = vsel %vm525_vm0, %v59_v18, 0  ;;  %v166_v26 = vld [vmem:[%s7709_s4 + $0x1e8] sm:$0xff]  ;;  %v60_v27 = vpack.c.bf16 %v48_v23, %v47_v22  ;;  %v51_v39 = vld [vmem:[%s7710_s0 + $0x50] sm:$0xff] }
   0x8   :  { %4671 = vmatprep.subr.msk.bf16.mxu0 %vm525_vm0, %v58_v11  ;;  %v165_v28 = vld [vmem:[%s7709_s4 + $0x1e0] sm:$0xff]  ;;  %4610 = vmatprep.mubr.msk.bf16.mxu0 %vm525_vm0, %v4683_v24  ;;  %v186_v29 = vld [vmem:[%s7709_s4 + $0x288] sm:$0xff]  ;;  %v52_v40 = vld [vmem:[%s7710_s0 + $0x58] sm:$0xff] }
   0x9   :  { %v185_v30 = vld [vmem:[%s7709_s4 + $0x280] sm:$0xff]  ;;  %v50_v32 = vld [vmem:[%s7710_s0 + $0x48] sm:$0xff]  ;;  %v596_v33 = vsel %vm525_vm0, %v60_v27, 0  ;;  %v62_v43 = vpack.c.bf16 %v52_v40, %v51_v39  ;;  %v148_v45 = vld [vmem:[%s7709_s4 + $0x158] sm:$0xff] }
   0xa   :  { %242 = vperm.xlu1 %4682, %v108_v12   ;;  %v49_v31 = vld [vmem:[%s7710_s0 + $0x40] sm:$0xff]  ;;  %v206_v34 = vld [vmem:[%s7709_s4 + $0x328] sm:$0xff]  ;;  %v147_v46 = vld [vmem:[%s7709_s4 + $0x150] sm:$0xff] }
   0xb   :  { %237 = vperm.xlu0 %4681, %v107_v13   ;;  %v61_v35 = vpack.c.bf16 %v50_v32, %v49_v31  ;;  %v205_v36 = vld [vmem:[%s7709_s4 + $0x320] sm:$0xff]  ;;  %v110_v37 = vld [vmem:[%s7709_s4 + $0x28] sm:$0xff]  ;;  %v602_v49 = vsel %vm525_vm0, %v62_v43, 0  ;;  %v168_v50 = vld [vmem:[%s7709_s4 + $0x1f8] sm:$0xff] }
   0xc   :  { %v109_v38 = vld [vmem:[%s7709_s4 + $0x20] sm:$0xff]  ;;  %v130_v42 = vld [vmem:[%s7709_s4 + $0xc8] sm:$0xff]  ;;  %v167_v52 = vld [vmem:[%s7709_s4 + $0x1f0] sm:$0xff] }
   0xd   :  { %v599_v41 = vsel %vm525_vm0, %v61_v35, 0  ;;  %v129_v44 = vld [vmem:[%s7709_s4 + $0xc0] sm:$0xff]  ;;  %v54_v48 = vld [vmem:[%s7710_s0 + $0x68] sm:$0xff]  ;;  %v188_v53 = vld [vmem:[%s7709_s4 + $0x298] sm:$0xff] }
   0xe   :  { %342 = vperm.xlu1 %4682, %v128_v17   ;;  %v53_v47 = vld [vmem:[%s7710_s0 + $0x60] sm:$0xff]  ;;  %v187_v54 = vld [vmem:[%s7709_s4 + $0x290] sm:$0xff]  ;;  %v56_v56 = vld [vmem:[%s7710_s0 + $0x78] sm:$0xff] }
   0xf   :  { %4597 = vmatpush3.bf16.xpose.msra.mxu0 %v590_v16  ;;  %337 = vperm.xlu0 %4681, %v127_v19   ;;  %v63_v51 = vpack.c.bf16 %v54_v48, %v53_v47  ;;  %v55_v55 = vld [vmem:[%s7710_s0 + $0x70] sm:$0xff]  ;;  %v208_v58 = vld [vmem:[%s7709_s4 + $0x338] sm:$0xff]  ;;  %v150_v3 = vld [vmem:[%s7709_s4 + $0x168] sm:$0xff] }
  0x10   :  { %4672 = vmatprep.subr.msk.bf16.mxu0 %vm525_vm0, %v59_v18  ;;  %v64_v59 = vpack.c.bf16 %v56_v56, %v55_v55  ;;  %v207_v60 = vld [vmem:[%s7709_s4 + $0x330] sm:$0xff]  ;;  %v112_v61 = vld [vmem:[%s7709_s4 + $0x38] sm:$0xff]  ;;  %v149_v4 = vld [vmem:[%s7709_s4 + $0x160] sm:$0xff] }
  0x11   :  { %v605_v57 = vsel %vm525_vm0, %v63_v51, 0  ;;  %v111_v62 = vld [vmem:[%s7709_s4 + $0x30] sm:$0xff]  ;;  %v132_v1 = vld [vmem:[%s7709_s4 + $0xd8] sm:$0xff]  ;;  %v4684_v5 = vld [vmem:[%s7711_s1 + $0x8] sm:$0xff]  }
  0x12   :  { %850 = vperm.xlu1 %4682, %v146_v20   ;;  %v608_v63 = vsel %vm525_vm0, %v64_v59, 0  ;;  %v131_v2 = vld [vmem:[%s7709_s4 + $0xd0] sm:$0xff]  ;;  %v170_v7 = vld [vmem:[%s7709_s4 + $0x208] sm:$0xff]  ;;  %v169_v8 = vld [vmem:[%s7709_s4 + $0x200] sm:$0xff] }
  0x13   :  { %845 = vperm.xlu0 %4681, %v145_v21   ;;  %v4685_v6 = vld [vmem:[%s7711_s1 + $0x10] sm:$0xff]   ;;  %v190_v9 = vld [vmem:[%s7709_s4 + $0x2a8] sm:$0xff]  ;;  %v189_v10 = vld [vmem:[%s7709_s4 + $0x2a0] sm:$0xff] }
  0x14   :  { %v4686_v11 = vld [vmem:[%s7711_s1 + $0x18] sm:$0xff]   ;;  %v4687_v12 = vld [vmem:[%s7711_s1 + $0x20] sm:$0xff]   ;;  %v210_v13 = vld [vmem:[%s7709_s4 + $0x348] sm:$0xff] }
  0x15   :  { %v209_v14 = vld [vmem:[%s7709_s4 + $0x340] sm:$0xff]  ;;  %v114_v15 = vld [vmem:[%s7709_s4 + $0x48] sm:$0xff]  ;;  %v4689_v18 = vld [vmem:[%s7711_s1 + $0x30] sm:$0xff]  }
  0x16   :  { %950 = vperm.xlu1 %4682, %v166_v26   ;;  %v113_v16 = vld [vmem:[%s7709_s4 + $0x40] sm:$0xff]  ;;  %v4688_v17 = vld [vmem:[%s7711_s1 + $0x28] sm:$0xff]   ;;  %v152_v21 = vld [vmem:[%s7709_s4 + $0x178] sm:$0xff] }
  0x17   :  { %4599 = vmatpush3.bf16.xpose.msra.mxu0 %v593_v25  ;;  %945 = vperm.xlu0 %4681, %v165_v28   ;;  %v134_v19 = vld [vmem:[%s7709_s4 + $0xe8] sm:$0xff]  ;;  %v133_v20 = vld [vmem:[%s7709_s4 + $0xe0] sm:$0xff]  ;;  %v151_v22 = vld [vmem:[%s7709_s4 + $0x170] sm:$0xff] }
  0x18   :  { %4673 = vmatprep.subr.msk.bf16.mxu0 %vm525_vm0, %v60_v27  ;;  %v4690_v23 = vld [vmem:[%s7711_s1 + $0x38] sm:$0xff]   ;;  %v4691_v24 = vld [vmem:[%s7711_s1 + $0x40] sm:$0xff]   ;;  %v171_v26 = vld [vmem:[%s7709_s4 + $0x210] sm:$0xff] }
  0x19   :  { %v172_v25 = vld [vmem:[%s7709_s4 + $0x218] sm:$0xff]  ;;  %v191_v28 = vld [vmem:[%s7709_s4 + $0x2b0] sm:$0xff]  ;;  %v154_v39 = vld [vmem:[%s7709_s4 + $0x188] sm:$0xff] }
  0x1a   :  { %1090 = vperm.xlu1 %4682, %v186_v29   ;;  %v192_v27 = vld [vmem:[%s7709_s4 + $0x2b8] sm:$0xff]  ;;  %v4692_v29 = vld [vmem:[%s7711_s1 + $0x48] sm:$0xff]   ;;  %v211_v32 = vld [vmem:[%s7709_s4 + $0x350] sm:$0xff] }
  0x1b   :  { %1085 = vperm.xlu0 %4681, %v185_v30   ;;  %v4693_v30 = vld [vmem:[%s7711_s1 + $0x50] sm:$0xff]   ;;  %v212_v31 = vld [vmem:[%s7709_s4 + $0x358] sm:$0xff]  ;;  %v153_v40 = vld [vmem:[%s7709_s4 + $0x180] sm:$0xff] }
  0x1c   :  { %v4698_v47 = vld [vmem:[%s7711_s1 + $0x78] sm:$0xff]   ;;  %v4699_v48 = vld [vmem:[%s7711_s1 + $0x80] sm:$0xff]   ;;  %v4700_v55 = vld [vmem:[%s7711_s1 + $0x88] sm:$0xff]  }
  0x1d   :  { %v4701_v56 = vld [vmem:[%s7711_s1 + $0x90] sm:$0xff]  }
  0x1e   :  { %1190 = vperm.xlu1 %4682, %v206_v34   ;;  %v115_v34 = vld [vmem:[%s7709_s4 + $0x50] sm:$0xff] }
  0x1f   :  { %4601 = vmatpush3.bf16.xpose.msra.mxu0 %v596_v33  ;;  %1185 = vperm.xlu0 %4681, %v205_v36   ;;  %v116_v33 = vld [vmem:[%s7709_s4 + $0x58] sm:$0xff]  ;;  %v4695_v36 = vld [vmem:[%s7711_s1 + $0x60] sm:$0xff]  }
  0x20   :  { %4674 = vmatprep.subr.msk.bf16.mxu0 %vm525_vm0, %v61_v35  ;;  %v4694_v35 = vld [vmem:[%s7711_s1 + $0x58] sm:$0xff]  }
  0x22   :  { %252 = vperm.xlu1 %4682, %v110_v37   ;;  %v136_v37 = vld [vmem:[%s7709_s4 + $0xf8] sm:$0xff] }
  0x23   :  { %247 = vperm.xlu0 %4681, %v109_v38   ;;  %v135_v38 = vld [vmem:[%s7709_s4 + $0xf0] sm:$0xff] }
  0x26   :  { %352 = vperm.xlu1 %4682, %v130_v42   ;;  %v4697_v42 = vld [vmem:[%s7711_s1 + $0x70] sm:$0xff]  }
  0x27   :  { %4603 = vmatpush3.bf16.xpose.msra.mxu0 %v599_v41  ;;  %347 = vperm.xlu0 %4681, %v129_v44   ;;  %v4696_v41 = vld [vmem:[%s7711_s1 + $0x68] sm:$0xff]   ;;  %v173_v44 = vld [vmem:[%s7709_s4 + $0x220] sm:$0xff] }
  0x28   :  { %4675 = vmatprep.subr.msk.bf16.mxu0 %vm525_vm0, %v62_v43  ;;  %v174_v43 = vld [vmem:[%s7709_s4 + $0x228] sm:$0xff] }
  0x2a   :  { %860 = vperm.xlu1 %4682, %v148_v45   ;;  %v194_v45 = vld [vmem:[%s7709_s4 + $0x2c8] sm:$0xff] }
  0x2b   :  { %855 = vperm.xlu0 %4681, %v147_v46   ;;  %v193_v46 = vld [vmem:[%s7709_s4 + $0x2c0] sm:$0xff] }
  0x2e   :  { %960 = vperm.xlu1 %4682, %v168_v50   ;;  %v213_v50 = vld [vmem:[%s7709_s4 + $0x360] sm:$0xff] }
  0x2f   :  { %4605 = vmatpush3.bf16.xpose.msra.mxu0 %v602_v49  ;;  %955 = vperm.xlu0 %4681, %v167_v52   ;;  %v214_v49 = vld [vmem:[%s7709_s4 + $0x368] sm:$0xff]  ;;  %v117_v52 = vld [vmem:[%s7709_s4 + $0x60] sm:$0xff] }
  0x30   :  { %4676 = vmatprep.subr.msk.bf16.mxu0 %vm525_vm0, %v63_v51  ;;  %v118_v51 = vld [vmem:[%s7709_s4 + $0x68] sm:$0xff] }
  0x32   :  { %1100 = vperm.xlu1 %4682, %v188_v53  }
  0x33   :  { %1095 = vperm.xlu0 %4681, %v187_v54  }
  0x36   :  { %1200 = vperm.xlu1 %4682, %v208_v58   ;;  %v137_v58 = vld [vmem:[%s7709_s4 + $0x100] sm:$0xff] }
  0x37   :  { %4607 = vmatpush3.bf16.xpose.msra.mxu0 %v605_v57  ;;  %1195 = vperm.xlu0 %4681, %v207_v60   ;;  %v138_v57 = vld [vmem:[%s7709_s4 + $0x108] sm:$0xff] }
  0x38   :  { %4677 = vmatprep.subr.msk.bf16.mxu0 %vm525_vm0, %v64_v59 }
  0x3a   :  { %262 = vperm.xlu1 %4682, %v112_v61   ;;  %v156_v61 = vld [vmem:[%s7709_s4 + $0x198] sm:$0xff] }
  0x3b   :  { %257 = vperm.xlu0 %4681, %v111_v62   ;;  %v155_v62 = vld [vmem:[%s7709_s4 + $0x190] sm:$0xff] }
  0x3e   :  { %362 = vperm.xlu1 %4682, %v132_v1   ;;  %v4702_v1 = vld [vmem:[%s7711_s1 + $0x98] sm:$0xff]  }
  0x3f   :  { %4609 = vmatpush3.bf16.xpose.msra.mxu0 %v608_v63  ;;  %357 = vperm.xlu0 %4681, %v131_v2  }
  0x40   :  { %3297 = vmatprep.subr.bf16.mxu0 %v7721_v0  ;;  %v4705_v0 = vld [vmem:[%s7712_s2 + $0x4] ss:$8 sps:$4 sm:$0xff]  }
  0x41   :  { %4460 = vmatprep.mubr.msk.bf16.mxu1 %vm1893_vm1, %v4705_v0  ;;  %v1434_v0 = vld [vmem:[%s7709_s4 + $0x508] sm:$0xff] }
  0x42   :  { %870 = vperm.xlu1 %4682, %v150_v3   ;;  %v176_v3 = vld [vmem:[%s7709_s4 + $0x238] sm:$0xff] }
  0x43   :  { %865 = vperm.xlu0 %4681, %v149_v4   ;;  %v175_v4 = vld [vmem:[%s7709_s4 + $0x230] sm:$0xff] }
  0x46   :  { %4611 = vmatmul.mubr.msk.bf16.vlgmr.msra.gmra.mrb[0].mxu0 %vm525_vm0, %v4684_v5  ;;  %970 = vperm.xlu1 %4682, %v170_v7   ;;  %v196_v7 = vld [vmem:[%s7709_s4 + $0x2d8] sm:$0xff] }
  0x47   :  { %4614 = vmatprep.mubr.msk.bf16.mxu0 %vm525_vm0, %v4685_v6  ;;  %965 = vperm.xlu0 %4681, %v169_v8   ;;  %v195_v8 = vld [vmem:[%s7709_s4 + $0x2d0] sm:$0xff] }
  0x4a   :  { %1110 = vperm.xlu1 %4682, %v190_v9  }
  0x4b   :  { %1105 = vperm.xlu0 %4681, %v189_v10  }
  0x4e   :  { %4615 = vmatmul.mubr.msk.bf16.gmra.mrb[4].mxu0 %vm525_vm0, %v4686_v11  ;;  %1210 = vperm.xlu1 %4682, %v210_v13   ;;  %v216_v11 = vld [vmem:[%s7709_s4 + $0x378] sm:$0xff] }
  0x4f   :  { %4618 = vmatprep.mubr.msk.bf16.mxu0 %vm525_vm0, %v4687_v12  ;;  %1205 = vperm.xlu0 %4681, %v209_v14   ;;  %v215_v12 = vld [vmem:[%s7709_s4 + $0x370] sm:$0xff] }
  0x52   :  { %272 = vperm.xlu1 %4682, %v114_v15   ;;  %v120_v15 = vld [vmem:[%s7709_s4 + $0x78] sm:$0xff] }
  0x53   :  { %267 = vperm.xlu0 %4681, %v113_v16   ;;  %v119_v16 = vld [vmem:[%s7709_s4 + $0x70] sm:$0xff] }
  0x56   :  { %4619 = vmatmul.mubr.msk.bf16.gmra.mrb[8].mxu0 %vm525_vm0, %v4688_v17  ;;  %372 = vperm.xlu1 %4682, %v134_v19   ;;  %v140_v19 = vld [vmem:[%s7709_s4 + $0x118] sm:$0xff] }
  0x57   :  { %4622 = vmatprep.mubr.msk.bf16.mxu0 %vm525_vm0, %v4689_v18  ;;  %367 = vperm.xlu0 %4681, %v133_v20   ;;  %v139_v20 = vld [vmem:[%s7709_s4 + $0x110] sm:$0xff] }
  0x5a   :  { %880 = vperm.xlu1 %4682, %v152_v21  }
  0x5b   :  { %875 = vperm.xlu0 %4681, %v151_v22  }
  0x5e   :  { %4623 = vmatmul.mubr.msk.bf16.gmra.mrb[12].mxu0 %vm525_vm0, %v4690_v23  ;;  %980 = vperm.xlu1 %4682, %v172_v25   ;;  %v158_v23 = vld [vmem:[%s7709_s4 + $0x1a8] sm:$0xff] }
  0x5f   :  { %4626 = vmatprep.mubr.msk.bf16.mxu0 %vm525_vm0, %v4691_v24  ;;  %975 = vperm.xlu0 %4681, %v171_v26   ;;  %v157_v24 = vld [vmem:[%s7709_s4 + $0x1a0] sm:$0xff] }
  0x62   :  { %1120 = vperm.xlu1 %4682, %v192_v27   ;;  %v178_v27 = vld [vmem:[%s7709_s4 + $0x248] sm:$0xff] }
  0x63   :  { %1115 = vperm.xlu0 %4681, %v191_v28   ;;  %v177_v28 = vld [vmem:[%s7709_s4 + $0x240] sm:$0xff] }
  0x66   :  { %4627 = vmatmul.mubr.msk.bf16.gmra.mrb[16].mxu0 %vm525_vm0, %v4692_v29  ;;  %1220 = vperm.xlu1 %4682, %v212_v31   ;;  %v198_v31 = vld [vmem:[%s7709_s4 + $0x2e8] sm:$0xff] }
  0x67   :  { %4630 = vmatprep.mubr.msk.bf16.mxu0 %vm525_vm0, %v4693_v30  ;;  %1215 = vperm.xlu0 %4681, %v211_v32   ;;  %v197_v32 = vld [vmem:[%s7709_s4 + $0x2e0] sm:$0xff] }
  0x6a   :  { %282 = vperm.xlu1 %4682, %v116_v33  }
  0x6b   :  { %277 = vperm.xlu0 %4681, %v115_v34  }
  0x6e   :  { %4631 = vmatmul.mubr.msk.bf16.gmra.mrb[20].mxu0 %vm525_vm0, %v4694_v35  ;;  %382 = vperm.xlu1 %4682, %v136_v37   ;;  %v218_v35 = vld [vmem:[%s7709_s4 + $0x388] sm:$0xff] }
  0x6f   :  { %4634 = vmatprep.mubr.msk.bf16.mxu0 %vm525_vm0, %v4695_v36  ;;  %377 = vperm.xlu0 %4681, %v135_v38   ;;  %v217_v36 = vld [vmem:[%s7709_s4 + $0x380] sm:$0xff] }
  0x72   :  { %890 = vperm.xlu1 %4682, %v154_v39   ;;  %v122_v39 = vld [vmem:[%s7709_s4 + $0x88] sm:$0xff] }
  0x73   :  { %885 = vperm.xlu0 %4681, %v153_v40   ;;  %v121_v40 = vld [vmem:[%s7709_s4 + $0x80] sm:$0xff] }
  0x76   :  { %4635 = vmatmul.mubr.msk.bf16.gmra.mrb[24].mxu0 %vm525_vm0, %v4696_v41  ;;  %990 = vperm.xlu1 %4682, %v174_v43   ;;  %v142_v43 = vld [vmem:[%s7709_s4 + $0x128] sm:$0xff] }
  0x77   :  { %4638 = vmatprep.mubr.msk.bf16.mxu0 %vm525_vm0, %v4697_v42  ;;  %985 = vperm.xlu0 %4681, %v173_v44   ;;  %v141_v44 = vld [vmem:[%s7709_s4 + $0x120] sm:$0xff] }
  0x7a   :  { %1130 = vperm.xlu1 %4682, %v194_v45  }
  0x7b   :  { %1125 = vperm.xlu0 %4681, %v193_v46  }
  0x7e   :  { %4639 = vmatmul.mubr.msk.bf16.gmra.mrb[28].mxu0 %vm525_vm0, %v4698_v47  ;;  %1230 = vperm.xlu1 %4682, %v214_v49   ;;  %v160_v47 = vld [vmem:[%s7709_s4 + $0x1b8] sm:$0xff] }
  0x7f   :  { %4642 = vmatprep.mubr.msk.bf16.mxu0 %vm525_vm0, %v4699_v48  ;;  %1225 = vperm.xlu0 %4681, %v213_v50   ;;  %v159_v48 = vld [vmem:[%s7709_s4 + $0x1b0] sm:$0xff] }
  0x81   :  { %v5234_v53 = vpop.permute.xlu1 %327 }
  0x82   :  { %v5236_v54 = vpop.permute.xlu0 %227  ;;  %292 = vperm.xlu1 %4682, %v118_v51   ;;  %v180_v51 = vld [vmem:[%s7709_s4 + $0x258] sm:$0xff] }
  0x83   :  { %287 = vperm.xlu0 %4681, %v117_v52   ;;  %v179_v52 = vld [vmem:[%s7709_s4 + $0x250] sm:$0xff] }
  0x85   :  { %v5251_v59 = vpop.permute.xlu1 %332 }
  0x86   :  { %4643 = vmatmul.mubr.msk.bf16.gmra.mrb[32].mxu0 %vm525_vm0, %v4700_v55  ;;  %v5253_v60 = vpop.permute.xlu0 %232  ;;  %392 = vperm.xlu1 %4682, %v138_v57   ;;  %v200_v57 = vld [vmem:[%s7709_s4 + $0x2f8] sm:$0xff] }
  0x87   :  { %4646 = vmatprep.mubr.msk.bf16.mxu0 %vm525_vm0, %v4701_v56  ;;  %387 = vperm.xlu0 %4681, %v137_v58   ;;  %v199_v58 = vld [vmem:[%s7709_s4 + $0x2f0] sm:$0xff] }
  0x89   :  { %v5262_v63 = vpop.permute.xlu1 %242 }
  0x8a   :  { %v5267_v2 = vpop.permute.xlu0 %237  ;;  %900 = vperm.xlu1 %4682, %v156_v61  }
  0x8b   :  { %895 = vperm.xlu0 %4681, %v155_v62  }
  0x8d   :  { %v5276_v5 = vpop.permute.xlu1 %342 }
  0x8e   :  { %4647 = vmatmul.mubr.msk.bf16.gmra.mrb[36].mxu0 %vm525_vm0, %v4702_v1  ;;  %v5278_v6 = vpop.permute.xlu0 %337  ;;  %1000 = vperm.xlu1 %4682, %v176_v3   ;;  %v220_v1 = vld [vmem:[%s7709_s4 + $0x398] sm:$0xff]  ;;  %v219_v3 = vld [vmem:[%s7709_s4 + $0x390] sm:$0xff] }
  0x8f   :  { %995 = vperm.xlu0 %4681, %v175_v4  }
  0x91   :  { %v5286_v9 = vpop.permute.xlu1 %850 }
  0x92   :  { %v5288_v10 = vpop.permute.xlu0 %845  ;;  %1140 = vperm.xlu1 %4682, %v196_v7  }
  0x93   :  { %1135 = vperm.xlu0 %4681, %v195_v8   ;;  %v124_v8 = vld [vmem:[%s7709_s4 + $0x98] sm:$0xff] }
  0x95   :  { %v5296_v13 = vpop.permute.xlu1 %950 }
  0x96   :  { %v5298_v14 = vpop.permute.xlu0 %945  ;;  %1240 = vperm.xlu1 %4682, %v216_v11   ;;  %v123_v11 = vld [vmem:[%s7709_s4 + $0x90] sm:$0xff] }
  0x97   :  { %1235 = vperm.xlu0 %4681, %v215_v12  }
  0x99   :  { %v5306_v17 = vpop.permute.xlu1 %1090 }
  0x9a   :  { %v5308_v18 = vpop.permute.xlu0 %1085  ;;  %302 = vperm.xlu1 %4682, %v120_v15  }
  0x9b   :  { %297 = vperm.xlu0 %4681, %v119_v16   ;;  %v144_v16 = vld [vmem:[%s7709_s4 + $0x138] sm:$0xff] }
  0x9d   :  { %v5316_v21 = vpop.permute.xlu1 %1190 }
  0x9e   :  { %v5318_v22 = vpop.permute.xlu0 %1185  ;;  %402 = vperm.xlu1 %4682, %v140_v19   ;;  %v143_v19 = vld [vmem:[%s7709_s4 + $0x130] sm:$0xff] }
  0x9f   :  { %397 = vperm.xlu0 %4681, %v139_v20  }
  0xa1   :  { %v5326_v25 = vpop.permute.xlu1 %252 }
  0xa2   :  { %v5328_v26 = vpop.permute.xlu0 %247  ;;  %910 = vperm.xlu1 %4682, %v158_v23  }
  0xa3   :  { %905 = vperm.xlu0 %4681, %v157_v24   ;;  %v162_v24 = vld [vmem:[%s7709_s4 + $0x1c8] sm:$0xff] }
  0xa5   :  { %v5336_v29 = vpop.permute.xlu1 %352 }
  0xa6   :  { %7723 = vst [vmem:[#allocation3_spill] sm:$0xff] %v5336_v29  ;;  %v5338_v30 = vpop.permute.xlu0 %347  ;;  %1010 = vperm.xlu1 %4682, %v178_v27   ;;  %v161_v27 = vld [vmem:[%s7709_s4 + $0x1c0] sm:$0xff] }
  0xa7   :  { %1005 = vperm.xlu0 %4681, %v177_v28  }
  0xa9   :  { %v5346_v33 = vpop.permute.xlu1 %860 }
  0xaa   :  { %v5348_v34 = vpop.permute.xlu0 %855  ;;  %1150 = vperm.xlu1 %4682, %v198_v31  }
  0xab   :  { %1145 = vperm.xlu0 %4681, %v197_v32   ;;  %v182_v32 = vld [vmem:[%s7709_s4 + $0x268] sm:$0xff] }
  0xad   :  { %v5356_v37 = vpop.permute.xlu1 %960 }
  0xae   :  { %v5358_v38 = vpop.permute.xlu0 %955  ;;  %1250 = vperm.xlu1 %4682, %v218_v35   ;;  %v181_v35 = vld [vmem:[%s7709_s4 + $0x260] sm:$0xff] }
  0xaf   :  { %1245 = vperm.xlu0 %4681, %v217_v36  }
  0xb1   :  { %v5366_v41 = vpop.permute.xlu1 %1100 }
  0xb2   :  { %v5368_v42 = vpop.permute.xlu0 %1095  ;;  %312 = vperm.xlu1 %4682, %v122_v39  }
  0xb3   :  { %307 = vperm.xlu0 %4681, %v121_v40   ;;  %v202_v40 = vld [vmem:[%s7709_s4 + $0x308] sm:$0xff] }
  0xb5   :  { %v5376_v45 = vpop.permute.xlu1 %1200 }
  0xb6   :  { %v5378_v46 = vpop.permute.xlu0 %1195  ;;  %412 = vperm.xlu1 %4682, %v142_v43   ;;  %v201_v43 = vld [vmem:[%s7709_s4 + $0x300] sm:$0xff] }
  0xb7   :  { %407 = vperm.xlu0 %4681, %v141_v44  }
  0xb9   :  { %v5386_v49 = vpop.permute.xlu1 %262 }
  0xba   :  { %v5388_v50 = vpop.permute.xlu0 %257  ;;  %920 = vperm.xlu1 %4682, %v160_v47  }
  0xbb   :  { %915 = vperm.xlu0 %4681, %v159_v48   ;;  %v222_v48 = vld [vmem:[%s7709_s4 + $0x3a8] sm:$0xff] }
  0xbd   :  { %v5396_v55 = vpop.permute.xlu1 %362 }
  0xbe   :  { %v5398_v56 = vpop.permute.xlu0 %357  ;;  %1020 = vperm.xlu1 %4682, %v180_v51   ;;  %v221_v51 = vld [vmem:[%s7709_s4 + $0x3a0] sm:$0xff] }
  0xbf   :  { %1015 = vperm.xlu0 %4681, %v179_v52  }
  0xc1   :  { %v5406_v61 = vpop.permute.xlu1 %870 }
  0xc2   :  { %v5408_v62 = vpop.permute.xlu0 %865  ;;  %1160 = vperm.xlu1 %4682, %v200_v57  }
  0xc3   :  { %1155 = vperm.xlu0 %4681, %v199_v58   ;;  %v164_v58 = vld [vmem:[%s7709_s4 + $0x1d8] sm:$0xff] }
  0xc5   :  { %v5416_v4 = vpop.permute.xlu1 %970 }
  0xc6   :  { %7724 = vst [vmem:[#allocation4_spill] sm:$0xff] %v5416_v4  ;;  %v5418_v7 = vpop.permute.xlu0 %965  ;;  %1260 = vperm.xlu1 %4682, %v220_v1   ;;  %v163_v1 = vld [vmem:[%s7709_s4 + $0x1d0] sm:$0xff] }
  0xc7   :  { %7725 = vst [vmem:[#allocation5_spill] sm:$0xff] %v5418_v7  ;;  %1255 = vperm.xlu0 %4681, %v219_v3  }
  0xc9   :  { %v5426_v12 = vpop.permute.xlu1 %1110 }
  0xca   :  { %7726 = vst [vmem:[#allocation6_spill] sm:$0xff] %v5426_v12  ;;  %v5428_v15 = vpop.permute.xlu0 %1105  ;;  %322 = vperm.xlu1 %4682, %v124_v8  }
  0xcb   :  { %317 = vperm.xlu0 %4681, %v123_v11   ;;  %v184_v11 = vld [vmem:[%s7709_s4 + $0x278] sm:$0xff] }
  0xcd   :  { %v5436_v20 = vpop.permute.xlu1 %1210 }
  0xce   :  { %7727 = vst [vmem:[#allocation7_spill] sm:$0xff] %v5436_v20  ;;  %v5438_v23 = vpop.permute.xlu0 %1205  ;;  %422 = vperm.xlu1 %4682, %v144_v16   ;;  %v183_v16 = vld [vmem:[%s7709_s4 + $0x270] sm:$0xff] }
  0xcf   :  { %7728 = vst [vmem:[#allocation8_spill] sm:$0xff] %v5438_v23  ;;  %417 = vperm.xlu0 %4681, %v143_v19  }
  0xd1   :  { %v5446_v28 = vpop.permute.xlu1 %272 }
  0xd2   :  { %v5448_v31 = vpop.permute.xlu0 %267  ;;  %930 = vperm.xlu1 %4682, %v162_v24  }
  0xd3   :  { %925 = vperm.xlu0 %4681, %v161_v27   ;;  %v204_v27 = vld [vmem:[%s7709_s4 + $0x318] sm:$0xff] }
  0xd5   :  { %v5456_v36 = vpop.permute.xlu1 %372 }
  0xd6   :  { %7729 = vst [vmem:[#allocation9_spill] sm:$0xff] %v5456_v36  ;;  %v5458_v39 = vpop.permute.xlu0 %367  ;;  %1030 = vperm.xlu1 %4682, %v182_v32   ;;  %v203_v32 = vld [vmem:[%s7709_s4 + $0x310] sm:$0xff] }
  0xd7   :  { %7730 = vst [vmem:[#allocation10_spill] sm:$0xff] %v5458_v39  ;;  %1025 = vperm.xlu0 %4681, %v181_v35  }
  0xd9   :  { %v5466_v44 = vpop.permute.xlu1 %880 }
  0xda   :  { %v5468_v47 = vpop.permute.xlu0 %875  ;;  %1170 = vperm.xlu1 %4682, %v202_v40  }
  0xdb   :  { %1165 = vperm.xlu0 %4681, %v201_v43   ;;  %v224_v43 = vld [vmem:[%s7709_s4 + $0x3b8] sm:$0xff] }
  0xdd   :  { %v5476_v52 = vpop.permute.xlu1 %980 }
  0xde   :  { %7731 = vst [vmem:[#allocation11_spill] sm:$0xff] %v5476_v52  ;;  %v5478_v57 = vpop.permute.xlu0 %975  ;;  %1270 = vperm.xlu1 %4682, %v222_v48   ;;  %v223_v48 = vld [vmem:[%s7709_s4 + $0x3b0] sm:$0xff] }
  0xdf   :  { %7732 = vst [vmem:[#allocation12_spill] sm:$0xff] %v5478_v57  ;;  %1265 = vperm.xlu0 %4681, %v221_v51  }
  0xe1   :  { %v5486_v3 = vpop.permute.xlu1 %1120 }
  0xe2   :  { %7733 = vst [vmem:[#allocation13_spill] sm:$0xff] %v5486_v3  ;;  %v5488_v8 = vpop.permute.xlu0 %1115  ;;  %940 = vperm.xlu1 %4682, %v164_v58  }
  0xe3   :  { %935 = vperm.xlu0 %4681, %v163_v1   ;;  %v1394_v1 = vld [vmem:[%s7709_s4 + $0x3c8] sm:$0xff] }
  0xe5   :  { %v5496_v19 = vpop.permute.xlu1 %1220 }
  0xe6   :  { %7734 = vst [vmem:[#allocation14_spill] sm:$0xff] %v5496_v19  ;;  %v5498_v24 = vpop.permute.xlu0 %1215  ;;  %1040 = vperm.xlu1 %4682, %v184_v11   ;;  %v1393_v11 = vld [vmem:[%s7709_s4 + $0x3c0] sm:$0xff] }
  0xe7   :  { %7735 = vst [vmem:[#allocation15_spill] sm:$0xff] %v5498_v24  ;;  %1035 = vperm.xlu0 %4681, %v183_v16  }
  0xe9   :  { %v5506_v35 = vpop.permute.xlu1 %282 }
  0xea   :  { %v5508_v40 = vpop.permute.xlu0 %277  ;;  %1180 = vperm.xlu1 %4682, %v204_v27  }
  0xeb   :  { %1175 = vperm.xlu0 %4681, %v203_v32   ;;  %v1414_v32 = vld [vmem:[%s7709_s4 + $0x468] sm:$0xff] }
  0xed   :  { %v5516_v51 = vpop.permute.xlu1 %382 }
  0xee   :  { %7736 = vst [vmem:[#allocation16_spill] sm:$0xff] %v5516_v51  ;;  %v5518_v58 = vpop.permute.xlu0 %377  ;;  %1280 = vperm.xlu1 %4682, %v224_v43   ;;  %v1413_v43 = vld [vmem:[%s7709_s4 + $0x460] sm:$0xff] }
  0xef   :  { %7737 = vst [vmem:[#allocation17_spill] sm:$0xff] %v5518_v58  ;;  %1275 = vperm.xlu0 %4681, %v223_v48  }
  0xf1   :  { %v5526_v16 = vpop.permute.xlu1 %890 }
  0xf2   :  { %7738 = vst [vmem:[#allocation18_spill] sm:$0xff] %v5526_v16  ;;  %v5528_v27 = vpop.permute.xlu0 %885  ;;  %1520 = vperm.xlu1 %4682, %v1394_v1   ;;  %v1396_v1 = vld [vmem:[%s7709_s4 + $0x3d8] sm:$0xff] }
  0xf3   :  { %7739 = vst [vmem:[#allocation19_spill] sm:$0xff] %v5528_v27  ;;  %1515 = vperm.xlu0 %4681, %v1393_v11   ;;  %v1395_v11 = vld [vmem:[%s7709_s4 + $0x3d0] sm:$0xff] }
  0xf5   :  { %v5536_v48 = vpop.permute.xlu1 %990 }
  0xf6   :  { %7740 = vst [vmem:[#allocation20_spill] sm:$0xff] %v5536_v48  ;;  %v5541_v36 = vpop.permute.xlu0 %985  ;;  %1620 = vperm.xlu1 %4682, %v1414_v32   ;;  %v1416_v32 = vld [vmem:[%s7709_s4 + $0x478] sm:$0xff] }
  0xf7   :  { %7741 = vst [vmem:[#allocation21_spill] sm:$0xff] %v5541_v36  ;;  %1615 = vperm.xlu0 %4681, %v1413_v43   ;;  %v1415_v36 = vld [vmem:[%s7709_s4 + $0x470] sm:$0xff]  ;;  %v1433_v43 = vld [vmem:[%s7709_s4 + $0x500] sm:$0xff] }
  0xf9   :  { %v5550_v48 = vpop.permute.xlu1 %1130 }
  0xfa   :  { %7742 = vst [vmem:[#allocation22_spill] sm:$0xff] %v5550_v48  ;;  %v5552_v51 = vpop.permute.xlu0 %1125  ;;  %1530 = vperm.xlu1 %4682, %v1396_v1  }
  0xfb   :  { %7743 = vst [vmem:[#allocation23_spill] sm:$0xff] %v5552_v51  ;;  %1525 = vperm.xlu0 %4681, %v1395_v11   ;;  %v1454_v11 = vld [vmem:[%s7709_s4 + $0x5a8] sm:$0xff] }
  0xfd   :  { %v5560_v39 = vpop.permute.xlu1 %1230 }
  0xfe   :  { %7744 = vst [vmem:[#allocation24_spill] sm:$0xff] %v5560_v39  ;;  %v5562_v20 = vpop.permute.xlu0 %1225  ;;  %1630 = vperm.xlu1 %4682, %v1416_v32   ;;  %v1453_v32 = vld [vmem:[%s7709_s4 + $0x5a0] sm:$0xff] }
  0xff   :  { %7745 = vst [vmem:[#allocation25_spill] sm:$0xff] %v5562_v20  ;;  %1625 = vperm.xlu0 %4681, %v1415_v36   ;;  %v1474_v36 = vld [vmem:[%s7709_s4 + $0x648] sm:$0xff] }
 0x101   :  { %v5570_v1 = vpop.permute.xlu1 %292 }
 0x102   :  { %7746 = vst [vmem:[#allocation26_spill] sm:$0xff] %v5570_v1  ;;  %v5572_v48 = vpop.permute.xlu0 %287  ;;  %2194 = vperm.xlu1 %4682, %v1434_v0   ;;  %v1473_v0 = vld [vmem:[%s7709_s4 + $0x640] sm:$0xff] }
 0x103   :  { %7747 = vst [vmem:[#allocation27_spill] sm:$0xff] %v5572_v48  ;;  %2189 = vperm.xlu0 %4681, %v1433_v43   ;;  %v1494_v43 = vld [vmem:[%s7709_s4 + $0x6e8] sm:$0xff] }
 0x105   :  { %v5580_v39 = vpop.permute.xlu1 %392 }
 0x106   :  { %7748 = vst [vmem:[#allocation28_spill] sm:$0xff] %v5580_v39  ;;  %v5582_v20 = vpop.permute.xlu0 %387  ;;  %2294 = vperm.xlu1 %4682, %v1454_v11   ;;  %v1493_v11 = vld [vmem:[%s7709_s4 + $0x6e0] sm:$0xff] }
 0x107   :  { %7749 = vst [vmem:[#allocation29_spill] sm:$0xff] %v5582_v20  ;;  %2289 = vperm.xlu0 %4681, %v1453_v32   ;;  %v1398_v20 = vld [vmem:[%s7709_s4 + $0x3e8] sm:$0xff] }
 0x109   :  { %v5590_v1 = vpop.permute.xlu1 %900 }
 0x10a   :  { %7750 = vst [vmem:[#allocation30_spill] sm:$0xff] %v5590_v1  ;;  %v5592_v48 = vpop.permute.xlu0 %895  ;;  %2434 = vperm.xlu1 %4682, %v1474_v36   ;;  %v1397_v36 = vld [vmem:[%s7709_s4 + $0x3e0] sm:$0xff] }
 0x10b   :  { %2429 = vperm.xlu0 %4681, %v1473_v0  }
 0x10d   :  { %v5600_v32 = vpop.permute.xlu1 %1000 }
 0x10e   :  { %7751 = vst [vmem:[#allocation31_spill] sm:$0xff] %v5600_v32  ;;  %v5602_v39 = vpop.permute.xlu0 %995  ;;  %2534 = vperm.xlu1 %4682, %v1494_v43   ;;  %v1418_v32 = vld [vmem:[%s7709_s4 + $0x488] sm:$0xff]  ;;  %v1417_v43 = vld [vmem:[%s7709_s4 + $0x480] sm:$0xff] }
 0x10f   :  { %7752 = vst [vmem:[#allocation32_spill] sm:$0xff] %v5602_v39  ;;  %2529 = vperm.xlu0 %4681, %v1493_v11  }
 0x111   :  { %v5610_v0 = vpop.permute.xlu1 %1140 }
 0x112   :  { %7753 = vst [vmem:[#allocation33_spill] sm:$0xff] %v5610_v0  ;;  %v5612_v16 = vpop.permute.xlu0 %1135  ;;  %1540 = vperm.xlu1 %4682, %v1398_v20   ;;  %v1436_v0 = vld [vmem:[%s7709_s4 + $0x518] sm:$0xff] }
 0x113   :  { %7754 = vst [vmem:[#allocation34_spill] sm:$0xff] %v5612_v16  ;;  %1535 = vperm.xlu0 %4681, %v1397_v36   ;;  %v1435_v36 = vld [vmem:[%s7709_s4 + $0x510] sm:$0xff] }
 0x115   :  { %v5620_v11 = vpop.permute.xlu1 %1240 }
 0x116   :  { %7755 = vst [vmem:[#allocation35_spill] sm:$0xff] %v5620_v11  ;;  %v5622_v39 = vpop.permute.xlu0 %1235  ;;  %1640 = vperm.xlu1 %4682, %v1418_v32   ;;  %v1456_v32 = vld [vmem:[%s7709_s4 + $0x5b8] sm:$0xff] }
 0x117   :  { %7756 = vst [vmem:[#allocation36_spill] sm:$0xff] %v5622_v39  ;;  %1635 = vperm.xlu0 %4681, %v1417_v43   ;;  %v1455_v43 = vld [vmem:[%s7709_s4 + $0x5b0] sm:$0xff] }
 0x119   :  { %v4612_v20 = vpop.f32.mrb[0].mxu0  ;;  %v5630_v19 = vpop.permute.xlu1 %302 }
 0x11a   :  { %v644_v58 = vpop.f32.mrb[1].mxu0  ;;  %7757 = vst [vmem:[#allocation37_spill] sm:$0xff] %v5630_v19  ;;  %v5632_v51 = vpop.permute.xlu0 %297  ;;  %2204 = vperm.xlu1 %4682, %v1436_v0   ;;  %v1476_v0 = vld [vmem:[%s7709_s4 + $0x658] sm:$0xff]  ;;  %v1475_v19 = vld [vmem:[%s7709_s4 + $0x650] sm:$0xff] }
 0x11b   :  { %7758 = vst [vmem:[#allocation38_spill] sm:$0xff] %v5632_v51  ;;  %v4613_v4 = vpop.f32.mrb[2].mxu0  ;;  %2199 = vperm.xlu0 %4681, %v1435_v36  }
 0x11c   :  { %v647_v11 = vpop.f32.mrb[3].mxu0 }
 0x11d   :  { %v5640_v39 = vpop.permute.xlu1 %402 }
 0x11e   :  { %7759 = vst [vmem:[#allocation39_spill] sm:$0xff] %v5640_v39  ;;  %v5642_v23 = vpop.permute.xlu0 %397  ;;  %2304 = vperm.xlu1 %4682, %v1456_v32   ;;  %v1495_v39 = vld [vmem:[%s7709_s4 + $0x6f0] sm:$0xff] }
 0x11f   :  { %7760 = vst [vmem:[#allocation40_spill] sm:$0xff] %v5642_v23  ;;  %2299 = vperm.xlu0 %4681, %v1455_v43   ;;  %v1496_v43 = vld [vmem:[%s7709_s4 + $0x6f8] sm:$0xff] }
 0x121   :  { %v4616_v36 = vpop.f32.mrb[4].mxu0  ;;  %v5650_v1 = vpop.permute.xlu1 %910 }
 0x122   :  { %v660_v51 = vpop.f32.mrb[5].mxu0  ;;  %7761 = vst [vmem:[#allocation41_spill] sm:$0xff] %v5650_v1  ;;  %v5652_v16 = vpop.permute.xlu0 %905  ;;  %2444 = vperm.xlu1 %4682, %v1476_v0   ;;  %v1399_v1 = vld [vmem:[%s7709_s4 + $0x3f0] sm:$0xff] }
 0x123   :  { %7762 = vst [vmem:[#allocation42_spill] sm:$0xff] %v5652_v16  ;;  %v5654_v52 = vpop.f32.mrb[6].mxu0  ;;  %2439 = vperm.xlu0 %4681, %v1475_v19   ;;  %v1400_v19 = vld [vmem:[%s7709_s4 + $0x3f8] sm:$0xff] }
 0x124   :  { %v5656_v32 = vpop.f32.mrb[7].mxu0 }
 0x125   :  { %v5664_v23 = vpop.permute.xlu1 %1010 }
 0x126   :  { %7763 = vst [vmem:[#allocation43_spill] sm:$0xff] %v5664_v23  ;;  %v5666_v24 = vpop.permute.xlu0 %1005  ;;  %2544 = vperm.xlu1 %4682, %v1496_v43   ;;  %v1420_v43 = vld [vmem:[%s7709_s4 + $0x498] sm:$0xff] }
 0x127   :  { %7764 = vst [vmem:[#allocation44_spill] sm:$0xff] %v5666_v24  ;;  %2539 = vperm.xlu0 %4681, %v1495_v39   ;;  %v1419_v24 = vld [vmem:[%s7709_s4 + $0x490] sm:$0xff] }
 0x129   :  { %v5671_v0 = vpop.f32.mrb[8].mxu0  ;;  %v5678_v12 = vpop.permute.xlu1 %1150 }
 0x12a   :  { %v5676_v16 = vpop.f32.mrb[9].mxu0  ;;  %7765 = vst [vmem:[#allocation45_spill] sm:$0xff] %v5678_v12  ;;  %v5680_v3 = vpop.permute.xlu0 %1145  ;;  %1550 = vperm.xlu1 %4682, %v1400_v19   ;;  %v1437_v12 = vld [vmem:[%s7709_s4 + $0x520] sm:$0xff] }
 0x12b   :  { %7766 = vst [vmem:[#allocation46_spill] sm:$0xff] %v5680_v3  ;;  %v5682_v23 = vpop.f32.mrb[10].mxu0  ;;  %1545 = vperm.xlu0 %4681, %v1399_v1   ;;  %v1438_v1 = vld [vmem:[%s7709_s4 + $0x528] sm:$0xff] }
 0x12c   :  { %v5684_v39 = vpop.f32.mrb[11].mxu0 }
 0x12d   :  { %v5692_v7 = vpop.permute.xlu1 %1250 }
 0x12e   :  { %7767 = vst [vmem:[#allocation47_spill] sm:$0xff] %v5692_v7  ;;  %v5694_v57 = vpop.permute.xlu0 %1245  ;;  %1650 = vperm.xlu1 %4682, %v1420_v43   ;;  %v1458_v43 = vld [vmem:[%s7709_s4 + $0x5c8] sm:$0xff] }
 0x12f   :  { %7768 = vst [vmem:[#allocation48_spill] sm:$0xff] %v5694_v57  ;;  %1645 = vperm.xlu0 %4681, %v1419_v24   ;;  %v1457_v57 = vld [vmem:[%s7709_s4 + $0x5c0] sm:$0xff] }
 0x131   :  { %v5699_v19 = vpop.f32.mrb[12].mxu0  ;;  %v5706_v27 = vpop.permute.xlu1 %312 }
 0x132   :  { %7769 = vst [vmem:[#allocation49_spill] sm:$0xff] %v5699_v19  ;;  %v5704_v3 = vpop.f32.mrb[13].mxu0  ;;  %7771 = vst [vmem:[#allocation51_spill] sm:$0xff] %v5706_v27  ;;  %v5708_v29 = vpop.permute.xlu0 %307  ;;  %2214 = vperm.xlu1 %4682, %v1438_v1   ;;  %v653_v19 = vadd.f32 %v4612_v20, %v5267_v2  ;;  %v645_v27 = vadd.f32 %v644_v58, %v5236_v54  ;;  %v656_v1 = vadd.f32 %v4613_v4, %v5262_v63  ;;  %v1477_v2 = vld [vmem:[%s7709_s4 + $0x660] sm:$0xff] }
 0x133   :  { %7770 = vst [vmem:[#allocation50_spill] sm:$0xff] %v5704_v3  ;;  %7772 = vst [vmem:[#allocation52_spill] sm:$0xff] %v5708_v29  ;;  %v5710_v7 = vpop.f32.mrb[14].mxu0  ;;  %2209 = vperm.xlu0 %4681, %v1437_v12   ;;  %v1478_v12 = vld [vmem:[%s7709_s4 + $0x668] sm:$0xff]  ;;  %v661_v63 = vadd.f32 %v660_v51, %v5328_v26  ;;  %v672_v51 = vadd.f32 %v5654_v52, %v5386_v49 }
 0x134   :  { %7773 = vst [vmem:[#allocation53_spill] sm:$0xff] %v5710_v7  ;;  %v5712_v24 = vpop.f32.mrb[15].mxu0  ;;  %v805_v20 = vmax.f32 %v653_v19, 0.0 }
 0x135   :  { %7774 = vst [vmem:[#allocation54_spill] sm:$0xff] %v5712_v24  ;;  %v5721_v3 = vpop.permute.xlu1 %412 }
 0x136   :  { %7775 = vst [vmem:[#allocation55_spill] sm:$0xff] %v5721_v3  ;;  %v5724_v29 = vpop.permute.xlu0 %407  ;;  %2314 = vperm.xlu1 %4682, %v1458_v43   ;;  %v648_v3 = vadd.f32 %v647_v11, %v5253_v60  ;;  %v669_v43 = vadd.f32 %v4616_v36, %v5388_v50  ;;  %v1498_v60 = vld [vmem:[%s7709_s4 + $0x708] sm:$0xff]  ;;  %v806_v11 = vmax.f32 %v656_v1, 0.0  ;;  %v1045_v50 = vmul.f32 %v5348_v34, %v805_v20 }
 0x137   :  { %7776 = vst [vmem:[#allocation56_spill] sm:$0xff] %v5724_v29  ;;  %2309 = vperm.xlu0 %4681, %v1457_v57   ;;  %v803_v57 = vmax.f32 %v645_v27, 0.0  ;;  %v1497_v27 = vld [vmem:[%s7709_s4 + $0x700] sm:$0xff]  ;;  %v1402_v1 = vld [vmem:[%s7709_s4 + $0x408] sm:$0xff] }
 0x138   :  { %v804_v36 = vmax.f32 %v648_v3, 0.0  ;;  %v809_v26 = vmax.f32 %v669_v43, 0.0  ;;  %v1046_v34 = vmul.f32 %v5346_v33, %v806_v11  ;;  %v664_v3 = vadd.f32 %v5656_v32, %v5326_v25 }
 0x139   :  { %v5730_v7 = vpop.f32.mrb[16].mxu0  ;;  %v5738_v58 = vpop.permute.xlu1 %920  ;;  %v5772_v49 = vadd.f32 %v5368_v42, %v1045_v50  ;;  %v810_v32 = vmax.f32 %v672_v51, 0.0 }
 0x13a   :  { %7777 = vst [vmem:[#allocation57_spill] sm:$0xff] %v5730_v7  ;;  %v5736_v54 = vpop.f32.mrb[17].mxu0  ;;  %v5741_v29 = vpop.permute.xlu0 %915  ;;  %2454 = vperm.xlu1 %4682, %v1478_v12   ;;  %v1043_v12 = vmul.f32 %v5288_v10, %v803_v57  ;;  %v807_v7 = vmax.f32 %v661_v63, 0.0  ;;  %v1401_v10 = vld [vmem:[%s7709_s4 + $0x400] sm:$0xff]  ;;  %v1044_v52 = vmul.f32 %v5286_v9, %v804_v36  ;;  %v1049_v25 = vmul.f32 %v5468_v47, %v809_v26  ;;  %v1422_v47 = vld [vmem:[%s7709_s4 + $0x4a8] sm:$0xff] }
 0x13b   :  { %v5743_v24 = vpop.f32.mrb[18].mxu0  ;;  %2449 = vperm.xlu0 %4681, %v1477_v2   ;;  %v808_v36 = vmax.f32 %v664_v3, 0.0 }
 0x13c   :  { %v5746_v4 = vpop.f32.mrb[19].mxu0  ;;  %v5779_v33 = vadd.f32 %v5308_v18, %v1043_v12  ;;  %v1047_v42 = vmul.f32 %v5408_v62, %v807_v7  ;;  %v1421_v62 = vld [vmem:[%s7709_s4 + $0x4a0] sm:$0xff]  ;;  %v1284_v7 = vadd.f32 %v5306_v17, %v1044_v52 }
 0x13d   :  { %v5755_v19 = vpop.permute.xlu1 %1020 }
 0x13e   :  { %v5760_v2 = vpop.permute.xlu0 %1015  ;;  %2554 = vperm.xlu1 %4682, %v1498_v60   ;;  %v5811_v17 = vadd.f32 %v5428_v15, %v1047_v42  ;;  %v7778_v42 = vld [vmem:[#allocation3_spill] sm:$0xff] }
 0x13f   :  { %2549 = vperm.xlu0 %4681, %v1497_v27  }
 0x141   :  { %v4632_v20 = vpop.f32.mrb[20].mxu0  ;;  %v5776_v63 = vpop.permute.xlu1 %1160 }
 0x142   :  { %v733_v57 = vadd.f32 %v4632_v20, %v5278_v6  ;;  %v724_v43 = vpop.f32.mrb[21].mxu0  ;;  %v5783_v11 = vpop.permute.xlu0 %1155  ;;  %1560 = vperm.xlu1 %4682, %v1402_v1   ;;  %v685_v6 = vadd.f32 %v5671_v0, %v5508_v40  ;;  %v1050_v1 = vmul.f32 %v5466_v44, %v810_v32  ;;  %v1048_v44 = vmul.f32 %v5406_v61, %v808_v36 }
 0x143   :  { %v725_v60 = vadd.f32 %v724_v43, %v5234_v53  ;;  %v4633_v27 = vpop.f32.mrb[22].mxu0  ;;  %1555 = vperm.xlu0 %4681, %v1401_v10   ;;  %v1286_v53 = vadd.f32 %v5366_v41, %v1046_v34  ;;  %v5804_v41 = vadd.f32 %v5488_v8, %v1049_v25  ;;  %v1440_v8 = vld [vmem:[%s7709_s4 + $0x538] sm:$0xff] }
 0x144   :  { %v825_v9 = vmax.f32 %v733_v57, 0.0  ;;  %v736_v50 = vadd.f32 %v4633_v27, %v5276_v5  ;;  %v727_v18 = vpop.f32.mrb[23].mxu0  ;;  %v677_v5 = vadd.f32 %v5676_v16, %v5448_v31  ;;  %v813_v31 = vmax.f32 %v685_v6, 0.0 }
 0x145   :  { %v823_v12 = vmax.f32 %v725_v60, 0.0  ;;  %v728_v26 = vadd.f32 %v727_v18, %v5251_v59  ;;  %v5801_v51 = vpop.permute.xlu1 %1260  ;;  %v7780_v18 = vld [vmem:[#allocation12_spill] sm:$0xff] }
 0x146   :  { %v1065_v40 = vmul.f32 %v5358_v38, %v825_v9  ;;  %v826_v0 = vmax.f32 %v736_v50, 0.0  ;;  %v5808_v3 = vpop.permute.xlu0 %1255  ;;  %1660 = vperm.xlu1 %4682, %v1422_v47  }
 0x147   :  { %v1063_v59 = vmul.f32 %v5298_v14, %v823_v12  ;;  %v824_v34 = vmax.f32 %v728_v26, 0.0  ;;  %1655 = vperm.xlu0 %4681, %v1421_v62   ;;  %v688_v14 = vadd.f32 %v5682_v23, %v5506_v35  ;;  %v7781_v62 = vld [vmem:[#allocation5_spill] sm:$0xff] }
 0x148   :  { %v1305_v38 = vadd.f32 %v5378_v46, %v1065_v40  ;;  %v1066_v16 = vmul.f32 %v5356_v37, %v826_v0  ;;  %v1439_v46 = vld [vmem:[%s7709_s4 + $0x530] sm:$0xff]  ;;  %v811_v37 = vmax.f32 %v677_v5, 0.0 }
 0x149   :  { %v1303_v20 = vadd.f32 %v5318_v22, %v1063_v59  ;;  %v1064_v15 = vmul.f32 %v5296_v13, %v824_v34  ;;  %v4636_v10 = vpop.f32.mrb[24].mxu0  ;;  %v5828_v25 = vpop.permute.xlu1 %322  ;;  %v680_v22 = vadd.f32 %v5684_v39, %v5446_v28  ;;  %v1460_v28 = vld [vmem:[%s7709_s4 + $0x5d8] sm:$0xff]  ;;  %v814_v39 = vmax.f32 %v688_v14, 0.0 }
 0x14a   :  { %v1306_v52 = vadd.f32 %v5376_v45, %v1066_v16  ;;  %v749_v57 = vadd.f32 %v4636_v10, %v5398_v56  ;;  %v740_v43 = vpop.f32.mrb[25].mxu0  ;;  %v1325_v61 = vmax.f32 %v5772_v49, %v1305_v38  ;;  %v5835_v35 = vpop.permute.xlu0 %317  ;;  %2224 = vperm.xlu1 %4682, %v1440_v8   ;;  %v1053_v56 = vmul.f32 %v5592_v48, %v813_v31  ;;  %v7779_v48 = vld [vmem:[#allocation19_spill] sm:$0xff]  ;;  %v7782_v59 = vld [vmem:[#allocation13_spill] sm:$0xff]  ;;  %v7783_v31 = vld [vmem:[#allocation6_spill] sm:$0xff] }
 0x14b   :  { %v1304_v13 = vadd.f32 %v5316_v21, %v1064_v15  ;;  %v741_v23 = vadd.f32 %v740_v43, %v5338_v30  ;;  %v4637_v32 = vpop.f32.mrb[26].mxu0  ;;  %v1323_v45 = vmax.f32 %v5779_v33, %v1303_v20  ;;  %2219 = vperm.xlu0 %4681, %v1439_v46   ;;  %v1459_v33 = vld [vmem:[%s7709_s4 + $0x5d0] sm:$0xff]  ;;  %v1051_v50 = vmul.f32 %v7779_v48, %v811_v37  ;;  %v7784_v38 = vld [vmem:[#allocation15_spill] sm:$0xff]  ;;  %v1480_v20 = vld [vmem:[%s7709_s4 + $0x678] sm:$0xff] }
 0x14c   :  { %v829_v60 = vmax.f32 %v749_v57, 0.0  ;;  %v752_v27 = vadd.f32 %v4637_v32, %v5396_v55  ;;  %v743_v49 = vpop.f32.mrb[27].mxu0  ;;  %v1326_v21 = vmax.f32 %v1286_v53, %v1306_v52  ;;  %v812_v26 = vmax.f32 %v680_v22, 0.0  ;;  %v7785_v8 = vld [vmem:[#allocation11_spill] sm:$0xff]  ;;  %v7786_v15 = vld [vmem:[#allocation34_spill] sm:$0xff]  ;;  %v7788_v52 = vld [vmem:[#allocation8_spill] sm:$0xff] }
 0x14d   :  { %v827_v30 = vmax.f32 %v741_v23, 0.0  ;;  %v744_v6 = vadd.f32 %v743_v49, %v7778_v42  ;;  %v1324_v9 = vmax.f32 %v1284_v7, %v1304_v13  ;;  %v5849_v36 = vpop.permute.xlu1 %422  ;;  %v1290_v34 = vadd.f32 %v7782_v59, %v1050_v1  ;;  %v7787_v46 = vld [vmem:[#allocation30_spill] sm:$0xff]  ;;  %v7789_v43 = vld [vmem:[#allocation4_spill] sm:$0xff]  ;;  %v7790_v22 = vld [vmem:[#allocation23_spill] sm:$0xff] }
 0x14e   :  { %v1069_v55 = vmul.f32 %v7780_v18, %v829_v60  ;;  %v830_v47 = vmax.f32 %v752_v27, 0.0  ;;  %v1384_v12 = vpack.c.bf16 %v1326_v21, %v1325_v61  ;;  %v5852_v40 = vpop.permute.xlu0 %417  ;;  %2324 = vperm.xlu1 %4682, %v1460_v28   ;;  %v1288_v7 = vadd.f32 %v7783_v31, %v1048_v44  ;;  %v1479_v44 = vld [vmem:[%s7709_s4 + $0x670] sm:$0xff]  ;;  %v7791_v23 = vld [vmem:[#allocation14_spill] sm:$0xff]  ;;  %v7797_v18 = vld [vmem:[#allocation27_spill] sm:$0xff] }
 0x14f   :  { %v1067_v53 = vmul.f32 %v7781_v62, %v827_v30  ;;  %v828_v5 = vmax.f32 %v744_v6, 0.0  ;;  %v1383_v0 = vpack.c.bf16 %v1324_v9, %v1323_v45  ;;  %2319 = vperm.xlu0 %4681, %v1459_v33   ;;  %v5862_v10 = vadd.f32 %v7786_v15, %v1053_v56  ;;  %v7792_v45 = vld [vmem:[#allocation17_spill] sm:$0xff]  ;;  %v7794_v21 = vld [vmem:[#allocation18_spill] sm:$0xff]  ;;  %v7795_v30 = vld [vmem:[#allocation7_spill] sm:$0xff] }
 0x150   :  { %v1309_v16 = vadd.f32 %v7784_v38, %v1069_v55  ;;  %v1070_v14 = vmul.f32 %v7785_v8, %v830_v47  ;;  %v1054_v37 = vmul.f32 %v7787_v46, %v814_v39  ;;  %v5871_v13 = vadd.f32 %v7790_v22, %v1051_v50  ;;  %v7796_v6 = vld [vmem:[#allocation10_spill] sm:$0xff]  ;;  %v7802_v8 = vld [vmem:[#allocation9_spill] sm:$0xff] }
 0x151   :  { %v1307_v57 = vadd.f32 %v7788_v52, %v1067_v53  ;;  %v1068_v1 = vmul.f32 %v7789_v43, %v828_v5  ;;  %v4640_v61 = vpop.f32.mrb[28].mxu0  ;;  %1955 = vmatpush1.bf16.msra.mxu1 %v1383_v0  ;;  %v5875_v27 = vpop.permute.xlu1 %930  ;;  %v7793_v49 = vmov 0   ;;  %v1052_v39 = vmul.f32 %v7794_v21, %v812_v26  ;;  %v7798_v55 = vld [vmem:[#allocation50_spill] sm:$0xff]  ;;  %v7799_v53 = vld [vmem:[#allocation16_spill] sm:$0xff]  ;;  %v7804_v46 = vld [vmem:[#allocation49_spill] sm:$0xff] }
 0x152   :  { %v1310_v32 = vadd.f32 %v7791_v23, %v1070_v14  ;;  %v765_v56 = vadd.f32 %v4640_v61, %v7792_v45  ;;  %v756_v60 = vpop.f32.mrb[29].mxu0  ;;  %1956 = vmatprep.subr.bf16.mxu1 %v7793_v49  ;;  %v1329_v28 = vmax.f32 %v5804_v41, %v1309_v16  ;;  %v5882_v9 = vpop.permute.xlu0 %925  ;;  %2464 = vperm.xlu1 %4682, %v1480_v20   ;;  %v1500_v26 = vld [vmem:[%s7709_s4 + $0x718] sm:$0xff] }
 0x153   :  { %v1308_v42 = vadd.f32 %v7795_v30, %v1068_v1  ;;  %v757_v33 = vadd.f32 %v756_v60, %v7796_v6  ;;  %v4641_v48 = vpop.f32.mrb[30].mxu0  ;;  %v1327_v50 = vmax.f32 %v5811_v17, %v1307_v57  ;;  %v693_v47 = vadd.f32 %v7798_v55, %v7797_v18  ;;  %2459 = vperm.xlu0 %4681, %v1479_v44   ;;  %v7800_v59 = vld [vmem:[#allocation26_spill] sm:$0xff]  ;;  %v1499_v17 = vld [vmem:[%s7709_s4 + $0x710] sm:$0xff] }
 0x154   :  { %v833_v62 = vmax.f32 %v765_v56, 0.0  ;;  %v768_v5 = vadd.f32 %v4641_v48, %v7799_v53  ;;  %v759_v41 = vpop.f32.mrb[31].mxu0  ;;  %v1330_v0 = vmax.f32 %v1290_v34, %v1310_v32  ;;  %v7801_v31 = vld [vmem:[#allocation54_spill] sm:$0xff]  ;;  %v7805_v57 = vld [vmem:[#allocation32_spill] sm:$0xff]  ;;  %v7806_v44 = vld [vmem:[#allocation37_spill] sm:$0xff] }
 0x155   :  { %v696_v38 = vadd.f32 %v7801_v31, %v7800_v59  ;;  %v831_v16 = vmax.f32 %v757_v33, 0.0  ;;  %v760_v14 = vadd.f32 %v759_v41, %v7802_v8  ;;  %1957 = vmatpush1.bf16.msra.mxu1 %v1384_v12  ;;  %v1328_v20 = vmax.f32 %v1288_v7, %v1308_v42  ;;  %v7803_v15 = vld [vmem:[#allocation38_spill] sm:$0xff]  ;;  %v5900_v61 = vpop.permute.xlu1 %1030  ;;  %v7807_v22 = vld [vmem:[#allocation53_spill] sm:$0xff]  ;;  %v7810_v42 = vld [vmem:[#allocation36_spill] sm:$0xff] }
 0x156   :  { %v701_v52 = vadd.f32 %v7804_v46, %v7803_v15  ;;  %v1073_v43 = vmul.f32 %v7805_v57, %v833_v62  ;;  %v834_v1 = vmax.f32 %v768_v5, 0.0  ;;  %1958 = vmatprep.subr.bf16.mxu1 %v7793_v49  ;;  %v1386_v34 = vpack.c.bf16 %v1330_v0, %v1329_v28  ;;  %v7808_v12 = vld [vmem:[#allocation21_spill] sm:$0xff]  ;;  %v5906_v56 = vpop.permute.xlu0 %1025  ;;  %2564 = vperm.xlu1 %4682, %v1500_v26   ;;  %v7811_v33 = vld [vmem:[#allocation31_spill] sm:$0xff]  ;;  %v7812_v18 = vld [vmem:[#allocation22_spill] sm:$0xff] }
 0x157   :  { %v704_v23 = vadd.f32 %v7807_v22, %v7806_v44  ;;  %v1071_v32 = vmul.f32 %v7808_v12, %v831_v16  ;;  %v832_v45 = vmax.f32 %v760_v14, 0.0  ;;  %v1385_v7 = vpack.c.bf16 %v1328_v20, %v1327_v50  ;;  %v7809_v60 = vld [vmem:[#allocation33_spill] sm:$0xff]  ;;  %2559 = vperm.xlu0 %4681, %v1499_v17   ;;  %v7814_v41 = vld [vmem:[#allocation20_spill] sm:$0xff]  ;;  %v7815_v0 = vld [vmem:[#allocation35_spill] sm:$0xff] }
 0x158   :  { %v1294_v21 = vadd.f32 %v7809_v60, %v1054_v37  ;;  %v815_v30 = vmax.f32 %v693_v47, 0.0  ;;  %v1313_v6 = vadd.f32 %v7810_v42, %v1073_v43  ;;  %v1074_v48 = vmul.f32 %v7811_v33, %v834_v1  ;;  %v1404_v28 = vld [vmem:[%s7709_s4 + $0x418] sm:$0xff]  ;;  %v1403_v37 = vld [vmem:[%s7709_s4 + $0x410] sm:$0xff]  ;;  %v7820_v12 = vld [vmem:[#allocation39_spill] sm:$0xff] }
 0x159   :  { %v1292_v55 = vadd.f32 %v7812_v18, %v1052_v39  ;;  %v816_v62 = vmax.f32 %v696_v38, 0.0  ;;  %v7813_v53 = vld [vmem:[#allocation25_spill] sm:$0xff]  ;;  %v1072_v26 = vmul.f32 %v7814_v41, %v832_v45  ;;  %v4644_v50 = vpop.f32.mrb[32].mxu0  ;;  %1959 = vmatpush1.bf16.msra.mxu1 %v1385_v7  ;;  %v817_v47 = vmax.f32 %v701_v52, 0.0  ;;  %v7816_v31 = vld [vmem:[#allocation40_spill] sm:$0xff]  ;;  %v5922_v14 = vpop.permute.xlu1 %1170  ;;  %v7819_v1 = vld [vmem:[#allocation42_spill] sm:$0xff] }
 0x15a   :  { %v1311_v5 = vadd.f32 %v7813_v53, %v1071_v32  ;;  %v1314_v59 = vadd.f32 %v7815_v0, %v1074_v48  ;;  %v781_v16 = vadd.f32 %v4644_v50, %v7816_v31  ;;  %v772_v8 = vpop.f32.mrb[33].mxu0  ;;  %1960 = vmatprep.subr.bf16.mxu1 %v7793_v49  ;;  %v1333_v39 = vmax.f32 %v5862_v10, %v1313_v6  ;;  %v7817_v17 = vld [vmem:[#allocation24_spill] sm:$0xff]  ;;  %v7818_v15 = vld [vmem:[#allocation29_spill] sm:$0xff]  ;;  %v5928_v57 = vpop.permute.xlu0 %1165 }
 0x15b   :  { %v818_v38 = vmax.f32 %v704_v23, 0.0  ;;  %v1312_v20 = vadd.f32 %v7817_v17, %v1072_v26  ;;  %v773_v46 = vadd.f32 %v772_v8, %v7818_v15  ;;  %v4645_v43 = vpop.f32.mrb[34].mxu0  ;;  %1570 = vperm.xlu1 %4682, %v1404_v28   ;;  %v1055_v44 = vmul.f32 %v7819_v1, %v815_v30  ;;  %1565 = vperm.xlu0 %4681, %v1403_v37   ;;  %v1424_v10 = vld [vmem:[%s7709_s4 + $0x4b8] sm:$0xff]  ;;  %v7822_v6 = vld [vmem:[#allocation28_spill] sm:$0xff]  ;;  %v7827_v8 = vld [vmem:[#allocation43_spill] sm:$0xff] }
 0x15c   :  { %v1331_v52 = vmax.f32 %v5871_v13, %v1311_v5  ;;  %v837_v22 = vmax.f32 %v781_v16, 0.0  ;;  %v784_v32 = vadd.f32 %v4645_v43, %v7820_v12  ;;  %v775_v45 = vpop.f32.mrb[35].mxu0  ;;  %v1334_v23 = vmax.f32 %v1294_v21, %v1314_v59  ;;  %v7821_v7 = vld [vmem:[#allocation41_spill] sm:$0xff]  ;;  %v7824_v41 = vld [vmem:[#allocation44_spill] sm:$0xff]  ;;  %v7830_v1 = vld [vmem:[#allocation47_spill] sm:$0xff] }
 0x15d   :  { %v1056_v60 = vmul.f32 %v7821_v7, %v816_v62  ;;  %v835_v42 = vmax.f32 %v773_v46, 0.0  ;;  %v776_v33 = vadd.f32 %v775_v45, %v7822_v6  ;;  %1961 = vmatpush1.bf16.msra.mxu1 %v1386_v34  ;;  %v1423_v13 = vld [vmem:[%s7709_s4 + $0x4b0] sm:$0xff]  ;;  %v1332_v30 = vmax.f32 %v1292_v55, %v1312_v20  ;;  %v5943_v53 = vpop.permute.xlu1 %1270  ;;  %v1442_v0 = vld [vmem:[%s7709_s4 + $0x548] sm:$0xff] }
 0x15e   :  { %v1057_v48 = vmul.f32 %v5741_v29, %v817_v47  ;;  %v1077_v28 = vmul.f32 %v5760_v2, %v837_v22  ;;  %v838_v18 = vmax.f32 %v784_v32, 0.0  ;;  %1962 = vmatprep.subr.bf16.mxu1 %v7793_v49  ;;  %v1388_v21 = vpack.c.bf16 %v1334_v23, %v1333_v39  ;;  %v7823_v62 = vld [vmem:[#allocation52_spill] sm:$0xff]  ;;  %v1266_v50 = vpop.permute.xlu0 %1265  ;;  %v7829_v43 = vld [vmem:[#allocation45_spill] sm:$0xff] }
 0x15f   :  { %v709_v5 = vadd.f32 %v5736_v54, %v7823_v62  ;;  %v1075_v34 = vmul.f32 %v7824_v41, %v835_v42  ;;  %v836_v26 = vmax.f32 %v776_v33, 0.0  ;;  %1670 = vperm.xlu1 %4682, %v1424_v10   ;;  %v1387_v37 = vpack.c.bf16 %v1332_v30, %v1331_v52  ;;  %1665 = vperm.xlu0 %4681, %v1423_v13   ;;  %v7825_v54 = vld [vmem:[#allocation46_spill] sm:$0xff]  ;;  %v7826_v31 = vld [vmem:[#allocation48_spill] sm:$0xff] }
 0x160   :  { %v1058_v55 = vmul.f32 %v5738_v58, %v818_v38  ;;  %v1297_v29 = vadd.f32 %v5783_v11, %v1057_v48  ;;  %v1317_v2 = vadd.f32 %v5808_v3, %v1077_v28  ;;  %v1078_v47 = vmul.f32 %v5755_v19, %v838_v18  ;;  %v1441_v58 = vld [vmem:[%s7709_s4 + $0x540] sm:$0xff]  ;;  %v7831_v22 = vld [vmem:[#allocation56_spill] sm:$0xff] }
 0x161   :  { %v1295_v59 = vadd.f32 %v7825_v54, %v1055_v44  ;;  %v1315_v16 = vadd.f32 %v7826_v31, %v1075_v34  ;;  %v1076_v39 = vmul.f32 %v7827_v8, %v836_v26  ;;  %v4648_v17 = vpop.f32.mrb[36].mxu0  ;;  %1963 = vmatpush1.bf16.msra.mxu1 %v1387_v37  ;;  %v7828_v11 = vld [vmem:[#allocation51_spill] sm:$0xff]  ;;  %v941_v15 = vpop.permute.xlu1 %940  ;;  %v1296_v52 = vadd.f32 %v7829_v43, %v1056_v60  ;;  %v7833_v34 = vld [vmem:[#allocation57_spill] sm:$0xff] }
 0x162   :  { %v712_v19 = vadd.f32 %v5746_v4, %v7828_v11  ;;  %v1298_v3 = vadd.f32 %v5776_v63, %v1058_v55  ;;  %v1318_v38 = vadd.f32 %v5801_v51, %v1078_v47  ;;  %v788_v20 = vpop.f32.mrb[37].mxu0  ;;  %1964 = vmatprep.subr.bf16.mxu1 %v7793_v49  ;;  %v1337_v46 = vmax.f32 %v1297_v29, %v1317_v2  ;;  %v936_v32 = vpop.permute.xlu0 %935  ;;  %v1462_v51 = vld [vmem:[%s7709_s4 + $0x5e8] sm:$0xff]  ;;  %v1461_v33 = vld [vmem:[%s7709_s4 + $0x5e0] sm:$0xff] }
 0x163   :  { %v1316_v44 = vadd.f32 %v7830_v1, %v1076_v39  ;;  %v789_v12 = vadd.f32 %v788_v20, %v7831_v22  ;;  %v4649_v45 = vpop.f32.mrb[38].mxu0  ;;  %2234 = vperm.xlu1 %4682, %v1442_v0   ;;  %v1335_v10 = vmax.f32 %v1295_v59, %v1315_v16  ;;  %v819_v4 = vmax.f32 %v709_v5, 0.0  ;;  %2229 = vperm.xlu0 %4681, %v1441_v58   ;;  %v7832_v60 = vld [vmem:[#allocation55_spill] sm:$0xff] }
 0x164   :  { %v791_v63 = vpop.f32.mrb[39].mxu0  ;;  %v1338_v23 = vmax.f32 %v1298_v3, %v1318_v38  ;;  %v800_v42 = vadd.f32 %v4649_v45, %v5849_v36  ;;  %v820_v30 = vmax.f32 %v712_v19, 0.0  ;;  %v720_v48 = vadd.f32 %v5743_v24, %v5828_v25  ;;  %v1482_v24 = vld [vmem:[%s7709_s4 + $0x688] sm:$0xff]  ;;  %v1501_v16 = vld [vmem:[%s7709_s4 + $0x720] sm:$0xff] }
 0x165   :  { %v839_v7 = vmax.f32 %v789_v12, 0.0  ;;  %v792_v6 = vadd.f32 %v791_v63, %v7832_v60  ;;  %1965 = vmatpush1.bf16.msra.mxu1 %v1388_v21  ;;  %v1336_v13 = vmax.f32 %v1296_v52, %v1316_v44  ;;  %v1041_v28 = vpop.permute.xlu1 %1040  ;;  %v1059_v62 = vmul.f32 %v5882_v9, %v819_v4  ;;  %v1406_v20 = vld [vmem:[%s7709_s4 + $0x428] sm:$0xff]  ;;  %v1425_v12 = vld [vmem:[%s7709_s4 + $0x4c0] sm:$0xff]  ;;  %v1444_v63 = vld [vmem:[%s7709_s4 + $0x558] sm:$0xff] }
 0x166   :  { %1966 = vmatprep.subr.bf16.mxu1 %v7793_v49  ;;  %v1390_v18 = vpack.c.bf16 %v1338_v23, %v1337_v46  ;;  %v1036_v41 = vpop.permute.xlu0 %1035  ;;  %v717_v26 = vadd.f32 %v7833_v34, %v5835_v35  ;;  %v1060_v37 = vmul.f32 %v5875_v27, %v820_v30  ;;  %v797_v55 = vadd.f32 %v4648_v17, %v5852_v40  ;;  %v1481_v35 = vld [vmem:[%s7709_s4 + $0x680] sm:$0xff]  ;;  %v1426_v22 = vld [vmem:[%s7709_s4 + $0x4c8] sm:$0xff]  ;;  %v1463_v60 = vld [vmem:[%s7709_s4 + $0x5f0] sm:$0xff] }
 0x167   :  { %v1079_v36 = vmul.f32 %v5906_v56, %v839_v7  ;;  %v840_v5 = vmax.f32 %v792_v6, 0.0  ;;  %2334 = vperm.xlu1 %4682, %v1462_v51   ;;  %v1389_v21 = vpack.c.bf16 %v1336_v13, %v1335_v10  ;;  %2329 = vperm.xlu0 %4681, %v1461_v33   ;;  %v1299_v25 = vadd.f32 %v5928_v57, %v1059_v62  ;;  %v1405_v46 = vld [vmem:[%s7709_s4 + $0x420] sm:$0xff]  ;;  %v4706_v10 = vld [vmem:[%s7712_s2 + $0x14] ss:$8 sps:$4 sm:$0xff]   ;;  %v4708_v6 = vld [vmem:[%s7712_s2 + $0x10] ss:$8 sps:$4 sm:$0xff]  }
 0x168   :  { %v842_v56 = vmax.f32 %v800_v42, 0.0  ;;  %v822_v40 = vmax.f32 %v720_v48, 0.0  ;;  %v1300_v27 = vadd.f32 %v5922_v14, %v1060_v37  ;;  %v841_v54 = vmax.f32 %v797_v55, 0.0  ;;  %v1443_v51 = vld [vmem:[%s7709_s4 + $0x550] sm:$0xff]  ;;  %v1464_v42 = vld [vmem:[%s7709_s4 + $0x5f8] sm:$0xff] }
 0x169   :  { %v1319_v9 = vadd.f32 %v1266_v50, %v1079_v36  ;;  %v1080_v29 = vmul.f32 %v5900_v61, %v840_v5  ;;  %1967 = vmatpush1.bf16.msra.mxu1 %v1389_v21  ;;  %v1181_v2 = vpop.permute.xlu1 %1180  ;;  %v821_v50 = vmax.f32 %v717_v26, 0.0  ;;  %v1502_v61 = vld [vmem:[%s7709_s4 + $0x728] sm:$0xff]  ;;  %v1484_v48 = vld [vmem:[%s7709_s4 + $0x698] sm:$0xff]  ;;  %v1503_v5 = vld [vmem:[%s7709_s4 + $0x730] sm:$0xff] }
 0x16a   :  { %1968 = vmatprep.subr.bf16.mxu1 %v7793_v49  ;;  %v1176_v0 = vpop.permute.xlu0 %1175  ;;  %v1062_v59 = vmul.f32 %v941_v15, %v822_v40  ;;  %v1082_v31 = vmul.f32 %v1041_v28, %v842_v56  ;;  %v4709_v13 = vld [vmem:[%s7712_s2 + $0x24] ss:$8 sps:$4 sm:$0xff]   ;;  %v1483_v28 = vld [vmem:[%s7709_s4 + $0x690] sm:$0xff]  ;;  %v1504_v36 = vld [vmem:[%s7709_s4 + $0x738] sm:$0xff] }
 0x16b   :  { %v1320_v47 = vadd.f32 %v5943_v53, %v1080_v29  ;;  %2474 = vperm.xlu1 %4682, %v1482_v24   ;;  %v1339_v57 = vmax.f32 %v1299_v25, %v1319_v9  ;;  %2469 = vperm.xlu0 %4681, %v1481_v35   ;;  %v1061_v8 = vmul.f32 %v936_v32, %v821_v50  ;;  %v4703_v32 = vld [vmem:[%s7712_s2] ss:$8 sps:$4 sm:$0xff]   ;;  %v4712_v34 = vld [vmem:[%s7712_s2 + $0x34] ss:$8 sps:$4 sm:$0xff]   ;;  %v4714_v29 = vld [vmem:[%s7712_s2 + $0x30] ss:$8 sps:$4 sm:$0xff]  }
 0x16c   :  { %v1081_v53 = vmul.f32 %v1036_v41, %v841_v54  ;;  %v1302_v17 = vadd.f32 %v1181_v2, %v1062_v59  ;;  %v4711_v41 = vld [vmem:[%s7712_s2 + $0x20] ss:$8 sps:$4 sm:$0xff]   ;;  %v1408_v37 = vld [vmem:[%s7709_s4 + $0x438] sm:$0xff]  ;;  %v1407_v55 = vld [vmem:[%s7709_s4 + $0x430] sm:$0xff] }
 0x16d   :  { %1969 = vmatpush1.bf16.msra.mxu1 %v1390_v18  ;;  %v1340_v14 = vmax.f32 %v1300_v27, %v1320_v47  ;;  %v1281_v39 = vpop.permute.xlu1 %1280  ;;  %v1301_v3 = vadd.f32 %v1176_v0, %v1061_v8  ;;  %v1428_v9 = vld [vmem:[%s7709_s4 + $0x4d8] sm:$0xff]  ;;  %v1427_v56 = vld [vmem:[%s7709_s4 + $0x4d0] sm:$0xff]  ;;  %v4715_v2 = vld [vmem:[%s7712_s2 + $0x44] ss:$8 sps:$4 sm:$0xff]  }
 0x16e   :  { %1970 = vmatprep.subr.bf16.mxu1 %v7793_v49  ;;  %v1322_v58 = vadd.f32 %v1281_v39, %v1082_v31  ;;  %v1276_v11 = vpop.permute.xlu0 %1275  ;;  %v1446_v27 = vld [vmem:[%s7709_s4 + $0x568] sm:$0xff]  ;;  %v1445_v47 = vld [vmem:[%s7709_s4 + $0x560] sm:$0xff]  ;;  %v4718_v31 = vld [vmem:[%s7712_s2 + $0x54] ss:$8 sps:$4 sm:$0xff]  }
 0x16f   :  { %2574 = vperm.xlu1 %4682, %v1502_v61   ;;  %v1391_v19 = vpack.c.bf16 %v1340_v14, %v1339_v57  ;;  %v1321_v38 = vadd.f32 %v1276_v11, %v1081_v53  ;;  %2569 = vperm.xlu0 %4681, %v1501_v16   ;;  %v1466_v50 = vld [vmem:[%s7709_s4 + $0x608] sm:$0xff]  ;;  %v1465_v54 = vld [vmem:[%s7709_s4 + $0x600] sm:$0xff]  ;;  %v4720_v11 = vld [vmem:[%s7712_s2 + $0x50] ss:$8 sps:$4 sm:$0xff]  }
 0x170   :  { %v1342_v15 = vmax.f32 %v1302_v17, %v1322_v58  ;;  %v4717_v61 = vld [vmem:[%s7712_s2 + $0x40] ss:$8 sps:$4 sm:$0xff]  }
 0x171   :  { %1971 = vmatpush1.bf16.msra.mxu1 %v1391_v19  ;;  %v1341_v43 = vmax.f32 %v1301_v3, %v1321_v38  ;;  %v6011_v52 = vpop.permute.xlu1 %1520  ;;  %v1486_v14 = vld [vmem:[%s7709_s4 + $0x6a8] sm:$0xff]  ;;  %v1485_v8 = vld [vmem:[%s7709_s4 + $0x6a0] sm:$0xff] }
 0x172   :  { %1972 = vmatprep.subr.bf16.mxu1 %v7793_v49  ;;  %v6014_v1 = vpop.permute.xlu0 %1515  ;;  %v1506_v17 = vld [vmem:[%s7709_s4 + $0x748] sm:$0xff]  ;;  %v1505_v58 = vld [vmem:[%s7709_s4 + $0x740] sm:$0xff] }
 0x173   :  { %1580 = vperm.xlu1 %4682, %v1406_v20   ;;  %1575 = vperm.xlu0 %4681, %v1405_v46   ;;  %v1392_v44 = vpack.c.bf16 %v1342_v15, %v1341_v43  ;;  %v4721_v3 = vld [vmem:[%s7712_s2 + $0x64] ss:$8 sps:$4 sm:$0xff]  }
 0x174   :  { %v1410_v20 = vld [vmem:[%s7709_s4 + $0x448] sm:$0xff]  ;;  %v1409_v15 = vld [vmem:[%s7709_s4 + $0x440] sm:$0xff] }
 0x175   :  { %1973 = vmatpush1.bf16.msra.mxu1 %v1392_v44  ;;  %v6025_v45 = vpop.permute.xlu1 %1620  ;;  %v1430_v44 = vld [vmem:[%s7709_s4 + $0x4e8] sm:$0xff] }
 0x176   :  { %v6030_v4 = vpop.permute.xlu0 %1615  ;;  %4144 = vmatprep.subr.bf16.mxu1 %v7793_v49 }
 0x177   :  { %1680 = vperm.xlu1 %4682, %v1426_v22   ;;  %1675 = vperm.xlu0 %4681, %v1425_v12   ;;  %v1429_v22 = vld [vmem:[%s7709_s4 + $0x4e0] sm:$0xff] }
 0x178   :  { %1987 = vmatmul.mubr.bf16.vlgmr.msra.gmra.mrb[0].mxu1 %v4703_v32  ;;  %v4723_v12 = vld [vmem:[%s7712_s2 + $0x60] ss:$8 sps:$4 sm:$0xff]  }
 0x179   :  { %v6039_v23 = vpop.permute.xlu1 %1530  ;;  %4461 = vmatprep.mubr.msk.bf16.mxu1 %vm1893_vm1, %v4706_v10  ;;  %v4724_v10 = vld [vmem:[%s7712_s2 + $0x74] ss:$8 sps:$4 sm:$0xff]  }
 0x17a   :  { %v6042_v7 = vpop.permute.xlu0 %1525 }
 0x17b   :  { %2244 = vperm.xlu1 %4682, %v1444_v63   ;;  %2239 = vperm.xlu0 %4681, %v1443_v51   ;;  %v1448_v51 = vld [vmem:[%s7709_s4 + $0x578] sm:$0xff] }
 0x17d   :  { %v6053_v33 = vpop.permute.xlu1 %1630 }
 0x17e   :  { %v6058_v30 = vpop.permute.xlu0 %1625 }
 0x17f   :  { %2344 = vperm.xlu1 %4682, %v1464_v42   ;;  %2339 = vperm.xlu0 %4681, %v1463_v60   ;;  %v1447_v42 = vld [vmem:[%s7709_s4 + $0x570] sm:$0xff] }
 0x180   :  { %1995 = vmatmul.mubr.bf16.gmra.mrb[4].mxu1 %v4708_v6 }
 0x181   :  { %v6066_v18 = vpop.permute.xlu1 %2194  ;;  %4462 = vmatprep.mubr.msk.bf16.mxu1 %vm1893_vm1, %v4709_v13  ;;  %v1468_v13 = vld [vmem:[%s7709_s4 + $0x618] sm:$0xff] }
 0x182   :  { %v6069_v62 = vpop.permute.xlu0 %2189 }
 0x183   :  { %2484 = vperm.xlu1 %4682, %v1484_v48   ;;  %2479 = vperm.xlu0 %4681, %v1483_v28   ;;  %v1467_v48 = vld [vmem:[%s7709_s4 + $0x610] sm:$0xff] }
 0x184   :  { %v4726_v28 = vld [vmem:[%s7712_s2 + $0x70] ss:$8 sps:$4 sm:$0xff]  }
 0x185   :  { %v6080_v21 = vpop.permute.xlu1 %2294 }
 0x186   :  { %v6085_v26 = vpop.permute.xlu0 %2289 }
 0x187   :  { %2584 = vperm.xlu1 %4682, %v1504_v36   ;;  %2579 = vperm.xlu0 %4681, %v1503_v5   ;;  %v4727_v5 = vld [vmem:[%s7712_s2 + $0x84] ss:$8 sps:$4 sm:$0xff]  }
 0x188   :  { %2003 = vmatmul.mubr.bf16.gmra.mrb[8].mxu1 %v4711_v41 }
 0x189   :  { %v6093_v24 = vpop.permute.xlu1 %2434  ;;  %4463 = vmatprep.mubr.msk.bf16.mxu1 %vm1893_vm1, %v4712_v34  ;;  %v1488_v34 = vld [vmem:[%s7709_s4 + $0x6b8] sm:$0xff] }
 0x18a   :  { %v6096_v25 = vpop.permute.xlu0 %2429 }
 0x18b   :  { %1590 = vperm.xlu1 %4682, %v1408_v37   ;;  %1585 = vperm.xlu0 %4681, %v1407_v55   ;;  %v1487_v37 = vld [vmem:[%s7709_s4 + $0x6b0] sm:$0xff] }
 0x18d   :  { %v6107_v35 = vpop.permute.xlu1 %2534 }
 0x18e   :  { %v6112_v40 = vpop.permute.xlu0 %2529 }
 0x18f   :  { %1690 = vperm.xlu1 %4682, %v1428_v9   ;;  %1685 = vperm.xlu0 %4681, %v1427_v56   ;;  %v1508_v56 = vld [vmem:[%s7709_s4 + $0x758] sm:$0xff] }
 0x190   :  { %2011 = vmatmul.mubr.bf16.gmra.mrb[12].mxu1 %v4714_v29  ;;  %v1507_v29 = vld [vmem:[%s7709_s4 + $0x750] sm:$0xff] }
 0x191   :  { %v6120_v0 = vpop.permute.xlu1 %1540  ;;  %4464 = vmatprep.mubr.msk.bf16.mxu1 %vm1893_vm1, %v4715_v2  ;;  %v4729_v2 = vld [vmem:[%s7712_s2 + $0x80] ss:$8 sps:$4 sm:$0xff]  }
 0x192   :  { %v6123_v57 = vpop.permute.xlu0 %1535 }
 0x193   :  { %2254 = vperm.xlu1 %4682, %v1446_v27   ;;  %2249 = vperm.xlu0 %4681, %v1445_v47   ;;  %v4730_v47 = vld [vmem:[%s7712_s2 + $0x94] ss:$8 sps:$4 sm:$0xff]  }
 0x195   :  { %v6134_v59 = vpop.permute.xlu1 %1640 }
 0x196   :  { %v6139_v16 = vpop.permute.xlu0 %1635 }
 0x197   :  { %2354 = vperm.xlu1 %4682, %v1466_v50   ;;  %2349 = vperm.xlu0 %4681, %v1465_v54   ;;  %v1412_v54 = vld [vmem:[%s7709_s4 + $0x458] sm:$0xff] }
 0x198   :  { %2019 = vmatmul.mubr.bf16.gmra.mrb[16].mxu1 %v4717_v61  ;;  %v1411_v61 = vld [vmem:[%s7709_s4 + $0x450] sm:$0xff] }
 0x199   :  { %v6147_v53 = vpop.permute.xlu1 %2204  ;;  %4465 = vmatprep.mubr.msk.bf16.mxu1 %vm1893_vm1, %v4718_v31 }
 0x19a   :  { %v6150_v39 = vpop.permute.xlu0 %2199 }
 0x19b   :  { %2494 = vperm.xlu1 %4682, %v1486_v14   ;;  %2489 = vperm.xlu0 %4681, %v1485_v8   ;;  %v1432_v8 = vld [vmem:[%s7709_s4 + $0x4f8] sm:$0xff] }
 0x19d   :  { %v6161_v19 = vpop.permute.xlu1 %2304 }
 0x19e   :  { %v6166_v38 = vpop.permute.xlu0 %2299 }
 0x19f   :  { %2594 = vperm.xlu1 %4682, %v1506_v17   ;;  %2589 = vperm.xlu0 %4681, %v1505_v58   ;;  %v1431_v17 = vld [vmem:[%s7709_s4 + $0x4f0] sm:$0xff] }
 0x1a0   :  { %2027 = vmatmul.mubr.bf16.gmra.mrb[20].mxu1 %v4720_v11  ;;  %v4732_v58 = vld [vmem:[%s7712_s2 + $0x90] ss:$8 sps:$4 sm:$0xff]  }
 0x1a1   :  { %v6174_v46 = vpop.permute.xlu1 %2444  ;;  %4466 = vmatprep.mubr.msk.bf16.mxu1 %vm1893_vm1, %v4721_v3  ;;  %v4733_v3 = vld [vmem:[%s7712_s2 + $0xa4] ss:$8 sps:$4 sm:$0xff]  }
 0x1a2   :  { %v6177_v43 = vpop.permute.xlu0 %2439 }
 0x1a3   :  { %1600 = vperm.xlu1 %4682, %v1410_v20   ;;  %1595 = vperm.xlu0 %4681, %v1409_v15   ;;  %v1450_v15 = vld [vmem:[%s7709_s4 + $0x588] sm:$0xff] }
 0x1a5   :  { %v6188_v32 = vpop.permute.xlu1 %2544 }
 0x1a6   :  { %v6193_v63 = vpop.permute.xlu0 %2539 }
 0x1a7   :  { %1700 = vperm.xlu1 %4682, %v1430_v44   ;;  %1695 = vperm.xlu0 %4681, %v1429_v22   ;;  %v1449_v44 = vld [vmem:[%s7709_s4 + $0x580] sm:$0xff] }
 0x1a8   :  { %2035 = vmatmul.mubr.bf16.gmra.mrb[24].mxu1 %v4723_v12 }
 0x1a9   :  { %v6201_v60 = vpop.permute.xlu1 %1550  ;;  %4467 = vmatprep.mubr.msk.bf16.mxu1 %vm1893_vm1, %v4724_v10  ;;  %v1470_v10 = vld [vmem:[%s7709_s4 + $0x628] sm:$0xff] }
 0x1aa   :  { %v6204_v6 = vpop.permute.xlu0 %1545 }
 0x1ab   :  { %2264 = vperm.xlu1 %4682, %v1448_v51   ;;  %2259 = vperm.xlu0 %4681, %v1447_v42   ;;  %v1469_v51 = vld [vmem:[%s7709_s4 + $0x620] sm:$0xff] }
 0x1ac   :  { %v4735_v42 = vld [vmem:[%s7712_s2 + $0xa0] ss:$8 sps:$4 sm:$0xff]  }
 0x1ad   :  { %v6215_v36 = vpop.permute.xlu1 %1650 }
 0x1ae   :  { %v6220_v41 = vpop.permute.xlu0 %1645 }
 0x1af   :  { %2364 = vperm.xlu1 %4682, %v1468_v13   ;;  %2359 = vperm.xlu0 %4681, %v1467_v48   ;;  %v4736_v48 = vld [vmem:[%s7712_s2 + $0xb4] ss:$8 sps:$4 sm:$0xff]  }
 0x1b0   :  { %2043 = vmatmul.mubr.bf16.gmra.mrb[28].mxu1 %v4726_v28 }
 0x1b1   :  { %v6228_v55 = vpop.permute.xlu1 %2214  ;;  %4468 = vmatprep.mubr.msk.bf16.mxu1 %vm1893_vm1, %v4727_v5  ;;  %v1490_v5 = vld [vmem:[%s7709_s4 + $0x6c8] sm:$0xff] }
 0x1b2   :  { %v6231_v9 = vpop.permute.xlu0 %2209 }
 0x1b3   :  { %2504 = vperm.xlu1 %4682, %v1488_v34   ;;  %2499 = vperm.xlu0 %4681, %v1487_v37   ;;  %v1489_v34 = vld [vmem:[%s7709_s4 + $0x6c0] sm:$0xff] }
 0x1b5   :  { %v6242_v27 = vpop.permute.xlu1 %2314 }
 0x1b6   :  { %v6247_v50 = vpop.permute.xlu0 %2309 }
 0x1b7   :  { %2604 = vperm.xlu1 %4682, %v1508_v56   ;;  %2599 = vperm.xlu0 %4681, %v1507_v29   ;;  %v1510_v29 = vld [vmem:[%s7709_s4 + $0x768] sm:$0xff] }
 0x1b8   :  { %2051 = vmatmul.mubr.bf16.gmra.mrb[32].mxu1 %v4729_v2  ;;  %v1509_v2 = vld [vmem:[%s7709_s4 + $0x760] sm:$0xff] }
 0x1b9   :  { %v6255_v31 = vpop.permute.xlu1 %2454  ;;  %4469 = vmatprep.mubr.msk.bf16.mxu1 %vm1893_vm1, %v4730_v47  ;;  %v4738_v47 = vld [vmem:[%s7712_s2 + $0xb0] ss:$8 sps:$4 sm:$0xff]  }
 0x1ba   :  { %v6258_v14 = vpop.permute.xlu0 %2449 }
 0x1bb   :  { %1610 = vperm.xlu1 %4682, %v1412_v54   ;;  %1605 = vperm.xlu0 %4681, %v1411_v61   ;;  %v4739_v61 = vld [vmem:[%s7712_s2 + $0xc4] ss:$8 sps:$4 sm:$0xff]  }
 0x1bd   :  { %v6269_v11 = vpop.permute.xlu1 %2554 }
 0x1be   :  { %v6274_v20 = vpop.permute.xlu0 %2549 }
 0x1bf   :  { %1710 = vperm.xlu1 %4682, %v1432_v8   ;;  %1705 = vperm.xlu0 %4681, %v1431_v17   ;;  %v1452_v17 = vld [vmem:[%s7709_s4 + $0x598] sm:$0xff] }
 0x1c0   :  { %2059 = vmatmul.mubr.bf16.gmra.mrb[36].mxu1 %v4732_v58  ;;  %v1451_v58 = vld [vmem:[%s7709_s4 + $0x590] sm:$0xff] }
 0x1c1   :  { %v6282_v22 = vpop.permute.xlu1 %1560  ;;  %4470 = vmatprep.mubr.msk.bf16.mxu1 %vm1893_vm1, %v4733_v3 }
 0x1c2   :  { %v6285_v12 = vpop.permute.xlu0 %1555 }
 0x1c3   :  { %2274 = vperm.xlu1 %4682, %v1450_v15   ;;  %2269 = vperm.xlu0 %4681, %v1449_v44   ;;  %v1472_v44 = vld [vmem:[%s7709_s4 + $0x638] sm:$0xff] }
 0x1c5   :  { %v6296_v13 = vpop.permute.xlu1 %1660 }
 0x1c6   :  { %7834 = vst [vmem:[#allocation3_spill] sm:$0xff] %v6296_v13  ;;  %v6301_v28 = vpop.permute.xlu0 %1655 }
 0x1c7   :  { %7835 = vst [vmem:[#allocation19_spill] sm:$0xff] %v6301_v28  ;;  %2374 = vperm.xlu1 %4682, %v1470_v10   ;;  %2369 = vperm.xlu0 %4681, %v1469_v51   ;;  %v1471_v10 = vld [vmem:[%s7709_s4 + $0x630] sm:$0xff]  ;;  %v4741_v51 = vld [vmem:[%s7712_s2 + $0xc0] ss:$8 sps:$4 sm:$0xff]  }
 0x1c8   :  { %2067 = vmatmul.mubr.bf16.gmra.mrb[40].mxu1 %v4735_v42 }
 0x1c9   :  { %v6309_v37 = vpop.permute.xlu1 %2224  ;;  %4471 = vmatprep.mubr.msk.bf16.mxu1 %vm1893_vm1, %v4736_v48  ;;  %v4742_v48 = vld [vmem:[%s7712_s2 + $0xd4] ss:$8 sps:$4 sm:$0xff]  }
 0x1ca   :  { %7836 = vst [vmem:[#allocation12_spill] sm:$0xff] %v6309_v37  ;;  %v6312_v56 = vpop.permute.xlu0 %2219 }
 0x1cb   :  { %2514 = vperm.xlu1 %4682, %v1490_v5   ;;  %2509 = vperm.xlu0 %4681, %v1489_v34   ;;  %v1492_v34 = vld [vmem:[%s7709_s4 + $0x6d8] sm:$0xff] }
 0x1cd   :  { %v6323_v54 = vpop.permute.xlu1 %2324 }
 0x1ce   :  { %7837 = vst [vmem:[#allocation5_spill] sm:$0xff] %v6323_v54  ;;  %v6328_v8 = vpop.permute.xlu0 %2319 }
 0x1cf   :  { %7838 = vst [vmem:[#allocation13_spill] sm:$0xff] %v6328_v8  ;;  %2614 = vperm.xlu1 %4682, %v1510_v29   ;;  %2609 = vperm.xlu0 %4681, %v1509_v2   ;;  %v1491_v29 = vld [vmem:[%s7709_s4 + $0x6d0] sm:$0xff] }
 0x1d0   :  { %2075 = vmatmul.mubr.bf16.gmra.mrb[44].mxu1 %v4738_v47 }
 0x1d1   :  { %v6336_v3 = vpop.permute.xlu1 %2464  ;;  %4472 = vmatprep.mubr.msk.bf16.mxu1 %vm1893_vm1, %v4739_v61  ;;  %v1512_v61 = vld [vmem:[%s7709_s4 + $0x778] sm:$0xff] }
 0x1d2   :  { %7839 = vst [vmem:[#allocation6_spill] sm:$0xff] %v6336_v3  ;;  %v6339_v15 = vpop.permute.xlu0 %2459 }
 0x1d3   :  { %7840 = vst [vmem:[#allocation15_spill] sm:$0xff] %v6339_v15  ;;  %2284 = vperm.xlu1 %4682, %v1452_v17   ;;  %2279 = vperm.xlu0 %4681, %v1451_v58   ;;  %v1511_v17 = vld [vmem:[%s7709_s4 + $0x770] sm:$0xff] }
 0x1d4   :  { %v4744_v58 = vld [vmem:[%s7712_s2 + $0xd0] ss:$8 sps:$4 sm:$0xff]  }
 0x1d5   :  { %v6350_v42 = vpop.permute.xlu1 %2564 }
 0x1d6   :  { %7841 = vst [vmem:[#allocation11_spill] sm:$0xff] %v6350_v42  ;;  %v6355_v5 = vpop.permute.xlu0 %2559 }
 0x1d7   :  { %7842 = vst [vmem:[#allocation34_spill] sm:$0xff] %v6355_v5  ;;  %2384 = vperm.xlu1 %4682, %v1472_v44   ;;  %2379 = vperm.xlu0 %4681, %v1471_v10   ;;  %v4745_v10 = vld [vmem:[%s7712_s2 + $0xe4] ss:$8 sps:$4 sm:$0xff]  }
 0x1d8   :  { %2083 = vmatmul.mubr.bf16.gmra.mrb[48].mxu1 %v4741_v51 }
 0x1d9   :  { %4473 = vmatprep.mubr.msk.bf16.mxu1 %vm1893_vm1, %v4742_v48  ;;  %v2738_v48 = vld [vmem:[%s7709_s4 + $0x788] sm:$0xff] }
 0x1da   :  { %v6363_v2 = vpop.permute.xlu1 %1570  ;;  %v6366_v47 = vpop.permute.xlu0 %1565 }
 0x1db   :  { %7843 = vst [vmem:[#allocation30_spill] sm:$0xff] %v6363_v2  ;;  %7844 = vst [vmem:[#allocation8_spill] sm:$0xff] %v6366_v47  ;;  %2524 = vperm.xlu1 %4682, %v1492_v34   ;;  %2519 = vperm.xlu0 %4681, %v1491_v29   ;;  %v2737_v34 = vld [vmem:[%s7709_s4 + $0x780] sm:$0xff]  ;;  %v2739_v2 = vld [vmem:[%s7709_s4 + $0x790] sm:$0xff] }
 0x1de   :  { %v6377_v44 = vpop.permute.xlu1 %1670  ;;  %v6382_v51 = vpop.permute.xlu0 %1665 }
 0x1df   :  { %7845 = vst [vmem:[#allocation4_spill] sm:$0xff] %v6377_v44  ;;  %7846 = vst [vmem:[#allocation23_spill] sm:$0xff] %v6382_v51  ;;  %2624 = vperm.xlu1 %4682, %v1512_v61   ;;  %2619 = vperm.xlu0 %4681, %v1511_v17   ;;  %v2758_v61 = vld [vmem:[%s7709_s4 + $0x828] sm:$0xff]  ;;  %v2757_v17 = vld [vmem:[%s7709_s4 + $0x820] sm:$0xff] }
 0x1e0   :  { %2091 = vmatmul.mubr.bf16.gmra.mrb[52].mxu1 %v4744_v58  ;;  %v4747_v58 = vld [vmem:[%s7712_s2 + $0xe0] ss:$8 sps:$4 sm:$0xff]  }
 0x1e1   :  { %4474 = vmatprep.mubr.msk.bf16.mxu1 %vm1893_vm1, %v4745_v10  ;;  %v4748_v10 = vld [vmem:[%s7712_s2 + $0xf4] ss:$8 sps:$4 sm:$0xff]  }
 0x1e2   :  { %v6390_v29 = vpop.permute.xlu1 %2234  ;;  %v6393_v44 = vpop.permute.xlu0 %2229 }
 0x1e3   :  { %7847 = vst [vmem:[#allocation14_spill] sm:$0xff] %v6390_v29  ;;  %7848 = vst [vmem:[#allocation17_spill] sm:$0xff] %v6393_v44  ;;  %2864 = vperm.xlu1 %4682, %v2738_v48   ;;  %2859 = vperm.xlu0 %4681, %v2737_v34   ;;  %v2740_v34 = vld [vmem:[%s7709_s4 + $0x798] sm:$0xff] }
 0x1e6   :  { %v6404_v51 = vpop.permute.xlu1 %2334  ;;  %v6409_v48 = vpop.permute.xlu0 %2329 }
 0x1e7   :  { %7849 = vst [vmem:[#allocation18_spill] sm:$0xff] %v6404_v51  ;;  %7850 = vst [vmem:[#allocation7_spill] sm:$0xff] %v6409_v48  ;;  %2964 = vperm.xlu1 %4682, %v2758_v61   ;;  %2959 = vperm.xlu0 %4681, %v2757_v17   ;;  %v2760_v61 = vld [vmem:[%s7709_s4 + $0x838] sm:$0xff]  ;;  %v2759_v17 = vld [vmem:[%s7709_s4 + $0x830] sm:$0xff] }
 0x1e8   :  { %2099 = vmatmul.mubr.bf16.gmra.mrb[56].mxu1 %v4747_v58  ;;  %v4750_v58 = vld [vmem:[%s7712_s2 + $0xf0] ss:$8 sps:$4 sm:$0xff]  }
 0x1e9   :  { %4475 = vmatprep.mubr.msk.bf16.mxu1 %vm1893_vm1, %v4748_v10  ;;  %v4751_v10 = vld [vmem:[%s7712_s2 + $0x104] ss:$8 sps:$4 sm:$0xff]  }
 0x1ea   :  { %v6417_v29 = vpop.permute.xlu1 %2474  ;;  %v6420_v51 = vpop.permute.xlu0 %2469 }
 0x1eb   :  { %7851 = vst [vmem:[#allocation10_spill] sm:$0xff] %v6417_v29  ;;  %7852 = vst [vmem:[#allocation27_spill] sm:$0xff] %v6420_v51  ;;  %2874 = vperm.xlu1 %4682, %v2740_v34   ;;  %2869 = vperm.xlu0 %4681, %v2739_v2   ;;  %v2778_v2 = vld [vmem:[%s7709_s4 + $0x8c8] sm:$0xff]  ;;  %v2777_v29 = vld [vmem:[%s7709_s4 + $0x8c0] sm:$0xff] }
 0x1ee   :  { %v6431_v48 = vpop.permute.xlu1 %2574  ;;  %v6436_v34 = vpop.permute.xlu0 %2569 }
 0x1ef   :  { %7853 = vst [vmem:[#allocation50_spill] sm:$0xff] %v6431_v48  ;;  %7854 = vst [vmem:[#allocation16_spill] sm:$0xff] %v6436_v34  ;;  %2974 = vperm.xlu1 %4682, %v2760_v61   ;;  %2969 = vperm.xlu0 %4681, %v2759_v17   ;;  %v2798_v61 = vld [vmem:[%s7709_s4 + $0x968] sm:$0xff]  ;;  %v2797_v17 = vld [vmem:[%s7709_s4 + $0x960] sm:$0xff] }
 0x1f0   :  { %2107 = vmatmul.mubr.bf16.gmra.mrb[60].mxu1 %v4750_v58  ;;  %v4753_v58 = vld [vmem:[%s7712_s2 + $0x100] ss:$8 sps:$4 sm:$0xff]  }
 0x1f1   :  { %4476 = vmatprep.mubr.msk.bf16.mxu1 %vm1893_vm1, %v4751_v10  ;;  %v4754_v10 = vld [vmem:[%s7712_s2 + $0x114] ss:$8 sps:$4 sm:$0xff]  }
 0x1f2   :  { %v6444_v51 = vpop.permute.xlu1 %1580  ;;  %v6447_v48 = vpop.permute.xlu0 %1575 }
 0x1f3   :  { %7855 = vst [vmem:[#allocation26_spill] sm:$0xff] %v6444_v51  ;;  %7856 = vst [vmem:[#allocation54_spill] sm:$0xff] %v6447_v48  ;;  %3537 = vperm.xlu1 %4682, %v2778_v2   ;;  %3532 = vperm.xlu0 %4681, %v2777_v29   ;;  %v2818_v29 = vld [vmem:[%s7709_s4 + $0xa08] sm:$0xff]  ;;  %v2817_v51 = vld [vmem:[%s7709_s4 + $0xa00] sm:$0xff] }
 0x1f6   :  { %v6458_v34 = vpop.permute.xlu1 %1680  ;;  %v6463_v2 = vpop.permute.xlu0 %1675 }
 0x1f7   :  { %7857 = vst [vmem:[#allocation9_spill] sm:$0xff] %v6458_v34  ;;  %7858 = vst [vmem:[#allocation38_spill] sm:$0xff] %v6463_v2  ;;  %3637 = vperm.xlu1 %4682, %v2798_v61   ;;  %3632 = vperm.xlu0 %4681, %v2797_v17   ;;  %v2838_v61 = vld [vmem:[%s7709_s4 + $0xaa8] sm:$0xff]  ;;  %v2837_v17 = vld [vmem:[%s7709_s4 + $0xaa0] sm:$0xff] }
 0x1f8   :  { %2115 = vmatmul.mubr.bf16.gmra.mrb[64].mxu1 %v4753_v58  ;;  %v4756_v58 = vld [vmem:[%s7712_s2 + $0x110] ss:$8 sps:$4 sm:$0xff]  }
 0x1f9   :  { %4477 = vmatprep.mubr.msk.bf16.mxu1 %vm1893_vm1, %v4754_v10  ;;  %v4757_v10 = vld [vmem:[%s7712_s2 + $0x124] ss:$8 sps:$4 sm:$0xff]  }
 0x1fa   :  { %v6471_v48 = vpop.permute.xlu1 %2244  ;;  %v6474_v34 = vpop.permute.xlu0 %2239 }
 0x1fb   :  { %7859 = vst [vmem:[#allocation49_spill] sm:$0xff] %v6471_v48  ;;  %7860 = vst [vmem:[#allocation32_spill] sm:$0xff] %v6474_v34  ;;  %3777 = vperm.xlu1 %4682, %v2818_v29   ;;  %3772 = vperm.xlu0 %4681, %v2817_v51   ;;  %v2742_v51 = vld [vmem:[%s7709_s4 + $0x7a8] sm:$0xff]  ;;  %v2741_v48 = vld [vmem:[%s7709_s4 + $0x7a0] sm:$0xff] }
 0x1fe   :  { %v6485_v2 = vpop.permute.xlu1 %2344  ;;  %v6490_v29 = vpop.permute.xlu0 %2339 }
 0x1ff   :  { %7861 = vst [vmem:[#allocation37_spill] sm:$0xff] %v6485_v2  ;;  %7862 = vst [vmem:[#allocation53_spill] sm:$0xff] %v6490_v29  ;;  %3877 = vperm.xlu1 %4682, %v2838_v61   ;;  %3872 = vperm.xlu0 %4681, %v2837_v17   ;;  %v2762_v61 = vld [vmem:[%s7709_s4 + $0x848] sm:$0xff]  ;;  %v2761_v17 = vld [vmem:[%s7709_s4 + $0x840] sm:$0xff] }
 0x200   :  { %2123 = vmatmul.mubr.bf16.gmra.mrb[68].mxu1 %v4756_v58  ;;  %v4759_v58 = vld [vmem:[%s7712_s2 + $0x120] ss:$8 sps:$4 sm:$0xff]  }
 0x201   :  { %4478 = vmatprep.mubr.msk.bf16.mxu1 %vm1893_vm1, %v4757_v10  ;;  %v4760_v10 = vld [vmem:[%s7712_s2 + $0x134] ss:$8 sps:$4 sm:$0xff]  }
 0x202   :  { %v6498_v34 = vpop.permute.xlu1 %2484  ;;  %v6501_v2 = vpop.permute.xlu0 %2479 }
 0x203   :  { %7863 = vst [vmem:[#allocation21_spill] sm:$0xff] %v6498_v34  ;;  %7864 = vst [vmem:[#allocation33_spill] sm:$0xff] %v6501_v2  ;;  %2884 = vperm.xlu1 %4682, %v2742_v51   ;;  %2879 = vperm.xlu0 %4681, %v2741_v48   ;;  %v2780_v48 = vld [vmem:[%s7709_s4 + $0x8d8] sm:$0xff]  ;;  %v2779_v34 = vld [vmem:[%s7709_s4 + $0x8d0] sm:$0xff] }
 0x206   :  { %v6512_v29 = vpop.permute.xlu1 %2584  ;;  %v6517_v51 = vpop.permute.xlu0 %2579 }
 0x207   :  { %7865 = vst [vmem:[#allocation36_spill] sm:$0xff] %v6512_v29  ;;  %7866 = vst [vmem:[#allocation31_spill] sm:$0xff] %v6517_v51  ;;  %2984 = vperm.xlu1 %4682, %v2762_v61   ;;  %2979 = vperm.xlu0 %4681, %v2761_v17   ;;  %v2800_v61 = vld [vmem:[%s7709_s4 + $0x978] sm:$0xff]  ;;  %v2799_v17 = vld [vmem:[%s7709_s4 + $0x970] sm:$0xff] }
 0x208   :  { %2131 = vmatmul.mubr.bf16.gmra.mrb[72].mxu1 %v4759_v58  ;;  %v4762_v58 = vld [vmem:[%s7712_s2 + $0x130] ss:$8 sps:$4 sm:$0xff]  }
 0x209   :  { %4479 = vmatprep.mubr.msk.bf16.mxu1 %vm1893_vm1, %v4760_v10  ;;  %v2819_v10 = vld [vmem:[%s7709_s4 + $0xa10] sm:$0xff] }
 0x20a   :  { %v6525_v2 = vpop.permute.xlu1 %1590  ;;  %v6528_v29 = vpop.permute.xlu0 %1585 }
 0x20b   :  { %7867 = vst [vmem:[#allocation22_spill] sm:$0xff] %v6525_v2  ;;  %7868 = vst [vmem:[#allocation25_spill] sm:$0xff] %v6528_v29  ;;  %3547 = vperm.xlu1 %4682, %v2780_v48   ;;  %3542 = vperm.xlu0 %4681, %v2779_v34   ;;  %v2820_v34 = vld [vmem:[%s7709_s4 + $0xa18] sm:$0xff] }
 0x20e   :  { %v6539_v51 = vpop.permute.xlu1 %1690  ;;  %v6541_v2 = vpop.permute.xlu0 %1685 }
 0x20f   :  { %7869 = vst [vmem:[#allocation20_spill] sm:$0xff] %v6539_v51  ;;  %7870 = vst [vmem:[#allocation35_spill] sm:$0xff] %v6541_v2  ;;  %3647 = vperm.xlu1 %4682, %v2800_v61   ;;  %3642 = vperm.xlu0 %4681, %v2799_v17   ;;  %v2840_v61 = vld [vmem:[%s7709_s4 + $0xab8] sm:$0xff]  ;;  %v2839_v17 = vld [vmem:[%s7709_s4 + $0xab0] sm:$0xff] }
 0x210   :  { %2139 = vmatmul.mubr.bf16.gmra.mrb[76].mxu1 %v4762_v58  ;;  %v2744_v2 = vld [vmem:[%s7709_s4 + $0x7b8] sm:$0xff] }
 0x212   :  { %v6549_v48 = vpop.permute.xlu1 %2254  ;;  %v6551_v29 = vpop.permute.xlu0 %2249 }
 0x213   :  { %7871 = vst [vmem:[#allocation40_spill] sm:$0xff] %v6549_v48  ;;  %7872 = vst [vmem:[#allocation24_spill] sm:$0xff] %v6551_v29  ;;  %3787 = vperm.xlu1 %4682, %v2820_v34   ;;  %3782 = vperm.xlu0 %4681, %v2819_v10   ;;  %v2743_v34 = vld [vmem:[%s7709_s4 + $0x7b0] sm:$0xff] }
 0x216   :  { %v6559_v51 = vpop.permute.xlu1 %2354  ;;  %v6561_v58 = vpop.permute.xlu0 %2349 }
 0x217   :  { %7873 = vst [vmem:[#allocation29_spill] sm:$0xff] %v6559_v51  ;;  %7874 = vst [vmem:[#allocation42_spill] sm:$0xff] %v6561_v58  ;;  %3887 = vperm.xlu1 %4682, %v2840_v61   ;;  %3882 = vperm.xlu0 %4681, %v2839_v17   ;;  %v2764_v51 = vld [vmem:[%s7709_s4 + $0x858] sm:$0xff]  ;;  %v2763_v61 = vld [vmem:[%s7709_s4 + $0x850] sm:$0xff] }
 0x21a   :  { %v6569_v10 = vpop.permute.xlu1 %2494  ;;  %v6571_v48 = vpop.permute.xlu0 %2489 }
 0x21b   :  { %7875 = vst [vmem:[#allocation39_spill] sm:$0xff] %v6569_v10  ;;  %7876 = vst [vmem:[#allocation41_spill] sm:$0xff] %v6571_v48  ;;  %2894 = vperm.xlu1 %4682, %v2744_v2   ;;  %2889 = vperm.xlu0 %4681, %v2743_v34   ;;  %v2782_v10 = vld [vmem:[%s7709_s4 + $0x8e8] sm:$0xff]  ;;  %v2781_v2 = vld [vmem:[%s7709_s4 + $0x8e0] sm:$0xff] }
 0x21c   :  { %v2802_v34 = vld [vmem:[%s7709_s4 + $0x988] sm:$0xff] }
 0x21e   :  { %v6579_v17 = vpop.permute.xlu0 %2589  ;;  %v6584_v58 = vpop.permute.xlu1 %2594 }
 0x21f   :  { %2994 = vperm.xlu1 %4682, %v2764_v51   ;;  %7877 = vst [vmem:[#allocation28_spill] sm:$0xff] %v6579_v17  ;;  %2989 = vperm.xlu0 %4681, %v2763_v61   ;;  %7878 = vst [vmem:[#allocation52_spill] sm:$0xff] %v6584_v58  ;;  %v2801_v51 = vld [vmem:[%s7709_s4 + $0x980] sm:$0xff]  ;;  %v2822_v58 = vld [vmem:[%s7709_s4 + $0xa28] sm:$0xff] }
 0x222   :  { %v6595_v61 = vpop.permute.xlu0 %1595  ;;  %v6597_v17 = vpop.permute.xlu1 %1600 }
 0x223   :  { %3557 = vperm.xlu1 %4682, %v2782_v10   ;;  %3552 = vperm.xlu0 %4681, %v2781_v2   ;;  %7879 = vst [vmem:[#allocation44_spill] sm:$0xff] %v6595_v61  ;;  %7880 = vst [vmem:[#allocation46_spill] sm:$0xff] %v6597_v17  ;;  %v2821_v10 = vld [vmem:[%s7709_s4 + $0xa20] sm:$0xff]  ;;  %v2842_v61 = vld [vmem:[%s7709_s4 + $0xac8] sm:$0xff] }
 0x224   :  { %v2784_v17 = vld [vmem:[%s7709_s4 + $0x8f8] sm:$0xff] }
 0x226   :  { %v6605_v2 = vpop.permute.xlu0 %1695  ;;  %v6610_v48 = vpop.permute.xlu1 %1700 }
 0x227   :  { %3657 = vperm.xlu1 %4682, %v2802_v34   ;;  %3652 = vperm.xlu0 %4681, %v2801_v51   ;;  %7881 = vst [vmem:[#allocation48_spill] sm:$0xff] %v6605_v2  ;;  %7882 = vst [vmem:[#allocation43_spill] sm:$0xff] %v6610_v48  ;;  %v2841_v34 = vld [vmem:[%s7709_s4 + $0xac0] sm:$0xff]  ;;  %v2746_v51 = vld [vmem:[%s7709_s4 + $0x7c8] sm:$0xff] }
 0x228   :  { %v2766_v48 = vld [vmem:[%s7709_s4 + $0x868] sm:$0xff] }
 0x22a   :  { %v6623_v2 = vpop.permute.xlu1 %2264 }
 0x22b   :  { %3797 = vperm.xlu1 %4682, %v2822_v58   ;;  %3792 = vperm.xlu0 %4681, %v2821_v10   ;;  %v2745_v58 = vld [vmem:[%s7709_s4 + $0x7c0] sm:$0xff]  ;;  %v6621_v10 = vpop.permute.xlu0 %2259  ;;  %7884 = vst [vmem:[#allocation45_spill] sm:$0xff] %v6623_v2 }
 0x22c   :  { %7883 = vst [vmem:[#allocation51_spill] sm:$0xff] %v6621_v10 }
 0x22e   :  { %v6636_v10 = vpop.permute.xlu1 %2364 }
 0x22f   :  { %3897 = vperm.xlu1 %4682, %v2842_v61   ;;  %3892 = vperm.xlu0 %4681, %v2841_v34   ;;  %v2765_v61 = vld [vmem:[%s7709_s4 + $0x860] sm:$0xff]  ;;  %v6631_v34 = vpop.permute.xlu0 %2359  ;;  %7886 = vst [vmem:[#allocation56_spill] sm:$0xff] %v6636_v10  ;;  %v2824_v10 = vld [vmem:[%s7709_s4 + $0xa38] sm:$0xff] }
 0x230   :  { %7885 = vst [vmem:[#allocation47_spill] sm:$0xff] %v6631_v34 }
 0x232   :  { %v6649_v34 = vpop.permute.xlu1 %2504 }
 0x233   :  { %2904 = vperm.xlu1 %4682, %v2746_v51   ;;  %2899 = vperm.xlu0 %4681, %v2745_v58   ;;  %v2783_v51 = vld [vmem:[%s7709_s4 + $0x8f0] sm:$0xff]  ;;  %v2804_v58 = vld [vmem:[%s7709_s4 + $0x998] sm:$0xff]  ;;  %7888 = vst [vmem:[#allocation57_spill] sm:$0xff] %v6649_v34 }
 0x236   :  { %v6662_v2 = vpop.permute.xlu1 %2604 }
 0x237   :  { %3004 = vperm.xlu1 %4682, %v2766_v48   ;;  %2999 = vperm.xlu0 %4681, %v2765_v61   ;;  %v2803_v48 = vld [vmem:[%s7709_s4 + $0x990] sm:$0xff]  ;;  %v6647_v61 = vpop.permute.xlu0 %2499  ;;  %7890 = vst [vmem:[#allocation59_spill] sm:$0xff] %v6662_v2 }
 0x238   :  { %7887 = vst [vmem:[#allocation55_spill] sm:$0xff] %v6647_v61  ;;  %v2844_v61 = vld [vmem:[%s7709_s4 + $0xad8] sm:$0xff] }
 0x23a   :  { %v6675_v34 = vpop.permute.xlu1 %1610 }
 0x23b   :  { %3567 = vperm.xlu1 %4682, %v2784_v17   ;;  %3562 = vperm.xlu0 %4681, %v2783_v51   ;;  %v2823_v17 = vld [vmem:[%s7709_s4 + $0xa30] sm:$0xff]  ;;  %v6657_v51 = vpop.permute.xlu0 %2599  ;;  %7892 = vst [vmem:[#allocation61_spill] sm:$0xff] %v6675_v34 }
 0x23c   :  { %7889 = vst [vmem:[#allocation58_spill] sm:$0xff] %v6657_v51  ;;  %v2767_v51 = vld [vmem:[%s7709_s4 + $0x870] sm:$0xff] }
 0x23f   :  { %3667 = vperm.xlu1 %4682, %v2804_v58   ;;  %3662 = vperm.xlu0 %4681, %v2803_v48   ;;  %v2843_v58 = vld [vmem:[%s7709_s4 + $0xad0] sm:$0xff]  ;;  %v2748_v48 = vld [vmem:[%s7709_s4 + $0x7d8] sm:$0xff] }
 0x243   :  { %3807 = vperm.xlu1 %4682, %v2824_v10   ;;  %3802 = vperm.xlu0 %4681, %v2823_v17   ;;  %v2747_v10 = vld [vmem:[%s7709_s4 + $0x7d0] sm:$0xff]  ;;  %v6673_v17 = vpop.permute.xlu0 %1605 }
 0x244   :  { %7891 = vst [vmem:[#allocation60_spill] sm:$0xff] %v6673_v17 }
 0x247   :  { %3907 = vperm.xlu1 %4682, %v2844_v61   ;;  %3902 = vperm.xlu0 %4681, %v2843_v58   ;;  %v2768_v61 = vld [vmem:[%s7709_s4 + $0x878] sm:$0xff]  ;;  %v6687_v17 = vpop.permute.xlu0 %1705 }
 0x248   :  { %7893 = vst [vmem:[#allocation62_spill] sm:$0xff] %v6687_v17 }
 0x24b   :  { %2914 = vperm.xlu1 %4682, %v2748_v48   ;;  %2909 = vperm.xlu0 %4681, %v2747_v10   ;;  %v6677_v2 = vpop.f32.mrb[0].mxu1  ;;  %v2786_v48 = vld [vmem:[%s7709_s4 + $0x908] sm:$0xff]  ;;  %v6692_v10 = vpop.permute.xlu1 %1710 }
 0x24c   :  { %v1990_v58 = vpop.f32.mrb[1].mxu1  ;;  %7894 = vst [vmem:[#allocation63_spill] sm:$0xff] %v6692_v10  ;;  %v6705_v17 = vpop.permute.xlu0 %2269 }
 0x24d   :  { %v6685_v29 = vpop.f32.mrb[2].mxu1  ;;  %v2785_v58 = vld [vmem:[%s7709_s4 + $0x900] sm:$0xff]  ;;  %7895 = vst [vmem:[#allocation64_spill] sm:$0xff] %v6705_v17 }
 0x24e   :  { %v1993_v13 = vpop.f32.mrb[3].mxu1 }
 0x24f   :  { %3014 = vperm.xlu1 %4682, %v2768_v61   ;;  %3009 = vperm.xlu0 %4681, %v2767_v51   ;;  %v2806_v13 = vld [vmem:[%s7709_s4 + $0x9a8] sm:$0xff]  ;;  %v2805_v51 = vld [vmem:[%s7709_s4 + $0x9a0] sm:$0xff]  ;;  %v6709_v47 = vpop.permute.xlu1 %2274 }
 0x250   :  { %7896 = vst [vmem:[#allocation65_spill] sm:$0xff] %v6709_v47  ;;  %v2845_v47 = vld [vmem:[%s7709_s4 + $0xae0] sm:$0xff] }
 0x253   :  { %3577 = vperm.xlu1 %4682, %v2786_v48   ;;  %3572 = vperm.xlu0 %4681, %v2785_v58   ;;  %v6697_v34 = vpop.f32.mrb[4].mxu1  ;;  %v2826_v48 = vld [vmem:[%s7709_s4 + $0xa48] sm:$0xff]  ;;  %v2825_v58 = vld [vmem:[%s7709_s4 + $0xa40] sm:$0xff] }
 0x254   :  { %v1998_v61 = vpop.f32.mrb[5].mxu1 }
 0x255   :  { %v6707_v10 = vpop.f32.mrb[6].mxu1  ;;  %v6717_v61 = vpop.permute.xlu0 %2369 }
 0x256   :  { %v2001_v44 = vpop.f32.mrb[7].mxu1  ;;  %7897 = vst [vmem:[#allocation66_spill] sm:$0xff] %v6717_v61 }
 0x257   :  { %3677 = vperm.xlu1 %4682, %v2806_v13   ;;  %3672 = vperm.xlu0 %4681, %v2805_v51   ;;  %v2846_v44 = vld [vmem:[%s7709_s4 + $0xae8] sm:$0xff]  ;;  %v6724_v13 = vpop.permute.xlu1 %2374 }
 0x258   :  { %7898 = vst [vmem:[#allocation67_spill] sm:$0xff] %v6724_v13  ;;  %v16_v13 = vstv %s7713_s10 }
 0x259   :  { %v6737_v61 = vpop.permute.xlu0 %2509  ;;  %17 = vst [vmem:[#allocation2] sm:$0x1] %v16_v13  ;;  %v2787_v13 = vld [vmem:[%s7709_s4 + $0x910] sm:$0xff] }
 0x25a   :  { %7899 = vst [vmem:[#allocation68_spill] sm:$0xff] %v6737_v61  ;;  %v2769_v61 = vld [vmem:[%s7709_s4 + $0x880] sm:$0xff] }
 0x25b   :  { %3817 = vperm.xlu1 %4682, %v2826_v48   ;;  %3812 = vperm.xlu0 %4681, %v2825_v58   ;;  %v6719_v17 = vpop.f32.mrb[8].mxu1  ;;  %v2750_v48 = vld [vmem:[%s7709_s4 + $0x7e8] sm:$0xff]  ;;  %v2749_v58 = vld [vmem:[%s7709_s4 + $0x7e0] sm:$0xff] }
 0x25c   :  { %v2006_v51 = vpop.f32.mrb[9].mxu1 }
 0x25d   :  { %v6729_v28 = vpop.f32.mrb[10].mxu1  ;;  %v6739_v51 = vpop.permute.xlu1 %2514 }
 0x25e   :  { %v2009_v42 = vpop.f32.mrb[11].mxu1  ;;  %7900 = vst [vmem:[#allocation69_spill] sm:$0xff] %v6739_v51  ;;  %v6754_v51 = vpop.permute.xlu0 %2609 }
 0x25f   :  { %3917 = vperm.xlu1 %4682, %v2846_v44   ;;  %3912 = vperm.xlu0 %4681, %v2845_v47   ;;  %v2770_v47 = vld [vmem:[%s7709_s4 + $0x888] sm:$0xff]  ;;  %7901 = vst [vmem:[#allocation70_spill] sm:$0xff] %v6754_v51 }
 0x261   :  { %v6759_v54 = vpop.permute.xlu1 %2614 }
 0x262   :  { %7902 = vst [vmem:[#allocation71_spill] sm:$0xff] %v6759_v54  ;;  %v6772_v51 = vpop.permute.xlu0 %2279 }
 0x263   :  { %2924 = vperm.xlu1 %4682, %v2750_v48   ;;  %2919 = vperm.xlu0 %4681, %v2749_v58   ;;  %v6744_v42 = vpop.f32.mrb[12].mxu1  ;;  %v2788_v58 = vld [vmem:[%s7709_s4 + $0x918] sm:$0xff]  ;;  %7903 = vst [vmem:[#allocation72_spill] sm:$0xff] %v6772_v51 }
 0x264   :  { %v2014_v44 = vpop.f32.mrb[13].mxu1 }
 0x265   :  { %v6752_v3 = vpop.f32.mrb[14].mxu1  ;;  %v6776_v5 = vpop.permute.xlu1 %2284 }
 0x266   :  { %v2017_v48 = vpop.f32.mrb[15].mxu1  ;;  %7905 = vst [vmem:[#allocation74_spill] sm:$0xff] %v6776_v5  ;;  %v2847_v5 = vld [vmem:[%s7709_s4 + $0xaf0] sm:$0xff] }
 0x267   :  { %3024 = vperm.xlu1 %4682, %v2770_v47   ;;  %3019 = vperm.xlu0 %4681, %v2769_v61   ;;  %v2808_v47 = vld [vmem:[%s7709_s4 + $0x9b8] sm:$0xff]  ;;  %v2807_v61 = vld [vmem:[%s7709_s4 + $0x9b0] sm:$0xff] }
 0x269   :  { %v6797_v51 = vpop.permute.xlu1 %2384 }
 0x26a   :  { %7908 = vst [vmem:[#allocation77_spill] sm:$0xff] %v6797_v51 }
 0x26b   :  { %3587 = vperm.xlu1 %4682, %v2788_v58   ;;  %3582 = vperm.xlu0 %4681, %v2787_v13   ;;  %v6764_v44 = vpop.f32.mrb[16].mxu1  ;;  %v2828_v58 = vld [vmem:[%s7709_s4 + $0xa58] sm:$0xff]  ;;  %v2827_v13 = vld [vmem:[%s7709_s4 + $0xa50] sm:$0xff] }
 0x26c   :  { %v2022_v48 = vpop.f32.mrb[17].mxu1 }
 0x26d   :  { %v6774_v54 = vpop.f32.mrb[18].mxu1  ;;  %v2848_v48 = vld [vmem:[%s7709_s4 + $0xaf8] sm:$0xff] }
 0x26e   :  { %7904 = vst [vmem:[#allocation73_spill] sm:$0xff] %v6774_v54  ;;  %v2025_v15 = vpop.f32.mrb[19].mxu1 }
 0x26f   :  { %3687 = vperm.xlu1 %4682, %v2808_v47   ;;  %3682 = vperm.xlu0 %4681, %v2807_v61   ;;  %v6790_v15 = vpop.permute.xlu0 %2379  ;;  %v4765_v61 = vld [vmem:[%s7714_s3 + $0x4] ss:$8 sps:$4 sm:$0xff]  }
 0x270   :  { %7906 = vst [vmem:[#allocation75_spill] sm:$0xff] %v6790_v15  ;;  %4520 = vmatprep.mubr.msk.bf16.mxu0 %vm1893_vm1, %v4765_v61  ;;  %v2771_v61 = vld [vmem:[%s7709_s4 + $0x890] sm:$0xff] }
 0x273   :  { %3827 = vperm.xlu1 %4682, %v2828_v58   ;;  %3822 = vperm.xlu0 %4681, %v2827_v13   ;;  %v6792_v47 = vpop.f32.mrb[20].mxu1  ;;  %v2752_v58 = vld [vmem:[%s7709_s4 + $0x7f8] sm:$0xff]  ;;  %v2751_v13 = vld [vmem:[%s7709_s4 + $0x7f0] sm:$0xff]  ;;  %v6808_v15 = vpop.permute.xlu0 %2519 }
 0x274   :  { %7907 = vst [vmem:[#allocation76_spill] sm:$0xff] %v6792_v47  ;;  %v2030_v8 = vpop.f32.mrb[21].mxu1  ;;  %7910 = vst [vmem:[#allocation79_spill] sm:$0xff] %v6808_v15  ;;  %v6810_v47 = vpop.permute.xlu1 %2524 }
 0x275   :  { %v6799_v37 = vpop.f32.mrb[22].mxu1  ;;  %7911 = vst [vmem:[#allocation80_spill] sm:$0xff] %v6810_v47  ;;  %v2772_v8 = vld [vmem:[%s7709_s4 + $0x898] sm:$0xff] }
 0x276   :  { %7909 = vst [vmem:[#allocation78_spill] sm:$0xff] %v6799_v37  ;;  %v2033_v54 = vpop.f32.mrb[23].mxu1 }
 0x277   :  { %3927 = vperm.xlu1 %4682, %v2848_v48   ;;  %3922 = vperm.xlu0 %4681, %v2847_v5   ;;  %v2790_v5 = vld [vmem:[%s7709_s4 + $0x928] sm:$0xff] }
 0x278   :  { %v6827_v15 = vpop.permute.xlu1 %2624 }
 0x279   :  { %7915 = vst [vmem:[#allocation84_spill] sm:$0xff] %v6827_v15 }
 0x27b   :  { %2934 = vperm.xlu1 %4682, %v2752_v58   ;;  %2929 = vperm.xlu0 %4681, %v2751_v13   ;;  %v6818_v54 = vpop.f32.mrb[24].mxu1  ;;  %v6825_v58 = vpop.permute.xlu0 %2619  ;;  %v2789_v13 = vld [vmem:[%s7709_s4 + $0x920] sm:$0xff] }
 0x27c   :  { %7912 = vst [vmem:[#allocation81_spill] sm:$0xff] %v6818_v54  ;;  %v2038_v48 = vpop.f32.mrb[25].mxu1  ;;  %7914 = vst [vmem:[#allocation83_spill] sm:$0xff] %v6825_v58  ;;  %v6844_v15 = vpop.permute.xlu1 %2864 }
 0x27d   :  { %v6820_v51 = vpop.f32.mrb[26].mxu1  ;;  %7919 = vst [vmem:[#allocation88_spill] sm:$0xff] %v6844_v15  ;;  %v2849_v15 = vld [vmem:[%s7709_s4 + $0xb00] sm:$0xff] }
 0x27e   :  { %7913 = vst [vmem:[#allocation82_spill] sm:$0xff] %v6820_v51  ;;  %v2041_v47 = vpop.f32.mrb[27].mxu1  ;;  %v2810_v51 = vld [vmem:[%s7709_s4 + $0x9c8] sm:$0xff] }
 0x27f   :  { %3034 = vperm.xlu1 %4682, %v2772_v8   ;;  %3029 = vperm.xlu0 %4681, %v2771_v61   ;;  %v2809_v47 = vld [vmem:[%s7709_s4 + $0x9c0] sm:$0xff]  ;;  %v6840_v8 = vpop.permute.xlu0 %2859 }
 0x280   :  { %7917 = vst [vmem:[#allocation86_spill] sm:$0xff] %v6840_v8 }
 0x283   :  { %3597 = vperm.xlu1 %4682, %v2790_v5   ;;  %3592 = vperm.xlu0 %4681, %v2789_v13   ;;  %v6832_v48 = vpop.f32.mrb[28].mxu1  ;;  %v2830_v5 = vld [vmem:[%s7709_s4 + $0xa68] sm:$0xff]  ;;  %v6852_v13 = vpop.permute.xlu0 %2959 }
 0x284   :  { %7916 = vst [vmem:[#allocation85_spill] sm:$0xff] %v6832_v48  ;;  %v2046_v54 = vpop.f32.mrb[29].mxu1  ;;  %7920 = vst [vmem:[#allocation89_spill] sm:$0xff] %v6852_v13 }
 0x285   :  { %v6842_v61 = vpop.f32.mrb[30].mxu1  ;;  %v2829_v54 = vld [vmem:[%s7709_s4 + $0xa60] sm:$0xff] }
 0x286   :  { %7918 = vst [vmem:[#allocation87_spill] sm:$0xff] %v6842_v61  ;;  %v2049_v58 = vpop.f32.mrb[31].mxu1 }
 0x287   :  { %3697 = vperm.xlu1 %4682, %v2810_v51   ;;  %3692 = vperm.xlu0 %4681, %v2809_v47   ;;  %v2850_v58 = vld [vmem:[%s7709_s4 + $0xb08] sm:$0xff]  ;;  %v6859_v51 = vpop.permute.xlu1 %2964  ;;  %v6872_v13 = vpop.permute.xlu0 %2869 }
 0x288   :  { %7922 = vst [vmem:[#allocation91_spill] sm:$0xff] %v6859_v51  ;;  %7924 = vst [vmem:[#allocation93_spill] sm:$0xff] %v6872_v13  ;;  %v1989_v13 = vadd.f32 %v6677_v2, %v6014_v1 }
 0x28b   :  { %3837 = vperm.xlu1 %4682, %v2830_v5   ;;  %3832 = vperm.xlu0 %4681, %v2829_v54   ;;  %v6854_v8 = vpop.f32.mrb[32].mxu1  ;;  %v2754_v5 = vld [vmem:[%s7709_s4 + $0x808] sm:$0xff]  ;;  %v2753_v54 = vld [vmem:[%s7709_s4 + $0x800] sm:$0xff] }
 0x28c   :  { %7921 = vst [vmem:[#allocation90_spill] sm:$0xff] %v6854_v8  ;;  %v2054_v47 = vpop.f32.mrb[33].mxu1 }
 0x28d   :  { %v6864_v61 = vpop.f32.mrb[34].mxu1  ;;  %v6874_v47 = vpop.permute.xlu1 %2874 }
 0x28e   :  { %7923 = vst [vmem:[#allocation92_spill] sm:$0xff] %v6864_v61  ;;  %v2057_v48 = vpop.f32.mrb[35].mxu1  ;;  %7925 = vst [vmem:[#allocation94_spill] sm:$0xff] %v6874_v47 }
 0x28f   :  { %3937 = vperm.xlu1 %4682, %v2850_v58   ;;  %3932 = vperm.xlu0 %4681, %v2849_v15   ;;  %v2774_v15 = vld [vmem:[%s7709_s4 + $0x8a8] sm:$0xff]  ;;  %v2773_v58 = vld [vmem:[%s7709_s4 + $0x8a0] sm:$0xff] }
 0x291   :  { %v6895_v47 = vpop.permute.xlu1 %2974 }
 0x292   :  { %7929 = vst [vmem:[#allocation98_spill] sm:$0xff] %v6895_v47 }
 0x293   :  { %2944 = vperm.xlu1 %4682, %v2754_v5   ;;  %2939 = vperm.xlu0 %4681, %v2753_v54   ;;  %v6876_v51 = vpop.f32.mrb[36].mxu1  ;;  %v1992_v5 = vadd.f32 %v6685_v29, %v6011_v52  ;;  %v6890_v54 = vpop.permute.xlu0 %2969  ;;  %v2812_v52 = vld [vmem:[%s7709_s4 + $0x9d8] sm:$0xff] }
 0x294   :  { %7926 = vst [vmem:[#allocation95_spill] sm:$0xff] %v6876_v51  ;;  %v2062_v48 = vpop.f32.mrb[37].mxu1  ;;  %7928 = vst [vmem:[#allocation97_spill] sm:$0xff] %v6890_v54  ;;  %v2147_v51 = vmax.f32 %v1989_v13, 0.0 }
 0x295   :  { %v6884_v61 = vpop.f32.mrb[38].mxu1  ;;  %v2792_v48 = vld [vmem:[%s7709_s4 + $0x938] sm:$0xff]  ;;  %v2148_v1 = vmax.f32 %v1992_v5, 0.0  ;;  %v6912_v5 = vpop.permute.xlu1 %3537 }
 0x296   :  { %7927 = vst [vmem:[#allocation96_spill] sm:$0xff] %v6884_v61  ;;  %v2065_v8 = vpop.f32.mrb[39].mxu1  ;;  %v2791_v61 = vld [vmem:[%s7709_s4 + $0x930] sm:$0xff]  ;;  %v2387_v13 = vmul.f32 %v6069_v62, %v2147_v51  ;;  %v2000_v62 = vadd.f32 %v6707_v10, %v6039_v23 }
 0x297   :  { %3044 = vperm.xlu1 %4682, %v2774_v15   ;;  %3039 = vperm.xlu0 %4681, %v2773_v58   ;;  %v2811_v15 = vld [vmem:[%s7709_s4 + $0x9d0] sm:$0xff]  ;;  %v6907_v58 = vpop.permute.xlu0 %3532 }
 0x298   :  { %v2150_v10 = vmax.f32 %v2000_v62, 0.0 }
 0x29a   :  { %v2390_v62 = vmul.f32 %v6147_v53, %v2150_v10  ;;  %v2013_v10 = vadd.f32 %v6744_v42, %v6204_v6 }
 0x29b   :  { %3607 = vperm.xlu1 %4682, %v2792_v48   ;;  %3602 = vperm.xlu0 %4681, %v2791_v61   ;;  %v2068_v2 = vpop.f32.mrb[40].mxu1  ;;  %v1997_v61 = vadd.f32 %v6697_v34, %v6042_v7  ;;  %v2831_v34 = vld [vmem:[%s7709_s4 + $0xa70] sm:$0xff] }
 0x29c   :  { %v2069_v29 = vadd.f32 %v2068_v2, %v6030_v4  ;;  %v2070_v8 = vpop.f32.mrb[41].mxu1  ;;  %v2388_v4 = vmul.f32 %v6066_v18, %v2148_v1  ;;  %v2832_v2 = vld [vmem:[%s7709_s4 + $0xa78] sm:$0xff] }
 0x29d   :  { %v2071_v47 = vpop.f32.mrb[42].mxu1  ;;  %v2005_v8 = vadd.f32 %v6719_v17, %v6123_v57 }
 0x29e   :  { %v2167_v48 = vmax.f32 %v2069_v29, 0.0  ;;  %v2072_v54 = vadd.f32 %v2071_v47, %v6025_v45  ;;  %v2073_v37 = vpop.f32.mrb[43].mxu1  ;;  %v2627_v45 = vadd.f32 %v6096_v25, %v2387_v13  ;;  %v2628_v1 = vadd.f32 %v6093_v24, %v2388_v4  ;;  %v2851_v24 = vld [vmem:[%s7709_s4 + $0xb10] sm:$0xff] }
 0x29f   :  { %3707 = vperm.xlu1 %4682, %v2812_v52   ;;  %3702 = vperm.xlu0 %4681, %v2811_v15   ;;  %v2149_v37 = vmax.f32 %v1997_v61, 0.0  ;;  %v6929_v52 = vpop.permute.xlu0 %3632 }
 0x2a0   :  { %v2407_v51 = vmul.f32 %v6085_v26, %v2167_v48  ;;  %v2168_v7 = vmax.f32 %v2072_v54, 0.0  ;;  %v2852_v26 = vld [vmem:[%s7709_s4 + $0xb18] sm:$0xff]  ;;  %v6934_v54 = vpop.permute.xlu1 %3637 }
 0x2a1   :  { %v2389_v13 = vmul.f32 %v6150_v39, %v2149_v37  ;;  %v2776_v37 = vld [vmem:[%s7709_s4 + $0x8b8] sm:$0xff] }
 0x2a2   :  { %v2647_v18 = vadd.f32 %v6112_v40, %v2407_v51  ;;  %v2408_v47 = vmul.f32 %v6080_v21, %v2168_v7  ;;  %v2151_v51 = vmax.f32 %v2005_v8, 0.0 }
 0x2a3   :  { %3847 = vperm.xlu1 %4682, %v2832_v2   ;;  %3842 = vperm.xlu0 %4681, %v2831_v34   ;;  %v2076_v23 = vpop.f32.mrb[44].mxu1  ;;  %v6955_v7 = vpop.permute.xlu0 %3772 }
 0x2a4   :  { %v2667_v25 = vmax.f32 %v2627_v45, %v2647_v18  ;;  %v2648_v29 = vadd.f32 %v6107_v35, %v2408_v47  ;;  %v2077_v40 = vadd.f32 %v2076_v23, %v6058_v30  ;;  %v2078_v21 = vpop.f32.mrb[45].mxu1  ;;  %v2008_v30 = vadd.f32 %v6729_v28, %v6120_v0  ;;  %v2756_v35 = vld [vmem:[%s7709_s4 + $0x818] sm:$0xff]  ;;  %v6958_v28 = vpop.permute.xlu1 %3777 }
 0x2a5   :  { %v2079_v15 = vpop.f32.mrb[46].mxu1  ;;  %v2629_v0 = vadd.f32 %v6177_v43, %v2389_v13  ;;  %v2630_v18 = vadd.f32 %v6174_v46, %v2390_v62  ;;  %v2391_v23 = vmul.f32 %v6231_v9, %v2151_v51  ;;  %v2794_v21 = vld [vmem:[%s7709_s4 + $0x948] sm:$0xff]  ;;  %v2016_v9 = vadd.f32 %v6752_v3, %v6201_v60 }
 0x2a6   :  { %v2668_v61 = vmax.f32 %v2628_v1, %v2648_v29  ;;  %v2169_v48 = vmax.f32 %v2077_v40, 0.0  ;;  %v2080_v4 = vadd.f32 %v2079_v15, %v6053_v33  ;;  %v2081_v2 = vpop.f32.mrb[47].mxu1  ;;  %v2755_v33 = vld [vmem:[%s7709_s4 + $0x810] sm:$0xff]  ;;  %v2152_v53 = vmax.f32 %v2008_v30, 0.0 }
 0x2a7   :  { %3947 = vperm.xlu1 %4682, %v2852_v26   ;;  %3942 = vperm.xlu0 %4681, %v2851_v24   ;;  %v2631_v8 = vadd.f32 %v6258_v14, %v2391_v23  ;;  %v2153_v15 = vmax.f32 %v2013_v10, 0.0  ;;  %v7936_v10 = vld [vmem:[#allocation6_spill] sm:$0xff] }
 0x2a8   :  { %v2409_v57 = vmul.f32 %v6166_v38, %v2169_v48  ;;  %v2170_v17 = vmax.f32 %v2080_v4, 0.0  ;;  %v2727_v39 = vpack.c.bf16 %v2668_v61, %v2667_v25  ;;  %v6984_v24 = vpop.permute.xlu1 %3877  ;;  %v2154_v48 = vmax.f32 %v2016_v9, 0.0 }
 0x2a9   :  { %v2393_v62 = vmul.f32 %v6312_v56, %v2153_v15  ;;  %v7940_v15 = vld [vmem:[#allocation8_spill] sm:$0xff] }
 0x2aa   :  { %v2649_v34 = vadd.f32 %v6193_v63, %v2409_v57  ;;  %v2410_v45 = vmul.f32 %v6161_v19, %v2170_v17  ;;  %3298 = vmatpush1.bf16.msra.mxu0 %v2727_v39  ;;  %v2775_v19 = vld [vmem:[%s7709_s4 + $0x8b0] sm:$0xff] }
 0x2ab   :  { %2954 = vperm.xlu1 %4682, %v2756_v35   ;;  %2949 = vperm.xlu0 %4681, %v2755_v33   ;;  %v2084_v38 = vpop.f32.mrb[48].mxu1  ;;  %v7930_v33 = vld [vmem:[#allocation73_spill] sm:$0xff] }
 0x2ac   :  { %3299 = vmatprep.subr.bf16.mxu0 %v7793_v49  ;;  %v2669_v43 = vmax.f32 %v2629_v0, %v2649_v34  ;;  %v2650_v47 = vadd.f32 %v6188_v32, %v2410_v45  ;;  %v2085_v63 = vadd.f32 %v2084_v38, %v6139_v16  ;;  %v2086_v1 = vpop.f32.mrb[49].mxu1  ;;  %v2392_v32 = vmul.f32 %v6228_v55, %v2152_v53  ;;  %v6977_v16 = vpop.permute.xlu0 %3872  ;;  %v2793_v55 = vld [vmem:[%s7709_s4 + $0x940] sm:$0xff]  ;;  %v7932_v34 = vld [vmem:[#allocation13_spill] sm:$0xff] }
 0x2ad   :  { %v2087_v26 = vpop.f32.mrb[50].mxu1  ;;  %v7008_v57 = vpop.permute.xlu1 %2884  ;;  %v2024_v51 = vadd.f32 %v7930_v33, %v6282_v22 }
 0x2ae   :  { %v2670_v25 = vmax.f32 %v2630_v18, %v2650_v47  ;;  %v2171_v29 = vmax.f32 %v2085_v63, 0.0  ;;  %v2088_v46 = vadd.f32 %v2087_v26, %v6134_v59  ;;  %v2089_v40 = vpop.f32.mrb[51].mxu1  ;;  %v2632_v60 = vadd.f32 %v6255_v31, %v2392_v32  ;;  %v7935_v47 = vld [vmem:[#allocation5_spill] sm:$0xff]  ;;  %v2854_v26 = vld [vmem:[%s7709_s4 + $0xb28] sm:$0xff] }
 0x2af   :  { %3054 = vperm.xlu1 %4682, %v2776_v37   ;;  %3049 = vperm.xlu0 %4681, %v2775_v19   ;;  %v2021_v31 = vadd.f32 %v6764_v44, %v6285_v12  ;;  %v2834_v12 = vld [vmem:[%s7709_s4 + $0xa88] sm:$0xff]  ;;  %v2156_v1 = vmax.f32 %v2024_v51, 0.0 }
 0x2b0   :  { %v2411_v6 = vmul.f32 %v6247_v50, %v2171_v29  ;;  %v2172_v42 = vmax.f32 %v2088_v46, 0.0  ;;  %v2728_v59 = vpack.c.bf16 %v2670_v25, %v2669_v43  ;;  %v2814_v50 = vld [vmem:[%s7709_s4 + $0x9e8] sm:$0xff]  ;;  %v7005_v30 = vpop.permute.xlu0 %2879  ;;  %v7934_v43 = vld [vmem:[#allocation34_spill] sm:$0xff] }
 0x2b1   :  { %v7931_v44 = vld [vmem:[#allocation12_spill] sm:$0xff]  ;;  %v2155_v38 = vmax.f32 %v2021_v31, 0.0  ;;  %v7933_v37 = vld [vmem:[#allocation15_spill] sm:$0xff]  ;;  %v7031_v29 = vpop.permute.xlu1 %2984  ;;  %v7945_v31 = vld [vmem:[#allocation78_spill] sm:$0xff] }
 0x2b2   :  { %v2651_v13 = vadd.f32 %v6274_v20, %v2411_v6  ;;  %v2412_v61 = vmul.f32 %v6242_v27, %v2172_v42  ;;  %3300 = vmatpush1.bf16.msra.mxu0 %v2728_v59  ;;  %v2813_v27 = vld [vmem:[%s7709_s4 + $0x9e0] sm:$0xff]  ;;  %v2394_v0 = vmul.f32 %v7931_v44, %v2154_v48  ;;  %v2633_v18 = vadd.f32 %v7933_v37, %v2393_v62  ;;  %v7939_v59 = vld [vmem:[#allocation17_spill] sm:$0xff] }
 0x2b3   :  { %3617 = vperm.xlu1 %4682, %v2794_v21   ;;  %3612 = vperm.xlu0 %4681, %v2793_v55   ;;  %v2092_v3 = vpop.f32.mrb[52].mxu1  ;;  %v7937_v40 = vld [vmem:[#allocation11_spill] sm:$0xff]  ;;  %v2395_v55 = vmul.f32 %v7939_v59, %v2155_v38  ;;  %v7956_v59 = vld [vmem:[#allocation4_spill] sm:$0xff] }
 0x2b4   :  { %3301 = vmatprep.subr.bf16.mxu0 %v7793_v49  ;;  %v2671_v4 = vmax.f32 %v2631_v8, %v2651_v13  ;;  %v2652_v14 = vadd.f32 %v6269_v11, %v2412_v61  ;;  %v2093_v20 = vadd.f32 %v2092_v3, %v6220_v41  ;;  %v2094_v2 = vpop.f32.mrb[53].mxu1  ;;  %v7024_v19 = vpop.permute.xlu0 %2979  ;;  %v2634_v25 = vadd.f32 %v7936_v10, %v2394_v0  ;;  %v7938_v21 = vld [vmem:[#allocation19_spill] sm:$0xff]  ;;  %v7941_v13 = vld [vmem:[#allocation76_spill] sm:$0xff] }
 0x2b5   :  { %v2095_v35 = vpop.f32.mrb[54].mxu1  ;;  %v2853_v42 = vld [vmem:[%s7709_s4 + $0xb20] sm:$0xff]  ;;  %v2029_v61 = vadd.f32 %v7941_v13, %v7940_v15  ;;  %v2796_v2 = vld [vmem:[%s7709_s4 + $0x958] sm:$0xff]  ;;  %v7055_v0 = vpop.permute.xlu1 %3547  ;;  %v2815_v10 = vld [vmem:[%s7709_s4 + $0x9f0] sm:$0xff] }
 0x2b6   :  { %v2672_v17 = vmax.f32 %v2632_v60, %v2652_v14  ;;  %v2173_v39 = vmax.f32 %v2093_v20, 0.0  ;;  %v2096_v11 = vadd.f32 %v2095_v35, %v6215_v36  ;;  %v2097_v41 = vpop.f32.mrb[55].mxu1  ;;  %v2833_v36 = vld [vmem:[%s7709_s4 + $0xa80] sm:$0xff] }
 0x2b7   :  { %3717 = vperm.xlu1 %4682, %v2814_v50   ;;  %3712 = vperm.xlu0 %4681, %v2813_v27   ;;  %v7942_v50 = vld [vmem:[#allocation3_spill] sm:$0xff]  ;;  %v7943_v14 = vld [vmem:[#allocation14_spill] sm:$0xff]  ;;  %v2795_v41 = vld [vmem:[%s7709_s4 + $0x950] sm:$0xff]  ;;  %v2157_v44 = vmax.f32 %v2029_v61, 0.0 }
 0x2b8   :  { %v2413_v56 = vmul.f32 %v7932_v34, %v2173_v39  ;;  %v2174_v45 = vmax.f32 %v2096_v11, 0.0  ;;  %v2729_v53 = vpack.c.bf16 %v2672_v17, %v2671_v4  ;;  %v2396_v20 = vmul.f32 %v7943_v14, %v2156_v1  ;;  %v7944_v27 = vld [vmem:[#allocation30_spill] sm:$0xff]  ;;  %v7946_v62 = vld [vmem:[#allocation7_spill] sm:$0xff]  ;;  %v7052_v33 = vpop.permute.xlu0 %3542  ;;  %v7948_v34 = vld [vmem:[#allocation16_spill] sm:$0xff] }
 0x2b9   :  { %v2032_v35 = vadd.f32 %v7945_v31, %v7944_v27  ;;  %v7947_v51 = vld [vmem:[#allocation27_spill] sm:$0xff]  ;;  %v7957_v15 = vld [vmem:[#allocation26_spill] sm:$0xff]  ;;  %v7960_v14 = vld [vmem:[#allocation53_spill] sm:$0xff] }
 0x2ba   :  { %v2653_v22 = vadd.f32 %v7934_v43, %v2413_v56  ;;  %v2414_v63 = vmul.f32 %v7935_v47, %v2174_v45  ;;  %3302 = vmatpush1.bf16.msra.mxu0 %v2729_v53  ;;  %v7949_v45 = vld [vmem:[#allocation18_spill] sm:$0xff]  ;;  %v7952_v1 = vld [vmem:[#allocation23_spill] sm:$0xff]  ;;  %v2835_v31 = vld [vmem:[%s7709_s4 + $0xa90] sm:$0xff] }
 0x2bb   :  { %3857 = vperm.xlu1 %4682, %v2834_v12   ;;  %3852 = vperm.xlu0 %4681, %v2833_v36   ;;  %v2100_v23 = vpop.f32.mrb[56].mxu1  ;;  %v2635_v12 = vadd.f32 %v7947_v51, %v2395_v55  ;;  %v7950_v36 = vld [vmem:[#allocation10_spill] sm:$0xff]  ;;  %v2158_v43 = vmax.f32 %v2032_v35, 0.0 }
 0x2bc   :  { %3303 = vmatprep.subr.bf16.mxu0 %v7793_v49  ;;  %v2673_v46 = vmax.f32 %v2633_v18, %v2653_v22  ;;  %v2654_v32 = vadd.f32 %v7937_v40, %v2414_v63  ;;  %v2101_v9 = vadd.f32 %v2100_v23, %v7938_v21  ;;  %v2102_v6 = vpop.f32.mrb[57].mxu1  ;;  %v2636_v38 = vadd.f32 %v7950_v36, %v2396_v20  ;;  %v2816_v18 = vld [vmem:[%s7709_s4 + $0x9f8] sm:$0xff]  ;;  %v7955_v21 = vld [vmem:[#allocation32_spill] sm:$0xff] }
 0x2bd   :  { %v2103_v8 = vpop.f32.mrb[58].mxu1  ;;  %v7951_v47 = vld [vmem:[#allocation50_spill] sm:$0xff]  ;;  %v7965_v36 = vld [vmem:[#allocation36_spill] sm:$0xff] }
 0x2be   :  { %v2674_v60 = vmax.f32 %v2634_v25, %v2654_v32  ;;  %v2175_v3 = vmax.f32 %v2101_v9, 0.0  ;;  %v2104_v48 = vadd.f32 %v2103_v8, %v7942_v50  ;;  %v2105_v4 = vpop.f32.mrb[59].mxu1  ;;  %v7953_v25 = vld [vmem:[#allocation54_spill] sm:$0xff]  ;;  %v2397_v9 = vmul.f32 %v7955_v21, %v2157_v44  ;;  %v7959_v50 = vld [vmem:[#allocation49_spill] sm:$0xff] }
 0x2bf   :  { %3957 = vperm.xlu1 %4682, %v2854_v26   ;;  %3952 = vperm.xlu0 %4681, %v2853_v42   ;;  %v7958_v13 = vld [vmem:[#allocation82_spill] sm:$0xff]  ;;  %v7081_v4 = vpop.permute.xlu1 %3647  ;;  %v7970_v21 = vld [vmem:[#allocation9_spill] sm:$0xff] }
 0x2c0   :  { %v2415_v17 = vmul.f32 %v7946_v62, %v2175_v3  ;;  %v2176_v39 = vmax.f32 %v2104_v48, 0.0  ;;  %v2730_v11 = vpack.c.bf16 %v2674_v60, %v2673_v46  ;;  %v7954_v46 = vld [vmem:[#allocation81_spill] sm:$0xff]  ;;  %v2040_v61 = vadd.f32 %v7958_v13, %v7957_v15  ;;  %v7075_v60 = vpop.permute.xlu0 %3642  ;;  %v7973_v15 = vld [vmem:[#allocation87_spill] sm:$0xff] }
 0x2c1   :  { %v2037_v40 = vadd.f32 %v7954_v46, %v7953_v25  ;;  %v2836_v3 = vld [vmem:[%s7709_s4 + $0xa98] sm:$0xff]  ;;  %v2398_v48 = vmul.f32 %v7959_v50, %v2158_v43 }
 0x2c2   :  { %v2655_v56 = vadd.f32 %v7948_v34, %v2415_v17  ;;  %v2416_v53 = vmul.f32 %v7949_v45, %v2176_v39  ;;  %3304 = vmatpush1.bf16.msra.mxu0 %v2730_v11  ;;  %v7961_v62 = vld [vmem:[#allocation33_spill] sm:$0xff]  ;;  %v7962_v39 = vld [vmem:[#allocation31_spill] sm:$0xff] }
 0x2c3   :  { %3627 = vperm.xlu1 %4682, %v2796_v2   ;;  %3622 = vperm.xlu0 %4681, %v2795_v41   ;;  %v2108_v37 = vpop.f32.mrb[60].mxu1  ;;  %v2159_v35 = vmax.f32 %v2037_v40, 0.0  ;;  %v2637_v17 = vadd.f32 %v7961_v62, %v2397_v9  ;;  %v7963_v41 = vld [vmem:[#allocation37_spill] sm:$0xff]  ;;  %v7105_v46 = vpop.permute.xlu1 %3787 }
 0x2c4   :  { %3305 = vmatprep.subr.bf16.mxu0 %v7793_v49  ;;  %v2675_v22 = vmax.f32 %v2635_v12, %v2655_v56  ;;  %v2656_v63 = vadd.f32 %v7951_v47, %v2416_v53  ;;  %v2109_v23 = vadd.f32 %v2108_v37, %v7952_v1  ;;  %v2110_v26 = vpop.f32.mrb[61].mxu1  ;;  %v2160_v12 = vmax.f32 %v2040_v61, 0.0  ;;  %v2856_v34 = vld [vmem:[%s7709_s4 + $0xb38] sm:$0xff]  ;;  %v7967_v47 = vld [vmem:[#allocation24_spill] sm:$0xff]  ;;  %v7101_v1 = vpop.permute.xlu0 %3782 }
 0x2c5   :  { %v2111_v32 = vpop.f32.mrb[62].mxu1  ;;  %v7964_v56 = vld [vmem:[#allocation21_spill] sm:$0xff]  ;;  %v7966_v37 = vld [vmem:[#allocation38_spill] sm:$0xff] }
 0x2c6   :  { %v2676_v6 = vmax.f32 %v2636_v38, %v2656_v63  ;;  %v2177_v42 = vmax.f32 %v2109_v23, 0.0  ;;  %v2112_v55 = vadd.f32 %v2111_v32, %v7956_v59  ;;  %v2113_v8 = vpop.f32.mrb[63].mxu1  ;;  %v2638_v45 = vadd.f32 %v7964_v56, %v2398_v48  ;;  %v7968_v26 = vld [vmem:[#allocation25_spill] sm:$0xff]  ;;  %v7974_v61 = vld [vmem:[#allocation42_spill] sm:$0xff] }
 0x2c7   :  { %3727 = vperm.xlu1 %4682, %v2816_v18   ;;  %3722 = vperm.xlu0 %4681, %v2815_v10   ;;  %v2399_v63 = vmul.f32 %v7967_v47, %v2159_v35  ;;  %v7969_v10 = vld [vmem:[#allocation85_spill] sm:$0xff]  ;;  %v7972_v8 = vld [vmem:[#allocation22_spill] sm:$0xff] }
 0x2c8   :  { %v2417_v20 = vmul.f32 %v7960_v14, %v2177_v42  ;;  %v2178_v2 = vmax.f32 %v2112_v55, 0.0  ;;  %v2731_v27 = vpack.c.bf16 %v2676_v6, %v2675_v22  ;;  %v2855_v22 = vld [vmem:[%s7709_s4 + $0xb30] sm:$0xff]  ;;  %v2045_v25 = vadd.f32 %v7969_v10, %v7968_v26  ;;  %v4049_v55 = vld [vmem:[%s7715_s6 + $0x8] sm:$0xff]  ;;  %v4048_v14 = vld [vmem:[%s7715_s6] sm:$0xff] }
 0x2c9   :  { %v7971_v42 = vld [vmem:[#allocation40_spill] sm:$0xff]  ;;  %v2048_v13 = vadd.f32 %v7973_v15, %v7972_v8  ;;  %v7977_v62 = vld [vmem:[#allocation29_spill] sm:$0xff]  ;;  %v7988_v15 = vld [vmem:[#allocation47_spill] sm:$0xff] }
 0x2ca   :  { %v2657_v11 = vadd.f32 %v7962_v39, %v2417_v20  ;;  %v2418_v51 = vmul.f32 %v7963_v41, %v2178_v2  ;;  %3306 = vmatpush1.bf16.msra.mxu0 %v2731_v27  ;;  %v2400_v59 = vmul.f32 %v7971_v42, %v2160_v12  ;;  %v7975_v20 = vld [vmem:[#allocation41_spill] sm:$0xff]  ;;  %v2161_v27 = vmax.f32 %v2045_v25, 0.0  ;;  %v7978_v39 = vld [vmem:[#allocation39_spill] sm:$0xff]  ;;  %v7122_v41 = vpop.permute.xlu0 %3882 }
 0x2cb   :  { %3867 = vperm.xlu1 %4682, %v2836_v3   ;;  %3862 = vperm.xlu0 %4681, %v2835_v31   ;;  %v2116_v44 = vpop.f32.mrb[64].mxu1  ;;  %v2639_v2 = vadd.f32 %v7975_v20, %v2399_v63  ;;  %v7976_v31 = vld [vmem:[#allocation28_spill] sm:$0xff]  ;;  %v4051_v12 = vld [vmem:[%s7715_s6 + $0x18] sm:$0xff]  ;;  %v7989_v20 = vld [vmem:[#allocation55_spill] sm:$0xff] }
 0x2cc   :  { %3307 = vmatprep.subr.bf16.mxu0 %v7793_v49  ;;  %v2677_v53 = vmax.f32 %v2637_v17, %v2657_v11  ;;  %v2658_v38 = vadd.f32 %v7965_v36, %v2418_v51  ;;  %v2117_v18 = vadd.f32 %v2116_v44, %v7966_v37  ;;  %v2118_v43 = vpop.f32.mrb[65].mxu1  ;;  %v2640_v11 = vadd.f32 %v7978_v39, %v2400_v59  ;;  %v7980_v36 = vld [vmem:[#allocation35_spill] sm:$0xff] }
 0x2cd   :  { %v2119_v23 = vpop.f32.mrb[66].mxu1  ;;  %v2162_v44 = vmax.f32 %v2048_v13, 0.0  ;;  %v7981_v43 = vld [vmem:[#allocation44_spill] sm:$0xff] }
 0x2ce   :  { %v2678_v40 = vmax.f32 %v2638_v45, %v2658_v38  ;;  %v2179_v32 = vmax.f32 %v2117_v18, 0.0  ;;  %v2120_v9 = vadd.f32 %v2119_v23, %v7970_v21  ;;  %v2121_v6 = vpop.f32.mrb[67].mxu1  ;;  %v7979_v45 = vld [vmem:[#allocation52_spill] sm:$0xff]  ;;  %v7983_v23 = vld [vmem:[#allocation51_spill] sm:$0xff] }
 0x2cf   :  { %3967 = vperm.xlu1 %4682, %v2856_v34   ;;  %3962 = vperm.xlu0 %4681, %v2855_v22   ;;  %v7128_v34 = vpop.permute.xlu1 %3887  ;;  %v4050_v18 = vld [vmem:[%s7715_s6 + $0x10] sm:$0xff]  ;;  %v7982_v22 = vld [vmem:[#allocation90_spill] sm:$0xff]  ;;  %v2401_v26 = vmul.f32 %v7983_v23, %v2161_v27  ;;  %v4053_v59 = vld [vmem:[%s7715_s6 + $0x28] sm:$0xff] }
 0x2d0   :  { %v2419_v3 = vmul.f32 %v7974_v61, %v2179_v32  ;;  %v2180_v50 = vmax.f32 %v2120_v9, 0.0  ;;  %v2732_v48 = vpack.c.bf16 %v2678_v40, %v2677_v53  ;;  %v2053_v47 = vadd.f32 %v7982_v22, %v7981_v43  ;;  %v7984_v40 = vld [vmem:[#allocation20_spill] sm:$0xff]  ;;  %v7985_v9 = vld [vmem:[#allocation46_spill] sm:$0xff]  ;;  %v7997_v23 = vld [vmem:[#allocation95_spill] sm:$0xff] }
 0x2d1   :  { %v7986_v6 = vld [vmem:[#allocation92_spill] sm:$0xff] }
 0x2d2   :  { %v2659_v35 = vadd.f32 %v7976_v31, %v2419_v3  ;;  %v2420_v17 = vmul.f32 %v7977_v62, %v2180_v50  ;;  %3308 = vmatpush1.bf16.msra.mxu0 %v2732_v48  ;;  %v2056_v42 = vadd.f32 %v7986_v6, %v7985_v9  ;;  %v4052_v50 = vld [vmem:[%s7715_s6 + $0x20] sm:$0xff]  ;;  %v2163_v48 = vmax.f32 %v2053_v47, 0.0  ;;  %v7991_v62 = vld [vmem:[#allocation56_spill] sm:$0xff]  ;;  %v7999_v9 = vld [vmem:[#allocation65_spill] sm:$0xff] }
 0x2d3   :  { %4063 = vperm.xlu1 %4682, %v4049_v55   ;;  %4058 = vperm.xlu0 %4681, %v4048_v14   ;;  %v2124_v51 = vpop.f32.mrb[68].mxu1  ;;  %v7987_v55 = vld [vmem:[#allocation45_spill] sm:$0xff]  ;;  %v7149_v14 = vpop.permute.xlu0 %2889  ;;  %v7990_v31 = vld [vmem:[#allocation58_spill] sm:$0xff]  ;;  %v7995_v43 = vld [vmem:[#allocation64_spill] sm:$0xff] }
 0x2d4   :  { %3309 = vmatprep.subr.bf16.mxu0 %v7793_v49  ;;  %v2679_v56 = vmax.f32 %v2639_v2, %v2659_v35  ;;  %v2660_v53 = vadd.f32 %v7979_v45, %v2420_v17  ;;  %v2125_v38 = vadd.f32 %v2124_v51, %v7980_v36  ;;  %v2126_v37 = vpop.f32.mrb[69].mxu1  ;;  %v2402_v8 = vmul.f32 %v7987_v55, %v2162_v44  ;;  %v7152_v27 = vpop.permute.xlu1 %2894  ;;  %v4055_v51 = vld [vmem:[%s7715_s6 + $0x38] sm:$0xff]  ;;  %v7993_v45 = vld [vmem:[#allocation59_spill] sm:$0xff]  ;;  %v7994_v36 = vld [vmem:[#allocation48_spill] sm:$0xff] }
 0x2d5   :  { %v2127_v63 = vpop.f32.mrb[70].mxu1  ;;  %v2641_v2 = vadd.f32 %v7989_v20, %v2401_v26  ;;  %v2164_v39 = vmax.f32 %v2056_v42, 0.0  ;;  %v2403_v22 = vmul.f32 %v7995_v43, %v2163_v48  ;;  %v8000_v55 = vld [vmem:[#allocation61_spill] sm:$0xff]  ;;  %v4225_v20 = vld [vmem:[%s7716_s8] sm:$0xff] }
 0x2d6   :  { %v2680_v10 = vmax.f32 %v2640_v11, %v2660_v53  ;;  %v2181_v25 = vmax.f32 %v2125_v38, 0.0  ;;  %v2128_v32 = vadd.f32 %v2127_v63, %v7984_v40  ;;  %v2129_v21 = vpop.f32.mrb[71].mxu1  ;;  %v7996_v63 = vld [vmem:[#allocation60_spill] sm:$0xff]  ;;  %v7998_v40 = vld [vmem:[#allocation43_spill] sm:$0xff] }
 0x2d7   :  { %4073 = vperm.xlu1 %4682, %v4051_v12   ;;  %4068 = vperm.xlu0 %4681, %v4050_v18   ;;  %v7992_v12 = vld [vmem:[#allocation57_spill] sm:$0xff]  ;;  %v2061_v26 = vadd.f32 %v7997_v23, %v7996_v63  ;;  %v2404_v6 = vmul.f32 %v7999_v9, %v2164_v39  ;;  %v7171_v42 = vpop.permute.xlu0 %2989  ;;  %v8005_v39 = vld [vmem:[#allocation67_spill] sm:$0xff]  ;;  %v8009_v23 = vld [vmem:[#allocation72_spill] sm:$0xff] }
 0x2d8   :  { %v2421_v13 = vmul.f32 %v7988_v15, %v2181_v25  ;;  %v2182_v61 = vmax.f32 %v2128_v32, 0.0  ;;  %v2733_v3 = vpack.c.bf16 %v2680_v10, %v2679_v56  ;;  %v2642_v44 = vadd.f32 %v7992_v12, %v2402_v8  ;;  %v4054_v18 = vld [vmem:[%s7715_s6 + $0x30] sm:$0xff] }
 0x2d9   :  { %v8001_v8 = vld [vmem:[#allocation96_spill] sm:$0xff] }
 0x2da   :  { %v2661_v35 = vadd.f32 %v7990_v31, %v2421_v13  ;;  %v2422_v17 = vmul.f32 %v7991_v62, %v2182_v61  ;;  %3310 = vmatpush1.bf16.msra.mxu0 %v2733_v3  ;;  %v2064_v15 = vadd.f32 %v8001_v8, %v8000_v55  ;;  %v7178_v13 = vpop.permute.xlu1 %2994  ;;  %v8002_v61 = vld [vmem:[#allocation66_spill] sm:$0xff]  ;;  %v8012_v55 = vld [vmem:[#allocation75_spill] sm:$0xff] }
 0x2db   :  { %4083 = vperm.xlu1 %4682, %v4053_v59   ;;  %4078 = vperm.xlu0 %4681, %v4052_v50   ;;  %v2132_v11 = vpop.f32.mrb[72].mxu1  ;;  %v4226_v59 = vld [vmem:[%s7716_s8 + $0x8] sm:$0xff]  ;;  %v8004_v62 = vld [vmem:[#allocation70_spill] sm:$0xff] }
 0x2dc   :  { %3311 = vmatprep.subr.bf16.mxu0 %v7793_v49  ;;  %v2681_v56 = vmax.f32 %v2641_v2, %v2661_v35  ;;  %v2662_v53 = vadd.f32 %v7993_v45, %v2422_v17  ;;  %v2133_v38 = vadd.f32 %v2132_v11, %v7994_v36  ;;  %v2134_v37 = vpop.f32.mrb[73].mxu1  ;;  %v8003_v2 = vld [vmem:[#allocation68_spill] sm:$0xff]  ;;  %v2165_v35 = vmax.f32 %v2061_v26, 0.0  ;;  %v8007_v36 = vld [vmem:[#allocation71_spill] sm:$0xff] }
 0x2dd   :  { %v2135_v47 = vpop.f32.mrb[74].mxu1  ;;  %v2643_v31 = vadd.f32 %v8003_v2, %v2403_v22  ;;  %v2166_v45 = vmax.f32 %v2064_v15, 0.0  ;;  %v8008_v37 = vld [vmem:[#allocation62_spill] sm:$0xff]  ;;  %v4227_v22 = vld [vmem:[%s7716_s8 + $0x10] sm:$0xff] }
 0x2de   :  { %v2682_v10 = vmax.f32 %v2642_v44, %v2662_v53  ;;  %v2183_v25 = vmax.f32 %v2133_v38, 0.0  ;;  %v2136_v32 = vadd.f32 %v2135_v47, %v7998_v40  ;;  %v2137_v21 = vpop.f32.mrb[75].mxu1  ;;  %v7197_v47 = vpop.permute.xlu0 %3552  ;;  %v2405_v26 = vmul.f32 %v8009_v23, %v2165_v35  ;;  %v4778_v23 = vld [vmem:[%s7714_s3 + $0x54] ss:$8 sps:$4 sm:$0xff]  }
 0x2df   :  { %4093 = vperm.xlu1 %4682, %v4055_v51   ;;  %4088 = vperm.xlu0 %4681, %v4054_v18   ;;  %v8006_v51 = vld [vmem:[#allocation69_spill] sm:$0xff] }
 0x2e0   :  { %v2423_v3 = vmul.f32 %v8002_v61, %v2183_v25  ;;  %v2184_v50 = vmax.f32 %v2136_v32, 0.0  ;;  %v2734_v48 = vpack.c.bf16 %v2682_v10, %v2681_v56  ;;  %v2644_v12 = vadd.f32 %v8006_v51, %v2404_v6  ;;  %v4228_v56 = vld [vmem:[%s7716_s8 + $0x18] sm:$0xff]  ;;  %v7200_v10 = vpop.permute.xlu1 %3557  ;;  %v8010_v32 = vld [vmem:[#allocation63_spill] sm:$0xff]  ;;  %v8017_v51 = vld [vmem:[#allocation84_spill] sm:$0xff] }
 0x2e1   :  { %v8011_v6 = vld [vmem:[#allocation74_spill] sm:$0xff] }
 0x2e2   :  { %v2663_v17 = vadd.f32 %v8004_v62, %v2423_v3  ;;  %v2424_v11 = vmul.f32 %v8005_v39, %v2184_v50  ;;  %3312 = vmatpush1.bf16.msra.mxu0 %v2734_v48  ;;  %v4322_v3 = vld [vmem:[#allocation2] sm:$0x1]  ;;  %v8013_v50 = vld [vmem:[#allocation79_spill] sm:$0xff]  ;;  %v7208_v62 = vpop.permute.xlu0 %3652 }
 0x2e3   :  { %4236 = vperm.xlu1 %4682, %v4226_v59   ;;  %4231 = vperm.xlu0 %4681, %v4225_v20   ;;  %v2140_v44 = vpop.f32.mrb[76].mxu1  ;;  %v2406_v59 = vmul.f32 %v8011_v6, %v2166_v45  ;;  %v2645_v48 = vadd.f32 %v8013_v50, %v2405_v26  ;;  %v8014_v20 = vld [vmem:[#allocation83_spill] sm:$0xff]  ;;  %v4780_v26 = vld [vmem:[%s7714_s3 + $0x50] ss:$8 sps:$4 sm:$0xff]  }
 0x2e4   :  { %3313 = vmatprep.subr.bf16.mxu0 %v7793_v49  ;;  %v2683_v53 = vmax.f32 %v2643_v31, %v2663_v17  ;;  %v2664_v38 = vadd.f32 %v8007_v36, %v2424_v11  ;;  %v2141_v18 = vadd.f32 %v2140_v44, %v8008_v37  ;;  %v2142_v43 = vpop.f32.mrb[77].mxu1  ;;  %v8015_v31 = vld [vmem:[#allocation77_spill] sm:$0xff]  ;;  %v8016_v17 = vld [vmem:[#allocation80_spill] sm:$0xff] }
 0x2e5   :  { %v2143_v63 = vpop.f32.mrb[78].mxu1  ;;  %v2646_v39 = vadd.f32 %v8016_v17, %v2406_v59  ;;  %v4763_v45 = vld [vmem:[%s7714_s3] ss:$8 sps:$4 sm:$0xff]   ;;  %v4768_v36 = vld [vmem:[%s7714_s3 + $0x10] ss:$8 sps:$4 sm:$0xff]  }
 0x2e6   :  { %v2684_v25 = vmax.f32 %v2644_v12, %v2664_v38  ;;  %v2185_v40 = vmax.f32 %v2141_v18, 0.0  ;;  %v2144_v21 = vadd.f32 %v2143_v63, %v8010_v32  ;;  %v2145_v9 = vpop.f32.mrb[79].mxu1  ;;  %v4769_v38 = vld [vmem:[%s7714_s3 + $0x24] ss:$8 sps:$4 sm:$0xff]   ;;  %v4771_v37 = vld [vmem:[%s7714_s3 + $0x20] ss:$8 sps:$4 sm:$0xff]  }
 0x2e7   :  { %4246 = vperm.xlu1 %4682, %v4228_v56   ;;  %4241 = vperm.xlu0 %4681, %v4227_v22   ;;  %v4772_v18 = vld [vmem:[%s7714_s3 + $0x34] ss:$8 sps:$4 sm:$0xff]   ;;  %v4774_v43 = vld [vmem:[%s7714_s3 + $0x30] ss:$8 sps:$4 sm:$0xff]   ;;  %v4775_v22 = vld [vmem:[%s7714_s3 + $0x44] ss:$8 sps:$4 sm:$0xff]  }
 0x2e8   :  { %v2425_v8 = vmul.f32 %v8012_v55, %v2185_v40  ;;  %v2186_v15 = vmax.f32 %v2144_v21, 0.0  ;;  %v2735_v61 = vpack.c.bf16 %v2684_v25, %v2683_v53  ;;  %v4766_v53 = vld [vmem:[%s7714_s3 + $0x14] ss:$8 sps:$4 sm:$0xff]   ;;  %v4777_v63 = vld [vmem:[%s7714_s3 + $0x40] ss:$8 sps:$4 sm:$0xff]  }
 0x2e9   :  { %v4781_v25 = vld [vmem:[%s7714_s3 + $0x64] ss:$8 sps:$4 sm:$0xff]   ;;  %v4783_v40 = vld [vmem:[%s7714_s3 + $0x60] ss:$8 sps:$4 sm:$0xff]   ;;  %v4784_v32 = vld [vmem:[%s7714_s3 + $0x74] ss:$8 sps:$4 sm:$0xff]  }
 0x2ea   :  { %v2665_v2 = vadd.f32 %v8014_v20, %v2425_v8  ;;  %v2426_v35 = vmul.f32 %v8015_v31, %v2186_v15  ;;  %3314 = vmatpush1.bf16.msra.mxu0 %v2735_v61  ;;  %v4786_v21 = vld [vmem:[%s7714_s3 + $0x70] ss:$8 sps:$4 sm:$0xff]   ;;  %v4787_v9 = vld [vmem:[%s7714_s3 + $0x84] ss:$8 sps:$4 sm:$0xff]   ;;  %v4789_v6 = vld [vmem:[%s7714_s3 + $0x80] ss:$8 sps:$4 sm:$0xff]  }
 0x2eb   :  { %4325 = vperm.xlu0 %4681, %v4322_v3   ;;  %3315 = vmatprep.subr.bf16.mxu0 %v7793_v49  ;;  %v4790_v59 = vld [vmem:[%s7714_s3 + $0x94] ss:$8 sps:$4 sm:$0xff]   ;;  %v4792_v55 = vld [vmem:[%s7714_s3 + $0x90] ss:$8 sps:$4 sm:$0xff]   ;;  %v4793_v8 = vld [vmem:[%s7714_s3 + $0xa4] ss:$8 sps:$4 sm:$0xff]  }
 0x2ec   :  { %v2685_v11 = vmax.f32 %v2645_v48, %v2665_v2  ;;  %v2666_v12 = vadd.f32 %v8017_v51, %v2426_v35  ;;  %v4795_v15 = vld [vmem:[%s7714_s3 + $0xa0] ss:$8 sps:$4 sm:$0xff]   ;;  %v4796_v61 = vld [vmem:[%s7714_s3 + $0xb4] ss:$8 sps:$4 sm:$0xff]   ;;  %v4798_v3 = vld [vmem:[%s7714_s3 + $0xb0] ss:$8 sps:$4 sm:$0xff]   ;;  %v7324_v51 = vpop.permute.xlu1 %3657 }
 0x2ed   :  { %v4799_v50 = vld [vmem:[%s7714_s3 + $0xc4] ss:$8 sps:$4 sm:$0xff]   ;;  %v4801_v48 = vld [vmem:[%s7714_s3 + $0xc0] ss:$8 sps:$4 sm:$0xff]   ;;  %v4802_v20 = vld [vmem:[%s7714_s3 + $0xd4] ss:$8 sps:$4 sm:$0xff]  }
 0x2ee   :  { %v2686_v44 = vmax.f32 %v2646_v39, %v2666_v12  ;;  %v4804_v2 = vld [vmem:[%s7714_s3 + $0xd0] ss:$8 sps:$4 sm:$0xff]   ;;  %v4805_v31 = vld [vmem:[%s7714_s3 + $0xe4] ss:$8 sps:$4 sm:$0xff]   ;;  %v4807_v35 = vld [vmem:[%s7714_s3 + $0xe0] ss:$8 sps:$4 sm:$0xff]   ;;  %v7327_v12 = vpop.permute.xlu0 %3792 }
 0x2ef   :  { %v4808_v17 = vld [vmem:[%s7714_s3 + $0xf4] ss:$8 sps:$4 sm:$0xff]   ;;  %v4810_v39 = vld [vmem:[%s7714_s3 + $0xf0] ss:$8 sps:$4 sm:$0xff]  }
 0x2f0   :  { %v2736_v56 = vpack.c.bf16 %v2686_v44, %v2685_v11  ;;  %v4811_v11 = vld [vmem:[%s7714_s3 + $0x104] ss:$8 sps:$4 sm:$0xff]   ;;  %v4813_v44 = vld [vmem:[%s7714_s3 + $0x100] ss:$8 sps:$4 sm:$0xff]  }
 0x2f2   :  { %3316 = vmatpush1.bf16.msra.mxu0 %v2736_v56  ;;  %v7332_v56 = vpop.permute.xlu1 %3797 }
 0x2f5   :  { %3330 = vmatmul.mubr.bf16.vlgmr.msra.gmra.mrb[40].mxu0 %v4763_v45  ;;  %v4814_v45 = vld [vmem:[%s7714_s3 + $0x114] ss:$8 sps:$4 sm:$0xff]  }
 0x2f6   :  { %4521 = vmatprep.mubr.msk.bf16.mxu0 %vm1893_vm1, %v4766_v53  ;;  %v7337_v53 = vpop.permute.xlu0 %3892 }
 0x2fd   :  { %3338 = vmatmul.mubr.bf16.gmra.mrb[44].mxu0 %v4768_v36  ;;  %v7340_v36 = vpop.permute.xlu1 %3897 }
 0x2fe   :  { %4522 = vmatprep.mubr.msk.bf16.mxu0 %vm1893_vm1, %v4769_v38  ;;  %v4816_v38 = vld [vmem:[%s7714_s3 + $0x110] ss:$8 sps:$4 sm:$0xff]  }
 0x305   :  { %3346 = vmatmul.mubr.bf16.gmra.mrb[48].mxu0 %v4771_v37  ;;  %v4817_v37 = vld [vmem:[%s7714_s3 + $0x124] ss:$8 sps:$4 sm:$0xff]  }
 0x306   :  { %4523 = vmatprep.mubr.msk.bf16.mxu0 %vm1893_vm1, %v4772_v18  ;;  %v7348_v18 = vpop.permute.xlu0 %2899 }
 0x30d   :  { %3354 = vmatmul.mubr.bf16.gmra.mrb[52].mxu0 %v4774_v43  ;;  %v7350_v43 = vpop.permute.xlu1 %2904 }
 0x30e   :  { %4524 = vmatprep.mubr.msk.bf16.mxu0 %vm1893_vm1, %v4775_v22  ;;  %8018 = vst [vmem:[#allocation73_spill] sm:$0xff] %v7350_v43  ;;  %v4819_v22 = vld [vmem:[%s7714_s3 + $0x120] ss:$8 sps:$4 sm:$0xff]  }
 0x315   :  { %3362 = vmatmul.mubr.bf16.gmra.mrb[56].mxu0 %v4777_v63  ;;  %v7356_v63 = vpop.permute.xlu0 %2999 }
 0x316   :  { %4525 = vmatprep.mubr.msk.bf16.mxu0 %vm1893_vm1, %v4778_v23  ;;  %8019 = vst [vmem:[#allocation12_spill] sm:$0xff] %v7356_v63  ;;  %v4820_v23 = vld [vmem:[%s7714_s3 + $0x134] ss:$8 sps:$4 sm:$0xff]  }
 0x31d   :  { %3370 = vmatmul.mubr.bf16.gmra.mrb[60].mxu0 %v4780_v26  ;;  %v7361_v26 = vpop.permute.xlu1 %3004 }
 0x31e   :  { %4526 = vmatprep.mubr.msk.bf16.mxu0 %vm1893_vm1, %v4781_v25  ;;  %8020 = vst [vmem:[#allocation13_spill] sm:$0xff] %v7361_v26  ;;  %v7364_v25 = vpop.permute.xlu0 %3562 }
 0x325   :  { %3378 = vmatmul.mubr.bf16.gmra.mrb[64].mxu0 %v4783_v40  ;;  %v4822_v40 = vld [vmem:[%s7714_s3 + $0x130] ss:$8 sps:$4 sm:$0xff]  }
 0x326   :  { %4527 = vmatprep.mubr.msk.bf16.mxu0 %vm1893_vm1, %v4784_v32  ;;  %v7369_v32 = vpop.permute.xlu1 %3567 }
 0x32d   :  { %3386 = vmatmul.mubr.bf16.gmra.mrb[68].mxu0 %v4786_v21  ;;  %v7371_v21 = vpop.permute.xlu0 %3662 }
 0x32e   :  { %4528 = vmatprep.mubr.msk.bf16.mxu0 %vm1893_vm1, %v4787_v9  ;;  %8021 = vst [vmem:[#allocation15_spill] sm:$0xff] %v7371_v21  ;;  %v7373_v9 = vpop.permute.xlu1 %3667 }
 0x32f   :  { %8022 = vst [vmem:[#allocation34_spill] sm:$0xff] %v7373_v9 }
 0x335   :  { %3394 = vmatmul.mubr.bf16.gmra.mrb[72].mxu0 %v4789_v6  ;;  %v7375_v6 = vpop.permute.xlu0 %3802 }
 0x336   :  { %4529 = vmatprep.mubr.msk.bf16.mxu0 %vm1893_vm1, %v4790_v59  ;;  %8023 = vst [vmem:[#allocation5_spill] sm:$0xff] %v7375_v6  ;;  %v7377_v59 = vpop.permute.xlu1 %3807 }
 0x337   :  { %8024 = vst [vmem:[#allocation6_spill] sm:$0xff] %v7377_v59 }
 0x33d   :  { %3402 = vmatmul.mubr.bf16.gmra.mrb[76].mxu0 %v4792_v55  ;;  %v7379_v55 = vpop.permute.xlu0 %3902 }
 0x33e   :  { %4530 = vmatprep.mubr.msk.bf16.mxu0 %vm1893_vm1, %v4793_v8  ;;  %8025 = vst [vmem:[#allocation11_spill] sm:$0xff] %v7379_v55  ;;  %v7381_v8 = vpop.permute.xlu1 %3907 }
 0x33f   :  { %8026 = vst [vmem:[#allocation19_spill] sm:$0xff] %v7381_v8 }
 0x345   :  { %3410 = vmatmul.mubr.bf16.gmra.mrb[80].mxu0 %v4795_v15  ;;  %v2910_v15 = vpop.permute.xlu0 %2909 }
 0x346   :  { %4531 = vmatprep.mubr.msk.bf16.mxu0 %vm1893_vm1, %v4796_v61  ;;  %v2915_v61 = vpop.permute.xlu1 %2914 }
 0x34d   :  { %3418 = vmatmul.mubr.bf16.gmra.mrb[84].mxu0 %v4798_v3  ;;  %v7383_v3 = vpop.permute.xlu0 %3009 }
 0x34e   :  { %4532 = vmatprep.mubr.msk.bf16.mxu0 %vm1893_vm1, %v4799_v50  ;;  %8027 = vst [vmem:[#allocation17_spill] sm:$0xff] %v7383_v3  ;;  %v7385_v50 = vpop.permute.xlu1 %3014 }
 0x34f   :  { %8028 = vst [vmem:[#allocation8_spill] sm:$0xff] %v7385_v50 }
 0x355   :  { %3426 = vmatmul.mubr.bf16.gmra.mrb[88].mxu0 %v4801_v48  ;;  %v7387_v48 = vpop.permute.xlu0 %3572 }
 0x356   :  { %4533 = vmatprep.mubr.msk.bf16.mxu0 %vm1893_vm1, %v4802_v20  ;;  %8029 = vst [vmem:[#allocation76_spill] sm:$0xff] %v7387_v48  ;;  %v7389_v20 = vpop.permute.xlu1 %3577 }
 0x357   :  { %8030 = vst [vmem:[#allocation3_spill] sm:$0xff] %v7389_v20 }
 0x35d   :  { %3434 = vmatmul.mubr.bf16.gmra.mrb[92].mxu0 %v4804_v2  ;;  %v7391_v2 = vpop.permute.xlu0 %3672 }
 0x35e   :  { %4534 = vmatprep.mubr.msk.bf16.mxu0 %vm1893_vm1, %v4805_v31  ;;  %8031 = vst [vmem:[#allocation14_spill] sm:$0xff] %v7391_v2  ;;  %v7393_v31 = vpop.permute.xlu1 %3677 }
 0x35f   :  { %8032 = vst [vmem:[#allocation30_spill] sm:$0xff] %v7393_v31 }
 0x365   :  { %3442 = vmatmul.mubr.bf16.gmra.mrb[96].mxu0 %v4807_v35  ;;  %v7395_v35 = vpop.permute.xlu0 %3812 }
 0x366   :  { %4535 = vmatprep.mubr.msk.bf16.mxu0 %vm1893_vm1, %v4808_v17  ;;  %8033 = vst [vmem:[#allocation78_spill] sm:$0xff] %v7395_v35  ;;  %v7397_v17 = vpop.permute.xlu1 %3817 }
 0x367   :  { %8034 = vst [vmem:[#allocation7_spill] sm:$0xff] %v7397_v17 }
 0x36d   :  { %3450 = vmatmul.mubr.bf16.gmra.mrb[100].mxu0 %v4810_v39  ;;  %v7399_v39 = vpop.permute.xlu0 %3912 }
 0x36e   :  { %4536 = vmatprep.mubr.msk.bf16.mxu0 %vm1893_vm1, %v4811_v11  ;;  %8035 = vst [vmem:[#allocation27_spill] sm:$0xff] %v7399_v39  ;;  %v7401_v11 = vpop.permute.xlu1 %3917 }
 0x36f   :  { %8036 = vst [vmem:[#allocation16_spill] sm:$0xff] %v7401_v11 }
 0x375   :  { %3458 = vmatmul.mubr.bf16.gmra.mrb[104].mxu0 %v4813_v44  ;;  %v7403_v44 = vpop.permute.xlu0 %2919 }
 0x376   :  { %4537 = vmatprep.mubr.msk.bf16.mxu0 %vm1893_vm1, %v4814_v45  ;;  %8037 = vst [vmem:[#allocation18_spill] sm:$0xff] %v7403_v44  ;;  %v7405_v45 = vpop.permute.xlu1 %2924 }
 0x377   :  { %8038 = vst [vmem:[#allocation10_spill] sm:$0xff] %v7405_v45 }
 0x37a   :  { %v7413_v50 = vpop.permute.xlu1 %3024 }
 0x37b   :  { %8040 = vst [vmem:[#allocation23_spill] sm:$0xff] %v7413_v50 }
 0x37d   :  { %3466 = vmatmul.mubr.bf16.gmra.mrb[108].mxu0 %v4816_v38 }
 0x37e   :  { %4538 = vmatprep.mubr.msk.bf16.mxu0 %vm1893_vm1, %v4817_v37  ;;  %v3588_v39 = vpop.permute.xlu1 %3587 }
 0x382   :  { %v7421_v45 = vpop.permute.xlu1 %3687 }
 0x383   :  { %8042 = vst [vmem:[#allocation81_spill] sm:$0xff] %v7421_v45 }
 0x385   :  { %3474 = vmatmul.mubr.bf16.gmra.mrb[112].mxu0 %v4819_v22  ;;  %v7409_v22 = vpop.permute.xlu0 %3019 }
 0x386   :  { %4539 = vmatprep.mubr.msk.bf16.mxu0 %vm1893_vm1, %v4820_v23  ;;  %8039 = vst [vmem:[#allocation50_spill] sm:$0xff] %v7409_v22  ;;  %v7429_v50 = vpop.permute.xlu1 %3827 }
 0x387   :  { %8044 = vst [vmem:[#allocation4_spill] sm:$0xff] %v7429_v50 }
 0x389   :  { %v3583_v3 = vpop.permute.xlu0 %3582 }
 0x38a   :  { %v7437_v63 = vpop.permute.xlu1 %3927 }
 0x38b   :  { %8046 = vst [vmem:[#allocation82_spill] sm:$0xff] %v7437_v63 }
 0x38d   :  { %3482 = vmatmul.mubr.bf16.gmra.mrb[116].mxu0 %v4822_v40  ;;  %v7419_v35 = vpop.permute.xlu0 %3682 }
 0x38e   :  { %8041 = vst [vmem:[#allocation54_spill] sm:$0xff] %v7419_v35 }
 0x391   :  { %v7427_v20 = vpop.permute.xlu0 %3822 }
 0x392   :  { %8043 = vst [vmem:[#allocation32_spill] sm:$0xff] %v7427_v20 }
 0x395   :  { %v7433_v48 = vpop.permute.xlu0 %3922 }
 0x396   :  { %8045 = vst [vmem:[#allocation26_spill] sm:$0xff] %v7433_v48 }
 0x399   :  { %v7439_v45 = vpop.permute.xlu0 %2929 }
 0x39a   :  { %8047 = vst [vmem:[#allocation49_spill] sm:$0xff] %v7439_v45 }
 0x39d   :  { %v7447_v59 = vpop.permute.xlu0 %3029 }
 0x39e   :  { %8050 = vst [vmem:[#allocation31_spill] sm:$0xff] %v7447_v59 }
 0x3a1   :  { %v7455_v6 = vpop.permute.xlu0 %3592 }
 0x3a2   :  { %8052 = vst [vmem:[#allocation21_spill] sm:$0xff] %v7455_v6 }
 0x3c8   :  { %v7407_v38 = vpop.f32.mrb[40].mxu0 }
 0x3c9   :  { %v3333_v37 = vpop.f32.mrb[41].mxu0 }
 0x3ca   :  { %v7411_v23 = vpop.f32.mrb[42].mxu0 }
 0x3cb   :  { %v3336_v40 = vpop.f32.mrb[43].mxu0 }
 0x3d0   :  { %v7415_v17 = vpop.f32.mrb[44].mxu0 }
 0x3d1   :  { %v3341_v31 = vpop.f32.mrb[45].mxu0 }
 0x3d2   :  { %v7417_v11 = vpop.f32.mrb[46].mxu0 }
 0x3d3   :  { %v3344_v44 = vpop.f32.mrb[47].mxu0 }
 0x3d8   :  { %v7423_v37 = vpop.f32.mrb[48].mxu0 }
 0x3d9   :  { %v3349_v22 = vpop.f32.mrb[49].mxu0 }
 0x3da   :  { %v7425_v2 = vpop.f32.mrb[50].mxu0 }
 0x3db   :  { %v3352_v40 = vpop.f32.mrb[51].mxu0 }
 0x3dc   :  { %v7443_v40 = vpop.permute.xlu1 %2934 }
 0x3dd   :  { %8048 = vst [vmem:[#allocation53_spill] sm:$0xff] %v7443_v40 }
 0x3e0   :  { %v7431_v26 = vpop.f32.mrb[52].mxu0 }
 0x3e1   :  { %v3357_v31 = vpop.f32.mrb[53].mxu0 }
 0x3e2   :  { %v7435_v44 = vpop.f32.mrb[54].mxu0  ;;  %v7449_v31 = vpop.permute.xlu1 %3034 }
 0x3e3   :  { %v3360_v35 = vpop.f32.mrb[55].mxu0  ;;  %8051 = vst [vmem:[#allocation37_spill] sm:$0xff] %v7449_v31 }
 0x3e4   :  { %v4825_v35 = vld [vmem:[%s7717_s5 + $0x4] ss:$8 sps:$4 sm:$0xff]  }
 0x3e5   :  { %4548 = vmatprep.mubr.msk.bf16.mxu1 %vm1893_vm1, %v4825_v35 }
 0x3e6   :  { %v7459_v21 = vpop.permute.xlu1 %3597 }
 0x3e7   :  { %8054 = vst [vmem:[#allocation38_spill] sm:$0xff] %v7459_v21 }
 0x3e8   :  { %v7441_v22 = vpop.f32.mrb[56].mxu0 }
 0x3e9   :  { %v3365_v8 = vpop.f32.mrb[57].mxu0 }
 0x3ea   :  { %v7445_v20 = vpop.f32.mrb[58].mxu0 }
 0x3eb   :  { %8049 = vst [vmem:[#allocation33_spill] sm:$0xff] %v7445_v20  ;;  %v3368_v50 = vpop.f32.mrb[59].mxu0 }
 0x3f0   :  { %v3371_v48 = vpop.f32.mrb[60].mxu0 }
 0x3f1   :  { %v3372_v63 = vadd.f32 %v3371_v48, %v2910_v15  ;;  %v3373_v9 = vpop.f32.mrb[61].mxu0  ;;  %v7465_v15 = vpop.permute.xlu0 %3692 }
 0x3f2   :  { %v3374_v45 = vpop.f32.mrb[62].mxu0  ;;  %8056 = vst [vmem:[#allocation25_spill] sm:$0xff] %v7465_v15 }
 0x3f3   :  { %v3500_v8 = vmax.f32 %v3372_v63, 0.0  ;;  %v3375_v55 = vadd.f32 %v3374_v45, %v2915_v61  ;;  %v3376_v40 = vpop.f32.mrb[63].mxu0  ;;  %v7469_v63 = vpop.permute.xlu1 %3697 }
 0x3f4   :  { %8057 = vst [vmem:[#allocation85_spill] sm:$0xff] %v7469_v63 }
 0x3f5   :  { %v7457_v50 = vmul.f32 %v3583_v3, %v3500_v8  ;;  %v3501_v59 = vmax.f32 %v3375_v55, 0.0  ;;  %v7471_v61 = vpop.permute.xlu0 %3832 }
 0x3f6   :  { %8058 = vst [vmem:[#allocation9_spill] sm:$0xff] %v7471_v61 }
 0x3f7   :  { %8053 = vst [vmem:[#allocation36_spill] sm:$0xff] %v7457_v50  ;;  %v7461_v31 = vmul.f32 %v3588_v39, %v3501_v59  ;;  %v7475_v55 = vpop.permute.xlu1 %3837 }
 0x3f8   :  { %v7463_v20 = vpop.f32.mrb[64].mxu0  ;;  %8060 = vst [vmem:[#allocation22_spill] sm:$0xff] %v7475_v55 }
 0x3f9   :  { %8055 = vst [vmem:[#allocation24_spill] sm:$0xff] %v7461_v31  ;;  %v3381_v43 = vpop.f32.mrb[65].mxu0  ;;  %v7479_v39 = vpop.permute.xlu0 %3932 }
 0x3fa   :  { %v7467_v9 = vpop.f32.mrb[66].mxu0  ;;  %8062 = vst [vmem:[#allocation42_spill] sm:$0xff] %v7479_v39  ;;  %v8071_v39 = vld [vmem:[#allocation86_spill] sm:$0xff] }
 0x3fb   :  { %v3384_v48 = vpop.f32.mrb[67].mxu0  ;;  %v7481_v43 = vpop.permute.xlu1 %3937 }
 0x3fc   :  { %8063 = vst [vmem:[#allocation41_spill] sm:$0xff] %v7481_v43  ;;  %v3332_v43 = vadd.f32 %v7407_v38, %v8071_v39 }
 0x3fd   :  { %v7487_v15 = vpop.permute.xlu0 %2939 }
 0x3fe   :  { %8066 = vst [vmem:[#allocation39_spill] sm:$0xff] %v7487_v15 }
 0x3ff   :  { %v7489_v61 = vpop.permute.xlu1 %2944 }
 0x400   :  { %v7473_v45 = vpop.f32.mrb[68].mxu0  ;;  %8067 = vst [vmem:[#allocation52_spill] sm:$0xff] %v7489_v61 }
 0x401   :  { %8059 = vst [vmem:[#allocation40_spill] sm:$0xff] %v7473_v45  ;;  %v3389_v3 = vpop.f32.mrb[69].mxu0  ;;  %v7493_v21 = vpop.permute.xlu0 %3039 }
 0x402   :  { %v7477_v40 = vpop.f32.mrb[70].mxu0  ;;  %8069 = vst [vmem:[#allocation44_spill] sm:$0xff] %v7493_v21 }
 0x403   :  { %8061 = vst [vmem:[#allocation87_spill] sm:$0xff] %v7477_v40  ;;  %v3392_v59 = vpop.f32.mrb[71].mxu0 }
 0x405   :  { %v7503_v15 = vpop.permute.xlu0 %3602 }
 0x408   :  { %v7483_v35 = vpop.f32.mrb[72].mxu0 }
 0x409   :  { %8064 = vst [vmem:[#allocation28_spill] sm:$0xff] %v7483_v35  ;;  %v3397_v8 = vpop.f32.mrb[73].mxu0  ;;  %v7499_v35 = vpop.permute.xlu1 %3044 }
 0x40a   :  { %v7485_v48 = vpop.f32.mrb[74].mxu0  ;;  %8072 = vst [vmem:[#allocation51_spill] sm:$0xff] %v7499_v35  ;;  %v8073_v8 = vld [vmem:[#allocation88_spill] sm:$0xff]  ;;  %v8077_v35 = vld [vmem:[#allocation91_spill] sm:$0xff] }
 0x40b   :  { %8065 = vst [vmem:[#allocation29_spill] sm:$0xff] %v7485_v48  ;;  %v3400_v63 = vpop.f32.mrb[75].mxu0  ;;  %v3490_v48 = vmax.f32 %v3332_v43, 0.0  ;;  %v8078_v43 = vld [vmem:[#allocation94_spill] sm:$0xff] }
 0x40c   :  { %v3335_v63 = vadd.f32 %v7411_v23, %v8073_v8  ;;  %v3343_v8 = vadd.f32 %v7417_v11, %v8078_v43 }
 0x40d   :  { %v7506_v21 = vpop.permute.xlu1 %3607 }
 0x40e   :  { %v3491_v45 = vmax.f32 %v3335_v63, 0.0  ;;  %8075 = vst [vmem:[#allocation20_spill] sm:$0xff] %v7506_v21 }
 0x410   :  { %v7491_v3 = vpop.f32.mrb[76].mxu0  ;;  %v3731_v63 = vmul.f32 %v6912_v5, %v3491_v45 }
 0x411   :  { %8068 = vst [vmem:[#allocation35_spill] sm:$0xff] %v7491_v3  ;;  %v3405_v55 = vpop.f32.mrb[77].mxu0  ;;  %v8074_v3 = vld [vmem:[#allocation89_spill] sm:$0xff] }
 0x412   :  { %v7495_v59 = vpop.f32.mrb[78].mxu0  ;;  %v3971_v11 = vadd.f32 %v6958_v28, %v3731_v63 }
 0x413   :  { %8070 = vst [vmem:[#allocation90_spill] sm:$0xff] %v7495_v59  ;;  %v3408_v40 = vpop.f32.mrb[79].mxu0  ;;  %v8076_v59 = vld [vmem:[#allocation93_spill] sm:$0xff] }
 0x414   :  { %v3340_v31 = vadd.f32 %v7415_v17, %v8076_v59  ;;  %v3730_v40 = vmul.f32 %v6907_v58, %v3490_v48  ;;  %v7521_v48 = vpop.permute.xlu1 %3707 }
 0x416   :  { %v3492_v21 = vmax.f32 %v3340_v31, 0.0  ;;  %v3970_v17 = vadd.f32 %v6955_v7, %v3730_v40  ;;  %v3348_v7 = vadd.f32 %v7423_v37, %v7005_v30  ;;  %v8080_v40 = vld [vmem:[#allocation98_spill] sm:$0xff] }
 0x418   :  { %v3411_v61 = vpop.f32.mrb[80].mxu0  ;;  %v3732_v31 = vmul.f32 %v7052_v33, %v3492_v21  ;;  %v7536_v21 = vpop.permute.xlu1 %3847  ;;  %v3494_v37 = vmax.f32 %v3348_v7, 0.0 }
 0x419   :  { %v3412_v55 = vadd.f32 %v3411_v61, %v8074_v3  ;;  %v3413_v6 = vpop.f32.mrb[81].mxu0  ;;  %v7516_v3 = vpop.permute.xlu0 %3702 }
 0x41a   :  { %v3414_v38 = vpop.f32.mrb[82].mxu0  ;;  %v3972_v30 = vadd.f32 %v7101_v1, %v3732_v31  ;;  %v3356_v1 = vadd.f32 %v7431_v26, %v7149_v14 }
 0x41b   :  { %v3510_v39 = vmax.f32 %v3412_v55, 0.0  ;;  %v3415_v50 = vadd.f32 %v3414_v38, %v8077_v35  ;;  %v3416_v23 = vpop.f32.mrb[83].mxu0  ;;  %v3493_v35 = vmax.f32 %v3343_v8, 0.0 }
 0x41c   :  { %v3496_v14 = vmax.f32 %v3356_v1, 0.0  ;;  %v8088_v1 = vld [vmem:[#allocation19_spill] sm:$0xff] }
 0x41d   :  { %v3750_v61 = vmul.f32 %v6929_v52, %v3510_v39  ;;  %v3511_v6 = vmax.f32 %v3415_v50, 0.0  ;;  %v8079_v52 = vld [vmem:[#allocation97_spill] sm:$0xff]  ;;  %v7530_v8 = vpop.permute.xlu0 %3842  ;;  %v3733_v28 = vmul.f32 %v7055_v0, %v3493_v35 }
 0x41f   :  { %v3990_v59 = vadd.f32 %v6977_v16, %v3750_v61  ;;  %v3751_v58 = vmul.f32 %v6934_v54, %v3511_v6 }
 0x420   :  { %v3419_v55 = vpop.f32.mrb[84].mxu0 }
 0x421   :  { %v4010_v38 = vmax.f32 %v3970_v17, %v3990_v59  ;;  %v3991_v5 = vadd.f32 %v6984_v24, %v3751_v58  ;;  %v3420_v50 = vadd.f32 %v3419_v55, %v8079_v52  ;;  %v3421_v45 = vpop.f32.mrb[85].mxu0  ;;  %v3351_v24 = vadd.f32 %v7425_v2, %v7008_v57  ;;  %v7545_v55 = vpop.permute.xlu0 %3942 }
 0x422   :  { %v3422_v39 = vpop.f32.mrb[86].mxu0  ;;  %v3973_v59 = vadd.f32 %v7105_v46, %v3733_v28  ;;  %v7551_v52 = vpop.permute.xlu1 %3947 }
 0x423   :  { %v4011_v16 = vmax.f32 %v3971_v11, %v3991_v5  ;;  %v3512_v54 = vmax.f32 %v3420_v50, 0.0  ;;  %v3423_v23 = vadd.f32 %v3422_v39, %v8080_v40  ;;  %v3424_v43 = vpop.f32.mrb[87].mxu0  ;;  %v3495_v57 = vmax.f32 %v3351_v24, 0.0 }
 0x424   :  { %v3364_v40 = vadd.f32 %v7441_v22, %v7348_v18  ;;  %v8085_v18 = vld [vmem:[#allocation11_spill] sm:$0xff] }
 0x425   :  { %v3752_v63 = vmul.f32 %v7075_v60, %v3512_v54  ;;  %v3513_v61 = vmax.f32 %v3423_v23, 0.0  ;;  %v4038_v33 = vpack.c.bf16 %v4011_v16, %v4010_v38 }
 0x427   :  { %v3992_v6 = vadd.f32 %v7122_v41, %v3752_v63  ;;  %v3753_v17 = vmul.f32 %v7081_v4, %v3513_v61  ;;  %4145 = vmatpush1.bf16.msra.mxu1 %v4038_v33  ;;  %v3734_v4 = vmul.f32 %v7197_v47, %v3494_v37  ;;  %v8081_v63 = vld [vmem:[#allocation73_spill] sm:$0xff] }
 0x428   :  { %v3427_v0 = vpop.f32.mrb[88].mxu0  ;;  %4146 = vmatprep.subr.bf16.mxu1 %v7793_v49 }
 0x429   :  { %v4012_v2 = vmax.f32 %v3972_v30, %v3992_v6  ;;  %v3993_v60 = vadd.f32 %v7128_v34, %v3753_v17  ;;  %v3428_v58 = vadd.f32 %v3427_v0, %v7024_v19  ;;  %v3429_v35 = vpop.f32.mrb[89].mxu0  ;;  %v3359_v34 = vadd.f32 %v7435_v44, %v7152_v27  ;;  %v8086_v0 = vld [vmem:[#allocation34_spill] sm:$0xff] }
 0x42a   :  { %v3430_v41 = vpop.f32.mrb[90].mxu0  ;;  %v3735_v19 = vmul.f32 %v7200_v10, %v3495_v57  ;;  %v3974_v26 = vadd.f32 %v7327_v12, %v3734_v4  ;;  %v7566_v12 = vpop.permute.xlu1 %2954  ;;  %v8089_v4 = vld [vmem:[#allocation12_spill] sm:$0xff] }
 0x42b   :  { %v4013_v11 = vmax.f32 %v3973_v59, %v3993_v60  ;;  %v3514_v46 = vmax.f32 %v3428_v58, 0.0  ;;  %v3431_v38 = vadd.f32 %v3430_v41, %v7031_v29  ;;  %v3432_v5 = vpop.f32.mrb[91].mxu0  ;;  %v7560_v29 = vpop.permute.xlu0 %2949  ;;  %v3497_v7 = vmax.f32 %v3359_v34, 0.0 }
 0x42c   :  { %v3975_v27 = vadd.f32 %v7332_v56, %v3735_v19  ;;  %v3498_v59 = vmax.f32 %v3364_v40, 0.0  ;;  %v8090_v5 = vld [vmem:[#allocation76_spill] sm:$0xff]  ;;  %v8096_v40 = vld [vmem:[#allocation30_spill] sm:$0xff] }
 0x42d   :  { %v3754_v50 = vmul.f32 %v7208_v62, %v3514_v46  ;;  %v3515_v45 = vmax.f32 %v3431_v38, 0.0  ;;  %v4039_v31 = vpack.c.bf16 %v4013_v11, %v4012_v2  ;;  %v3737_v56 = vmul.f32 %v7369_v32, %v3497_v7  ;;  %v8087_v32 = vld [vmem:[#allocation6_spill] sm:$0xff] }
 0x42e   :  { %v3738_v34 = vmul.f32 %v8090_v5, %v3498_v59  ;;  %v8093_v7 = vld [vmem:[#allocation14_spill] sm:$0xff] }
 0x42f   :  { %v3994_v47 = vadd.f32 %v7337_v53, %v3754_v50  ;;  %v3755_v39 = vmul.f32 %v7324_v51, %v3515_v45  ;;  %4147 = vmatpush1.bf16.msra.mxu1 %v4039_v31  ;;  %v3736_v53 = vmul.f32 %v7364_v25, %v3496_v14  ;;  %v7576_v6 = vpop.permute.xlu0 %3049  ;;  %v8084_v25 = vld [vmem:[#allocation5_spill] sm:$0xff]  ;;  %v3977_v2 = vadd.f32 %v8087_v32, %v3737_v56 }
 0x430   :  { %v3435_v16 = vpop.f32.mrb[92].mxu0  ;;  %4148 = vmatprep.subr.bf16.mxu1 %v7793_v49  ;;  %v8091_v45 = vld [vmem:[#allocation13_spill] sm:$0xff] }
 0x431   :  { %v4014_v10 = vmax.f32 %v3974_v26, %v3994_v47  ;;  %v3995_v62 = vadd.f32 %v7340_v36, %v3755_v39  ;;  %v3436_v44 = vadd.f32 %v3435_v16, %v7171_v42  ;;  %v3437_v54 = vpop.f32.mrb[93].mxu0  ;;  %v8082_v36 = vld [vmem:[#allocation33_spill] sm:$0xff]  ;;  %v8083_v42 = vld [vmem:[#allocation15_spill] sm:$0xff]  ;;  %v3976_v17 = vadd.f32 %v8084_v25, %v3736_v53 }
 0x432   :  { %v3438_v51 = vpop.f32.mrb[94].mxu0  ;;  %v3367_v61 = vadd.f32 %v8082_v36, %v8081_v63  ;;  %v8092_v47 = vld [vmem:[#allocation3_spill] sm:$0xff]  ;;  %v8098_v63 = vld [vmem:[#allocation16_spill] sm:$0xff] }
 0x433   :  { %v4015_v23 = vmax.f32 %v3975_v27, %v3995_v62  ;;  %v3516_v43 = vmax.f32 %v3436_v44, 0.0  ;;  %v3439_v28 = vadd.f32 %v3438_v51, %v7178_v13  ;;  %v3440_v24 = vpop.f32.mrb[95].mxu0  ;;  %v7581_v13 = vpop.permute.xlu1 %3054  ;;  %v8094_v44 = vld [vmem:[#allocation78_spill] sm:$0xff]  ;;  %v8095_v53 = vld [vmem:[#allocation27_spill] sm:$0xff] }
 0x434   :  { %v3499_v58 = vmax.f32 %v3367_v61, 0.0  ;;  %v7589_v26 = vpop.permute.xlu0 %3612  ;;  %v3978_v54 = vadd.f32 %v8094_v44, %v3738_v34  ;;  %v8099_v61 = vld [vmem:[#allocation17_spill] sm:$0xff] }
 0x435   :  { %v3756_v33 = vmul.f32 %v8083_v42, %v3516_v43  ;;  %v3517_v30 = vmax.f32 %v3439_v28, 0.0  ;;  %v4040_v37 = vpack.c.bf16 %v4015_v23, %v4014_v10  ;;  %v8097_v28 = vld [vmem:[#allocation7_spill] sm:$0xff]  ;;  %v8107_v34 = vld [vmem:[#allocation81_spill] sm:$0xff] }
 0x436   :  { %v3739_v39 = vmul.f32 %v8092_v47, %v3499_v58  ;;  %v8103_v58 = vld [vmem:[#allocation54_spill] sm:$0xff] }
 0x437   :  { %v3996_v22 = vadd.f32 %v8085_v18, %v3756_v33  ;;  %v3757_v57 = vmul.f32 %v8086_v0, %v3517_v30  ;;  %4149 = vmatpush1.bf16.msra.mxu1 %v4040_v37  ;;  %v7593_v62 = vpop.permute.xlu1 %3617  ;;  %v8100_v37 = vld [vmem:[#allocation18_spill] sm:$0xff] }
 0x438   :  { %v3443_v60 = vpop.f32.mrb[96].mxu0  ;;  %4150 = vmatprep.subr.bf16.mxu1 %v7793_v49  ;;  %v3979_v24 = vadd.f32 %v8097_v28, %v3739_v39  ;;  %v7602_v30 = vpop.permute.xlu0 %3712  ;;  %v3380_v25 = vadd.f32 %v7463_v20, %v8100_v37  ;;  %v8106_v20 = vld [vmem:[#allocation26_spill] sm:$0xff]  ;;  %v8117_v37 = vld [vmem:[#allocation53_spill] sm:$0xff] }
 0x439   :  { %v4016_v35 = vmax.f32 %v3976_v17, %v3996_v22  ;;  %v3997_v41 = vadd.f32 %v8088_v1, %v3757_v57  ;;  %v3444_v11 = vadd.f32 %v3443_v60, %v8089_v4  ;;  %v3445_v46 = vpop.f32.mrb[97].mxu0  ;;  %v8101_v22 = vld [vmem:[#allocation8_spill] sm:$0xff] }
 0x43a   :  { %v3446_v38 = vpop.f32.mrb[98].mxu0  ;;  %v3502_v4 = vmax.f32 %v3380_v25, 0.0  ;;  %v8105_v46 = vld [vmem:[#allocation32_spill] sm:$0xff]  ;;  %v8118_v25 = vld [vmem:[#allocation87_spill] sm:$0xff] }
 0x43b   :  { %v4017_v19 = vmax.f32 %v3977_v2, %v3997_v41  ;;  %v3518_v50 = vmax.f32 %v3444_v11, 0.0  ;;  %v3447_v31 = vadd.f32 %v3446_v38, %v8091_v45  ;;  %v3448_v14 = vpop.f32.mrb[99].mxu0  ;;  %v7607_v32 = vpop.permute.xlu1 %3717  ;;  %v8102_v2 = vld [vmem:[#allocation10_spill] sm:$0xff]  ;;  %v8104_v11 = vld [vmem:[#allocation36_spill] sm:$0xff] }
 0x43c   :  { %v3383_v60 = vadd.f32 %v7467_v9, %v8102_v2  ;;  %v3980_v38 = vadd.f32 %v8105_v46, %v8104_v11  ;;  %v8108_v9 = vld [vmem:[#allocation24_spill] sm:$0xff]  ;;  %v8120_v2 = vld [vmem:[#allocation9_spill] sm:$0xff]  ;;  %v8123_v46 = vld [vmem:[#allocation22_spill] sm:$0xff] }
 0x43d   :  { %v3758_v16 = vmul.f32 %v8093_v7, %v3518_v50  ;;  %v3519_v27 = vmax.f32 %v3447_v31, 0.0  ;;  %v4041_v10 = vpack.c.bf16 %v4017_v19, %v4016_v35  ;;  %v7616_v50 = vpop.permute.xlu0 %3852  ;;  %v8109_v14 = vld [vmem:[#allocation4_spill] sm:$0xff]  ;;  %v8110_v7 = vld [vmem:[#allocation82_spill] sm:$0xff] }
 0x43e   :  { %v3503_v45 = vmax.f32 %v3383_v60, 0.0  ;;  %v3981_v47 = vadd.f32 %v8109_v14, %v8108_v9 }
 0x43f   :  { %v3998_v51 = vadd.f32 %v8095_v53, %v3758_v16  ;;  %v3759_v23 = vmul.f32 %v8096_v40, %v3519_v27  ;;  %4151 = vmatpush1.bf16.msra.mxu1 %v4041_v10  ;;  %v8111_v27 = vld [vmem:[#allocation50_spill] sm:$0xff]  ;;  %v8112_v53 = vld [vmem:[#allocation21_spill] sm:$0xff] }
 0x440   :  { %v3451_v43 = vpop.f32.mrb[100].mxu0  ;;  %4152 = vmatprep.subr.bf16.mxu1 %v7793_v49 }
 0x441   :  { %v4018_v56 = vmax.f32 %v3978_v54, %v3998_v51  ;;  %v3999_v36 = vadd.f32 %v8098_v63, %v3759_v23  ;;  %v3452_v42 = vadd.f32 %v3451_v43, %v8099_v61  ;;  %v3453_v33 = vpop.f32.mrb[101].mxu0  ;;  %v7623_v54 = vpop.permute.xlu1 %3857  ;;  %v3742_v51 = vmul.f32 %v8112_v53, %v3502_v4  ;;  %v8113_v23 = vld [vmem:[#allocation49_spill] sm:$0xff]  ;;  %v8114_v43 = vld [vmem:[#allocation40_spill] sm:$0xff]  ;;  %v8115_v63 = vld [vmem:[#allocation23_spill] sm:$0xff] }
 0x442   :  { %v3454_v17 = vpop.f32.mrb[102].mxu0  ;;  %v3388_v28 = vadd.f32 %v8114_v43, %v8113_v23  ;;  %v8128_v53 = vld [vmem:[#allocation37_spill] sm:$0xff]  ;;  %v8129_v43 = vld [vmem:[#allocation52_spill] sm:$0xff] }
 0x443   :  { %v4019_v59 = vmax.f32 %v3979_v24, %v3999_v36  ;;  %v3520_v18 = vmax.f32 %v3452_v42, 0.0  ;;  %v3455_v0 = vadd.f32 %v3454_v17, %v8101_v22  ;;  %v3456_v57 = vpop.f32.mrb[103].mxu0  ;;  %v8116_v42 = vld [vmem:[#allocation38_spill] sm:$0xff]  ;;  %v3391_v17 = vadd.f32 %v8118_v25, %v8117_v37 }
 0x444   :  { %v3743_v33 = vmul.f32 %v8116_v42, %v3503_v45  ;;  %v3953_v57 = vpop.permute.xlu0 %3952  ;;  %v3982_v60 = vadd.f32 %v8120_v2, %v3742_v51  ;;  %v8132_v2 = vld [vmem:[#allocation44_spill] sm:$0xff] }
 0x445   :  { %v3760_v35 = vmul.f32 %v8103_v58, %v3520_v18  ;;  %v3521_v1 = vmax.f32 %v3455_v0, 0.0  ;;  %v4042_v41 = vpack.c.bf16 %v4019_v59, %v4018_v56  ;;  %v8119_v59 = vld [vmem:[#allocation25_spill] sm:$0xff]  ;;  %v3504_v58 = vmax.f32 %v3388_v28, 0.0  ;;  %v3958_v11 = vpop.permute.xlu1 %3957 }
 0x446   :  { %v8130_v28 = vld [vmem:[#allocation29_spill] sm:$0xff] }
 0x447   :  { %v4000_v5 = vadd.f32 %v8106_v20, %v3760_v35  ;;  %v3761_v19 = vmul.f32 %v8107_v34, %v3521_v1  ;;  %4153 = vmatpush1.bf16.msra.mxu1 %v4042_v41  ;;  %v8121_v35 = vld [vmem:[#allocation42_spill] sm:$0xff]  ;;  %v8122_v41 = vld [vmem:[#allocation85_spill] sm:$0xff] }
 0x448   :  { %v3459_v31 = vpop.f32.mrb[104].mxu0  ;;  %4154 = vmatprep.subr.bf16.mxu1 %v7793_v49  ;;  %v3623_v23 = vpop.permute.xlu0 %3622 }
 0x449   :  { %v4020_v39 = vmax.f32 %v3980_v38, %v4000_v5  ;;  %v4001_v16 = vadd.f32 %v8110_v7, %v3761_v19  ;;  %v3460_v10 = vadd.f32 %v3459_v31, %v8111_v27  ;;  %v3461_v44 = vpop.f32.mrb[105].mxu0  ;;  %v3983_v38 = vadd.f32 %v8123_v46, %v3743_v33  ;;  %v8124_v19 = vld [vmem:[#allocation41_spill] sm:$0xff]  ;;  %v8125_v31 = vld [vmem:[#allocation31_spill] sm:$0xff]  ;;  %v3628_v33 = vpop.permute.xlu1 %3627 }
 0x44a   :  { %v3462_v40 = vpop.f32.mrb[106].mxu0  ;;  %v3505_v5 = vmax.f32 %v3391_v17, 0.0  ;;  %v3744_v27 = vmul.f32 %v7503_v15, %v3504_v58  ;;  %v8134_v46 = vld [vmem:[#allocation51_spill] sm:$0xff] }
 0x44b   :  { %v4021_v24 = vmax.f32 %v3981_v47, %v4001_v16  ;;  %v3522_v56 = vmax.f32 %v3460_v10, 0.0  ;;  %v3463_v36 = vadd.f32 %v3462_v40, %v8115_v63  ;;  %v3464_v61 = vpop.f32.mrb[107].mxu0  ;;  %v8126_v47 = vld [vmem:[#allocation39_spill] sm:$0xff] }
 0x44c   :  { %v3984_v25 = vadd.f32 %v7530_v8, %v3744_v27 }
 0x44d   :  { %v3762_v18 = vmul.f32 %v8119_v59, %v3522_v56  ;;  %v3523_v22 = vmax.f32 %v3463_v36, 0.0  ;;  %v4043_v0 = vpack.c.bf16 %v4021_v24, %v4020_v39  ;;  %v8127_v39 = vld [vmem:[#allocation28_spill] sm:$0xff]  ;;  %v3399_v24 = vadd.f32 %v8130_v28, %v8129_v43 }
 0x44e   :  { %v3396_v7 = vadd.f32 %v8127_v39, %v8126_v47  ;;  %v8131_v56 = vld [vmem:[#allocation20_spill] sm:$0xff] }
 0x44f   :  { %v4002_v1 = vadd.f32 %v8121_v35, %v3762_v18  ;;  %v3763_v4 = vmul.f32 %v8122_v41, %v3523_v22  ;;  %4155 = vmatpush1.bf16.msra.mxu1 %v4043_v0  ;;  %v3745_v63 = vmul.f32 %v8131_v56, %v3505_v5  ;;  %v3507_v59 = vmax.f32 %v3399_v24, 0.0  ;;  %v3723_v35 = vpop.permute.xlu0 %3722  ;;  %v3728_v5 = vpop.permute.xlu1 %3727 }
 0x450   :  { %v3467_v20 = vpop.f32.mrb[108].mxu0  ;;  %4156 = vmatprep.subr.bf16.mxu1 %v7793_v49  ;;  %v3506_v37 = vmax.f32 %v3396_v7, 0.0 }
 0x451   :  { %v4022_v34 = vmax.f32 %v3982_v60, %v4002_v1  ;;  %v4003_v45 = vadd.f32 %v8124_v19, %v3763_v4  ;;  %v3468_v9 = vadd.f32 %v3467_v20, %v8125_v31  ;;  %v3469_v14 = vpop.f32.mrb[109].mxu0  ;;  %v3985_v22 = vadd.f32 %v7536_v21, %v3745_v63 }
 0x452   :  { %v3470_v16 = vpop.f32.mrb[110].mxu0  ;;  %v3746_v8 = vmul.f32 %v7589_v26, %v3506_v37  ;;  %v3747_v21 = vmul.f32 %v7593_v62, %v3507_v59  ;;  %v4834_v59 = vld [vmem:[%s7717_s5 + $0x30] ss:$8 sps:$4 sm:$0xff]  }
 0x453   :  { %v4023_v10 = vmax.f32 %v3983_v38, %v4003_v45  ;;  %v3524_v44 = vmax.f32 %v3468_v9, 0.0  ;;  %v3471_v51 = vadd.f32 %v3470_v16, %v8128_v53  ;;  %v3472_v40 = vpop.f32.mrb[111].mxu0  ;;  %v3863_v47 = vpop.permute.xlu0 %3862 }
 0x454   :  { %v3986_v26 = vadd.f32 %v7616_v50, %v3746_v8  ;;  %v3987_v39 = vadd.f32 %v7623_v54, %v3747_v21 }
 0x455   :  { %v3764_v36 = vmul.f32 %v7516_v3, %v3524_v44  ;;  %v3525_v61 = vmax.f32 %v3471_v51, 0.0  ;;  %v4044_v42 = vpack.c.bf16 %v4023_v10, %v4022_v34  ;;  %v3868_v10 = vpop.permute.xlu1 %3867 }
 0x457   :  { %v4004_v15 = vadd.f32 %v7545_v55, %v3764_v36  ;;  %v3765_v17 = vmul.f32 %v7521_v48, %v3525_v61  ;;  %4157 = vmatpush1.bf16.msra.mxu1 %v4044_v42  ;;  %v8133_v55 = vld [vmem:[#allocation35_spill] sm:$0xff]  ;;  %v3963_v24 = vpop.permute.xlu0 %3962 }
 0x458   :  { %v3475_v18 = vpop.f32.mrb[112].mxu0  ;;  %4158 = vmatprep.subr.bf16.mxu1 %v7793_v49  ;;  %v3404_v48 = vadd.f32 %v8133_v55, %v7560_v29 }
 0x459   :  { %v4024_v0 = vmax.f32 %v3984_v25, %v4004_v15  ;;  %v4005_v3 = vadd.f32 %v7551_v52, %v3765_v17  ;;  %v3476_v60 = vadd.f32 %v3475_v18, %v8132_v2  ;;  %v3477_v58 = vpop.f32.mrb[113].mxu0  ;;  %v8135_v52 = vld [vmem:[#allocation90_spill] sm:$0xff]  ;;  %v4829_v25 = vld [vmem:[%s7717_s5 + $0x24] ss:$8 sps:$4 sm:$0xff]  }
 0x45a   :  { %v3478_v1 = vpop.f32.mrb[114].mxu0  ;;  %v3407_v34 = vadd.f32 %v8135_v52, %v7566_v12  ;;  %v3508_v9 = vmax.f32 %v3404_v48, 0.0  ;;  %v4831_v15 = vld [vmem:[%s7717_s5 + $0x20] ss:$8 sps:$4 sm:$0xff]   ;;  %v4832_v17 = vld [vmem:[%s7717_s5 + $0x34] ss:$8 sps:$4 sm:$0xff]  }
 0x45b   :  { %v4025_v41 = vmax.f32 %v3985_v22, %v4005_v3  ;;  %v3526_v4 = vmax.f32 %v3476_v60, 0.0  ;;  %v3479_v38 = vadd.f32 %v3478_v1, %v8134_v46  ;;  %v3480_v20 = vpop.f32.mrb[115].mxu0  ;;  %v4835_v18 = vld [vmem:[%s7718_s7] sm:$0xff]   ;;  %v4059_v22 = vpop.permute.xlu0 %4058 }
 0x45c   :  { %v3509_v62 = vmax.f32 %v3407_v34, 0.0  ;;  %v3748_v50 = vmul.f32 %v3623_v23, %v3508_v9 }
 0x45d   :  { %v3766_v19 = vmul.f32 %v7602_v30, %v3526_v4  ;;  %v3527_v45 = vmax.f32 %v3479_v38, 0.0  ;;  %v4045_v31 = vpack.c.bf16 %v4025_v41, %v4024_v0 }
 0x45e   :  { %v3749_v40 = vmul.f32 %v3628_v33, %v3509_v62  ;;  %v3988_v56 = vadd.f32 %v3863_v47, %v3748_v50  ;;  %v4826_v33 = vld [vmem:[%s7717_s5 + $0x14] ss:$8 sps:$4 sm:$0xff]  }
 0x45f   :  { %v4006_v14 = vadd.f32 %v3953_v57, %v3766_v19  ;;  %v3767_v29 = vmul.f32 %v7607_v32, %v3527_v45  ;;  %4159 = vmatpush1.bf16.msra.mxu1 %v4045_v31  ;;  %v4069_v41 = vpop.permute.xlu0 %4068 }
 0x460   :  { %v3483_v7 = vpop.f32.mrb[116].mxu0  ;;  %4160 = vmatprep.subr.bf16.mxu1 %v7793_v49 }
 0x461   :  { %v4026_v16 = vmax.f32 %v3986_v26, %v4006_v14  ;;  %v4007_v12 = vadd.f32 %v3958_v11, %v3767_v29  ;;  %v3484_v30 = vadd.f32 %v3483_v7, %v7576_v6  ;;  %v3485_v27 = vpop.f32.mrb[117].mxu0  ;;  %v3968_v11 = vpop.permute.xlu1 %3967  ;;  %v3989_v6 = vadd.f32 %v3868_v10, %v3749_v40 }
 0x462   :  { %v3486_v44 = vpop.f32.mrb[118].mxu0 }
 0x463   :  { %v4027_v53 = vmax.f32 %v3987_v39, %v4007_v12  ;;  %v3528_v57 = vmax.f32 %v3484_v30, 0.0  ;;  %v3487_v32 = vadd.f32 %v3486_v44, %v7581_v13  ;;  %v3488_v51 = vpop.f32.mrb[119].mxu0  ;;  %v4823_v13 = vld [vmem:[%s7717_s5] ss:$8 sps:$4 sm:$0xff]   ;;  %v4079_v31 = vpop.permute.xlu0 %4078 }
 0x465   :  { %v3768_v43 = vmul.f32 %v3723_v35, %v3528_v57  ;;  %v3529_v54 = vmax.f32 %v3487_v32, 0.0  ;;  %v4046_v28 = vpack.c.bf16 %v4027_v53, %v4026_v16  ;;  %v4064_v60 = vpop.permute.xlu1 %4063 }
 0x467   :  { %v4008_v63 = vadd.f32 %v3963_v24, %v3768_v43  ;;  %v3769_v36 = vmul.f32 %v3728_v5, %v3529_v54  ;;  %4161 = vmatpush1.bf16.msra.mxu1 %v4046_v28  ;;  %v4089_v30 = vpop.permute.xlu0 %4088  ;;  %v4836_v54 = vld [vmem:[%s7718_s7 + $0x8] sm:$0xff]   ;;  %v4838_v28 = vmov 0.0  }
 0x468   :  { %4162 = vmatprep.subr.bf16.mxu1 %v7793_v49  ;;  %v4828_v49 = vld [vmem:[%s7717_s5 + $0x10] ss:$8 sps:$4 sm:$0xff]  }
 0x469   :  { %v4028_v61 = vmax.f32 %v3988_v56, %v4008_v63  ;;  %v4009_v23 = vadd.f32 %v3968_v11, %v3769_v36  ;;  %v4074_v20 = vpop.permute.xlu1 %4073 }
 0x46b   :  { %v4029_v42 = vmax.f32 %v3989_v6, %v4009_v23  ;;  %v4232_v24 = vpop.permute.xlu0 %4231 }
 0x46d   :  { %v4047_v37 = vpack.c.bf16 %v4029_v42, %v4028_v61  ;;  %v4084_v29 = vpop.permute.xlu1 %4083 }
 0x46f   :  { %4163 = vmatpush1.bf16.msra.mxu1 %v4047_v37  ;;  %v4242_v63 = vpop.permute.xlu0 %4241 }
 0x471   :  { %v4094_v50 = vpop.permute.xlu1 %4093 }
 0x472   :  { %4177 = vmatmul.mubr.bf16.vlgmr.msra.gmra.mrb[80].mxu1 %v4823_v13 }
 0x473   :  { %4549 = vmatprep.mubr.msk.bf16.mxu1 %vm1893_vm1, %v4826_v33 }
 0x475   :  { %v4237_v56 = vpop.permute.xlu1 %4236 }
 0x479   :  { %v4247_v61 = vpop.permute.xlu1 %4246 }
 0x47a   :  { %4185 = vmatmul.mubr.bf16.gmra.mrb[84].mxu1 %v4828_v49 }
 0x47b   :  { %4550 = vmatprep.mubr.msk.bf16.mxu1 %vm1893_vm1, %v4829_v25 }
 0x482   :  { %4193 = vmatmul.mubr.bf16.gmra.mrb[88].mxu1 %v4831_v15 }
 0x483   :  { %4551 = vmatprep.mubr.msk.bf16.mxu1 %vm1893_vm1, %v4832_v17 }
 0x48a   :  { %4201 = vmatmul.mubr.bf16.gmra.mrb[92].mxu1 %v4834_v59 }
 0x48b   :  { %4658 = vmatprep.mubr.msk.bf16.mxu1 %vm4259_vm2, %v4835_v18 }
 0x545   :  { %v4178_v0 = vpop.f32.mrb[80].mxu1 }
 0x546   :  { %v4179_v3 = vadd.f32 %v4178_v0, %v4059_v22  ;;  %v4180_v2 = vpop.f32.mrb[81].mxu1  ;;  %v4319_v22 = vld [vmem:[%s7719_s9] sm:$0x1]  ;;  %v4328_v0 = vlaneseq }
 0x547   :  { %v4181_v58 = vpop.f32.mrb[82].mxu1 }
 0x548   :  { %v4182_v35 = vadd.f32 %v4181_v58, %v4064_v60  ;;  %v4183_v8 = vpop.f32.mrb[83].mxu1  ;;  %v4209_v1 = vmax.f32 %v4179_v3, 0.0  ;;  %v4329_v3 = vshrl.u32 %v4328_v0, 7  ;;  %v4326_v60 = vpop.permute.xlu0 %4325 }
 0x54a   :  { %v4210_v55 = vmax.f32 %v4182_v35, 0.0  ;;  %v4330_v2 = vsub.s32 0, %v4329_v3 }
 0x54c   :  { %v4221_v48 = vpack.c.bf16 %v4210_v55, %v4209_v1  ;;  %v4331_v58 = vrot.slane %v4326_v60, %v4330_v2 }
 0x54d   :  { %v4186_v4 = vpop.f32.mrb[84].mxu1 }
 0x54e   :  { %v4187_v46 = vadd.f32 %v4186_v4, %v4069_v41  ;;  %v4188_v38 = vpop.f32.mrb[85].mxu1  ;;  %4650 = vmatprep.subr.bf16.mxu1 %v4221_v48 }
 0x54f   :  { %v4189_v5 = vpop.f32.mrb[86].mxu1  ;;  %4651 = vmatpush3.bf16.msra.mxu1 %v4221_v48 }
 0x550   :  { %v4190_v21 = vadd.f32 %v4189_v5, %v4074_v20  ;;  %v4191_v52 = vpop.f32.mrb[87].mxu1  ;;  %v4211_v34 = vmax.f32 %v4187_v46, 0.0 }
 0x552   :  { %v4212_v19 = vmax.f32 %v4190_v21, 0.0 }
 0x554   :  { %v4222_v45 = vpack.c.bf16 %v4212_v19, %v4211_v34 }
 0x555   :  { %v4194_v26 = vpop.f32.mrb[88].mxu1 }
 0x556   :  { %v4195_v9 = vadd.f32 %v4194_v26, %v4079_v31  ;;  %v4196_v14 = vpop.f32.mrb[89].mxu1  ;;  %4652 = vmatprep.subr.bf16.mxu1 %v4222_v45 }
 0x557   :  { %v4197_v47 = vpop.f32.mrb[90].mxu1  ;;  %4653 = vmatpush3.bf16.msra.mxu1 %v4222_v45 }
 0x558   :  { %v4198_v39 = vadd.f32 %v4197_v47, %v4084_v29  ;;  %v4199_v7 = vpop.f32.mrb[91].mxu1  ;;  %v4213_v62 = vmax.f32 %v4195_v9, 0.0 }
 0x55a   :  { %v4214_v16 = vmax.f32 %v4198_v39, 0.0 }
 0x55c   :  { %v4223_v12 = vpack.c.bf16 %v4214_v16, %v4213_v62 }
 0x55d   :  { %v4202_v27 = vpop.f32.mrb[92].mxu1 }
 0x55e   :  { %v4203_v10 = vadd.f32 %v4202_v27, %v4089_v30  ;;  %v4204_v44 = vpop.f32.mrb[93].mxu1  ;;  %4654 = vmatprep.subr.bf16.mxu1 %v4223_v12 }
 0x55f   :  { %v4205_v53 = vpop.f32.mrb[94].mxu1  ;;  %4655 = vmatpush3.bf16.msra.mxu1 %v4223_v12 }
 0x560   :  { %v4206_v57 = vadd.f32 %v4205_v53, %v4094_v50  ;;  %v4207_v32 = vpop.f32.mrb[95].mxu1  ;;  %v4215_v51 = vmax.f32 %v4203_v10, 0.0 }
 0x562   :  { %v4216_v40 = vmax.f32 %v4206_v57, 0.0 }
 0x564   :  { %v4224_v43 = vpack.c.bf16 %v4216_v40, %v4215_v51 }
 0x566   :  { %4656 = vmatprep.subr.bf16.mxu1 %v4224_v43 }
 0x567   :  { %4657 = vmatpush3.bf16.msra.mxu1 %v4224_v43 }
 0x568   :  { %4662 = vmatprep.subr.bf16.mxu1 %v4838_v28 }
 0x56a   :  { %4659 = vmatmul.mubr.msk.bf16.vlgmr.msra.gmra.mrb[96].mxu1 %vm4259_vm2, %v4836_v54 }
 0x56b   :  { %4666 = vmatprep.mubr.msk.bf16.mxu1 %vm4839_vm3, %v4838_v28 }
 0x63d   :  { %v4660_v36 = vpop.f32.mrb[96].mxu1 }
 0x63e   :  { %v4309_v11 = vadd.f32 %v4660_v36, %v4242_v63  ;;  %v4300_v6 = vpop.f32.mrb[97].mxu1 }
 0x63f   :  { %v4301_v23 = vadd.f32 %v4300_v6, %v4232_v24  ;;  %v4661_v42 = vpop.f32.mrb[98].mxu1 }
 0x640   :  { %v4312_v37 = vadd.f32 %v4661_v42, %v4247_v61  ;;  %v4303_v13 = vpop.f32.mrb[99].mxu1  ;;  %v4317_v49 = vmax.f32 %v4309_v11, 0.0 }
 0x641   :  { %v4304_v33 = vadd.f32 %v4303_v13, %v4237_v56  ;;  %v4315_v15 = vmax.f32 %v4301_v23, 0.0 }
 0x642   :  { %v4318_v25 = vmax.f32 %v4312_v37, 0.0 }
 0x643   :  { %v4316_v17 = vmax.f32 %v4304_v33, 0.0 }
 0x644   :  { %v4321_v59 = vpack.c.bf16 %v4318_v25, %v4317_v49 }
 0x645   :  { %v4320_v18 = vpack.c.bf16 %v4316_v17, %v4315_v15 }
 0x647   :  { %4663 = vmatpush3.bf16.msra.mxu1 %v4320_v18 }
 0x648   :  { %4664 = vmatprep.subr.bf16.mxu1 %v4838_v28 }
 0x64b   :  { %4665 = vmatpush3.bf16.msra.mxu1 %v4321_v59 }
 0x64e   :  { %4667 = vmatmul.mubr.msk.bf16.vlgmr.msra.gmra.mrb[100].mxu1 %vm1893_vm1, %v4319_v22 }
 0x721   :  { %v4369_v35 = vpop.f32.mrb[100].mxu1 }
 0x722   :  { %v4370_v8 = vadd.f32 %v4369_v35, %v4331_v58  ;;  %v4668_v1 = vpop.f32.mrb[101].mxu1 }
 0x723   :  { %v4372_v55 = vpop.f32.mrb[102].mxu1 }
 0x724   :  { %4375 = vst [vmem:[%s7720_s11] sm:$0x1] %v4370_v8  ;;  %v4669_v48 = vpop.f32.mrb[103].mxu1 }

</bundles_post_ra>
